<compile_context>
chip_gen: v7x
topology: tpu7x:2x2x1
jax: 0.10.0
libtpu: 0.0.40
codegen_flags: <defaults>
</compile_context>

<pallas_src>
import jax
import jax.numpy as jnp
from jax.experimental import pallas as pl
from jax.experimental.pallas import tpu as pltpu


def _round_up(x, m):
    return -(-x // m) * m


# ----------------------------------------------------------------------------
# Pallas kernels
# ----------------------------------------------------------------------------
def conv_pool_kernel(p_ref, w_ref, b_ref, o_ref):
    """Fused conv3x3(pad=1) + bias + ReLU + maxpool2x2 on a tile of M rows.

    p_ref: (4, TM, K)   bf16 im2col patches, corner-major / (batch*pooled-pixel)-minor
    w_ref: (K, 128)     bf16 flattened conv weights (Cout zero-padded to 128 lanes)
    b_ref: (1, 128)     f32 bias (zero-padded)
    o_ref: (TM, 128)    bf16 pooled activation tile
    """
    c4, tm, k = p_ref.shape
    coutp = w_ref.shape[1]
    # One long MXU push over all 4 pooling corners at once.
    z = jnp.dot(p_ref[...].reshape(c4 * tm, k), w_ref[...],
                preferred_element_type=jnp.float32)          # (4*TM, 128) f32
    z = z.reshape(c4, tm, coutp).max(axis=0)                 # corner max == 2x2 maxpool
    o_ref[...] = jnp.maximum(z + b_ref[...], 0.0).astype(o_ref.dtype)


def conv3_mlp_kernel(p_ref, wc_ref, bc_ref, w1_ref, b1_ref, w2_ref, b2_ref,
                     w3_ref, b3_ref, o_ref):
    """Fused conv3 (+ReLU +pool) -> fc1(ReLU) -> fc2(ReLU) -> fc3 for a batch tile.

    p_ref : (36, TN, 576)  bf16 conv3 im2col patches, (corner, pooled-pixel)-major, batch-minor
    wc_ref: (576, 128)     bf16 conv3 weights      bc_ref: (1, 128)  f32
    w1_ref: (9, 128, 256)  bf16 fc1 weights (HWC)  b1_ref: (1, 256)  f32
    w2_ref: (256, 128)     bf16 fc2 weights        b2_ref: (1, 128)  f32
    w3_ref: (128, 128)     bf16 fc3 weights (cols padded 10->128)   b3_ref: (1, 128) f32
    o_ref : (TN, 128)      f32 logits (cols 10..127 are padding)
    """
    c36, tn, k = p_ref.shape
    coutp = wc_ref.shape[1]
    # conv3: single GEMM over (4 corners x 9 pooled pixels x TN examples).
    z = jnp.dot(p_ref[...].reshape(c36 * tn, k), wc_ref[...],
                preferred_element_type=jnp.float32)          # (36*TN, 128)
    z = z.reshape(4, 9, tn, coutp).max(axis=0)               # (9, TN, 128) maxpool
    a = jnp.maximum(z + bc_ref[...], 0.0).astype(jnp.bfloat16)
    # fc1 over the flattened (9 * 128) HWC features, done as 9 accumulated matmuls.
    w1 = w1_ref[...]
    h = jnp.dot(a[0], w1[0], preferred_element_type=jnp.float32)
    for i in range(1, 9):
        h = h + jnp.dot(a[i], w1[i], preferred_element_type=jnp.float32)
    h = jnp.maximum(h + b1_ref[...], 0.0).astype(jnp.bfloat16)               # (TN, 256)
    h = jnp.dot(h, w2_ref[...], preferred_element_type=jnp.float32) + b2_ref[...]
    h = jnp.maximum(h, 0.0).astype(jnp.bfloat16)                             # (TN, 128)
    o_ref[...] = jnp.dot(h, w3_ref[...], preferred_element_type=jnp.float32) + b3_ref[...]


# ----------------------------------------------------------------------------
# Glue (pure data rearrangement in bf16, no hot-path compute)
# ----------------------------------------------------------------------------
def _pool_corner_patches(x_nhwc):
    """(N,H,W,C) -> (4, N, H//2, W//2, 9*C) im2col patches for the 4 pool corners."""
    n, h, w, c = x_nhwc.shape
    h2, w2 = h // 2, w // 2
    xp = jnp.pad(x_nhwc, ((0, 0), (1, 1), (1, 1), (0, 0)))
    # tap order: (kh, kw) row-major, each tap contributes C channels (matches HWIO reshape)
    taps = [xp[:, dy:dy + h, dx:dx + w, :] for dy in range(3) for dx in range(3)]
    patches = jnp.concatenate(taps, axis=-1)                       # (N, H, W, 9C)
    corners = [patches[:, i:2 * h2:2, j:2 * w2:2, :] for i in range(2) for j in range(2)]
    return jnp.stack(corners, axis=0)                              # (4, N, H2, W2, 9C)


def conv_relu_pool(x_nhwc, w_hwio, b, *, tm_max=256):
    """One conv3x3(pad=1)+ReLU+maxpool2x2 layer as a single batch-flattened Pallas GEMM."""
    n, h, w, cin = x_nhwc.shape
    cout = w_hwio.shape[-1]
    h2, w2 = h // 2, w // 2
    k = 9 * cin
    kp = _round_up(k, 16)
    coutp = _round_up(cout, 128)

    p5 = _pool_corner_patches(x_nhwc.astype(jnp.bfloat16))          # (4, N, H2, W2, K)
    p = p5.reshape(4, n * h2 * w2, k)                               # batch folded into M
    if kp != k:
        p = jnp.pad(p, ((0, 0), (0, 0), (0, kp - k)))

    wmat = w_hwio.reshape(k, cout).astype(jnp.bfloat16)
    wmat = jnp.pad(wmat, ((0, kp - k), (0, coutp - cout)))          # lane-dense Cout
    bvec = jnp.pad(b.astype(jnp.float32), (0, coutp - cout)).reshape(1, coutp)

    mtot = n * h2 * w2
    tm = min(tm_max, _round_up(mtot, 128))
    mpad = _round_up(mtot, tm)
    if mpad != mtot:
        p = jnp.pad(p, ((0, 0), (0, mpad - mtot), (0, 0)))

    out = pl.pallas_call(
        conv_pool_kernel,
        out_shape=jax.ShapeDtypeStruct((mpad, coutp), jnp.bfloat16),
        grid=(mpad // tm,),
        in_specs=[
            pl.BlockSpec((4, tm, kp), lambda i: (0, i, 0)),
            pl.BlockSpec((kp, coutp), lambda i: (0, 0)),
            pl.BlockSpec((1, coutp), lambda i: (0, 0)),
        ],
        out_specs=pl.BlockSpec((tm, coutp), lambda i: (i, 0)),
        compiler_params=pltpu.CompilerParams(dimension_semantics=("parallel",)),
    )(p, wmat, bvec)
    # drop row padding + lane padding, restore NHWC for the next layer's im2col
    return out[:mtot, :cout].reshape(n, h2, w2, cout)


def conv3_mlp_head(x_nhwc, params, *, tn_max=128):
    """Fused conv3(+ReLU+pool) + fc1/fc2/fc3 head in a single pallas_call."""
    n, _, _, cin = x_nhwc.shape                                     # (N, 7, 7, 64)
    k = 9 * cin                                                      # 576

    p5 = _pool_corner_patches(x_nhwc.astype(jnp.bfloat16))          # (4, N, 3, 3, 576)
    # (corner, pooled-pixel)-major, batch-minor rows -> contiguous per-position slabs
    p = jnp.transpose(p5, (0, 2, 3, 1, 4)).reshape(36, n, k)

    npad0 = _round_up(n, 16)
    tn = min(tn_max, npad0)
    npad = _round_up(n, tn)
    if npad != n:
        p = jnp.pad(p, ((0, 0), (0, npad - n), (0, 0)))

    wc = params["conv3_w"].reshape(k, 128).astype(jnp.bfloat16)
    bc = params["conv3_b"].astype(jnp.float32).reshape(1, 128)
    w1 = params["fc1_w"].reshape(9, 128, 256).astype(jnp.bfloat16)   # HWC row order
    b1 = params["fc1_b"].astype(jnp.float32).reshape(1, 256)
    w2 = params["fc2_w"].astype(jnp.bfloat16)
    b2 = params["fc2_b"].astype(jnp.float32).reshape(1, 128)
    w3 = jnp.pad(params["fc3_w"].astype(jnp.bfloat16), ((0, 0), (0, 128 - 10)))
    b3 = jnp.pad(params["fc3_b"].astype(jnp.float32), (0, 128 - 10)).reshape(1, 128)

    out = pl.pallas_call(
        conv3_mlp_kernel,
        out_shape=jax.ShapeDtypeStruct((npad, 128), jnp.float32),
        grid=(npad // tn,),
        in_specs=[
            pl.BlockSpec((36, tn, k), lambda i: (0, i, 0)),
            pl.BlockSpec((k, 128), lambda i: (0, 0)),
            pl.BlockSpec((1, 128), lambda i: (0, 0)),
            pl.BlockSpec((9, 128, 256), lambda i: (0, 0, 0)),
            pl.BlockSpec((1, 256), lambda i: (0, 0)),
            pl.BlockSpec((256, 128), lambda i: (0, 0)),
            pl.BlockSpec((1, 128), lambda i: (0, 0)),
            pl.BlockSpec((128, 128), lambda i: (0, 0)),
            pl.BlockSpec((1, 128), lambda i: (0, 0)),
        ],
        out_specs=pl.BlockSpec((tn, 128), lambda i: (i, 0)),
        compiler_params=pltpu.CompilerParams(dimension_semantics=("parallel",)),
    )(p, wc, bc, w1, b1, w2, b2, w3, b3)
    return out[:n, :10]


# ----------------------------------------------------------------------------
# Full forward pass
# ----------------------------------------------------------------------------
@jax.jit
def net_forward(x_nchw, params):
    # NCHW (PyTorch) -> NHWC (kernel layout)
    x = jnp.transpose(x_nchw, (0, 2, 3, 1)).astype(jnp.float32)     # (N, 28, 28, 1)
    x = conv_relu_pool(x, params["conv1_w"], params["conv1_b"])     # (N, 14, 14, 32)
    x = conv_relu_pool(x, params["conv2_w"], params["conv2_b"])     # (N, 7, 7, 64)
    # dropout1 / dropout2: identity at inference (eval mode)
    return conv3_mlp_head(x, params)                                # (N, 10)


def init_params(key):
    ks = jax.random.split(key, 12)

    def w(k, shape, fan_in):
        return (jax.random.normal(k, shape, jnp.float32) / jnp.sqrt(float(fan_in))).astype(jnp.float32)

    def b(k, m):
        return (jax.random.normal(k, (m,), jnp.float32) * 0.01).astype(jnp.float32)

    return {
        "conv1_w": w(ks[0], (3, 3, 1, 32), 9 * 1),       # HWIO
        "conv1_b": b(ks[1], 32),
        "conv2_w": w(ks[2], (3, 3, 32, 64), 9 * 32),
        "conv2_b": b(ks[3], 64),
        "conv3_w": w(ks[4], (3, 3, 64, 128), 9 * 64),
        "conv3_b": b(ks[5], 128),
        # fc1_w rows are in HWC order (row = (h*3+w)*128 + c); PyTorch's CHW-flatten
        # weights need a one-time row permutation when imported.
        "fc1_w": w(ks[6], (128 * 3 * 3, 256), 128 * 3 * 3),
        "fc1_b": b(ks[7], 256),
        "fc2_w": w(ks[8], (256, 128), 256),
        "fc2_b": b(ks[9], 128),
        "fc3_w": w(ks[10], (128, 10), 128),
        "fc3_b": b(ks[11], 10),
    }


if __name__ == "__main__":
    key = jax.random.PRNGKey(0)
    pkey, xkey = jax.random.split(key)
    params = init_params(pkey)
    # Fashion-MNIST-shaped input: batch=2, 1 channel, 28x28 (28x28 required by fc1 = 128*3*3)
    x = jax.random.normal(xkey, (2, 1, 28, 28), dtype=jnp.float32)

    logits = net_forward(x, params)
    logits = jax.block_until_ready(logits)
    assert logits.shape == (2, 10), logits.shape
    assert bool(jnp.all(jnp.isfinite(logits)))
    print("KERNEL_OK")
</pallas_src>

<mosaic_0001>
module attributes {stable_mosaic.version = 11 : i64} {
  func.func @conv_pool_kernel(%arg0: i32, %arg1: memref<4x256x16xbf16, #tpu.memory_space<vmem>>, %arg2: memref<16x128xbf16, #tpu.memory_space<vmem>>, %arg3: memref<1x128xf32, #tpu.memory_space<vmem>>, %arg4: memref<256x128xbf16, #tpu.memory_space<vmem>>) attributes {dimension_semantics = [#tpu.dimension_semantics<parallel>], iteration_bounds = array<i64: 2>, scalar_prefetch = 0 : i64, scratch_operands = 0 : i64, tpu.core_type = #tpu.core_type<tc>, window_params = [{transform_indices = @transform_0, window_bounds = array<i64: 4, 256, 16>}, {pipeline_mode = #tpu.pipeline_mode<synchronous>, transform_indices = @transform_1, window_bounds = array<i64: 16, 128>}, {pipeline_mode = #tpu.pipeline_mode<synchronous>, transform_indices = @transform_2, window_bounds = array<i64: 1, 128>}, {transform_indices = @transform_3, window_bounds = array<i64: 256, 128>}]} {
    %c0 = arith.constant 0 : index
    %c0_0 = arith.constant 0 : index
    %c0_1 = arith.constant 0 : index
    %0 = vector.load %arg1[%c0, %c0_0, %c0_1] : memref<4x256x16xbf16, #tpu.memory_space<vmem>>, vector<4x256x16xbf16>
    %1 = vector.shape_cast %0 : vector<4x256x16xbf16> to vector<1024x16xbf16>
    %c0_2 = arith.constant 0 : index
    %c0_3 = arith.constant 0 : index
    %2 = vector.load %arg2[%c0_2, %c0_3] : memref<16x128xbf16, #tpu.memory_space<vmem>>, vector<16x128xbf16>
    %cst = arith.constant dense<0.000000e+00> : vector<1024x128xf32>
    %3 = tpu.matmul %1, %2, %cst {dimension_numbers = #tpu.dot_dimension_numbers<[1], [0], [0], [1], [0, 0, 1, 1], [], []>} : vector<1024x16xbf16>, vector<16x128xbf16>, vector<1024x128xf32> -> vector<1024x128xf32>
    %4 = vector.shape_cast %3 : vector<1024x128xf32> to vector<4x256x128xf32>
    %cst_4 = arith.constant dense<0xFF800000> : vector<256x128xf32>
    %5 = vector.multi_reduction <maximumf>, %4, %cst_4 [0] : vector<4x256x128xf32> to vector<256x128xf32>
    %c0_5 = arith.constant 0 : index
    %c0_6 = arith.constant 0 : index
    %6 = vector.load %arg3[%c0_5, %c0_6] : memref<1x128xf32, #tpu.memory_space<vmem>>, vector<1x128xf32>
    %7 = vector.broadcast %6 : vector<1x128xf32> to vector<256x128xf32>
    %8 = arith.addf %5, %7 : vector<256x128xf32>
    %cst_7 = arith.constant 0.000000e+00 : f32
    %9 = vector.broadcast %cst_7 : f32 to vector<256x128xf32>
    %10 = arith.maximumf %8, %9 : vector<256x128xf32>
    %11 = arith.truncf %10 : vector<256x128xf32> to vector<256x128xbf16>
    %c0_8 = arith.constant 0 : index
    %c0_9 = arith.constant 0 : index
    %12 = vector.load %arg4[%c0_8, %c0_9] : memref<256x128xbf16, #tpu.memory_space<vmem>>, vector<256x128xbf16>
    tpu.vector_store %arg4[%c0_8, %c0_9], %11 {strides = array<i32>} : memref<256x128xbf16, #tpu.memory_space<vmem>>, vector<256x128xbf16>,
    return
  }
  func.func @transform_0(%arg0: i32) -> (i32, i32, i32) {
    %c0_i32 = arith.constant 0 : i32
    %c0_i32_0 = arith.constant 0 : i32
    %c0_i32_1 = arith.constant 0 : i32
    return %c0_i32, %arg0, %c0_i32_0 : i32, i32, i32
  }
  func.func @transform_1(%arg0: i32) -> (i32, i32) {
    %c0_i32 = arith.constant 0 : i32
    %c0_i32_0 = arith.constant 0 : i32
    %c0_i32_1 = arith.constant 0 : i32
    return %c0_i32, %c0_i32_0 : i32, i32
  }
  func.func @transform_2(%arg0: i32) -> (i32, i32) {
    %c0_i32 = arith.constant 0 : i32
    %c0_i32_0 = arith.constant 0 : i32
    %c0_i32_1 = arith.constant 0 : i32
    return %c0_i32, %c0_i32_0 : i32, i32
  }
  func.func @transform_3(%arg0: i32) -> (i32, i32) {
    %c0_i32 = arith.constant 0 : i32
    %c0_i32_0 = arith.constant 0 : i32
    return %arg0, %c0_i32 : i32, i32
  }
}

module attributes {stable_mosaic.version = 11 : i64} {
  func.func @conv_pool_kernel(%arg0: i32, %arg1: memref<4x128x288xbf16, #tpu.memory_space<vmem>>, %arg2: memref<288x128xbf16, #tpu.memory_space<vmem>>, %arg3: memref<1x128xf32, #tpu.memory_space<vmem>>, %arg4: memref<128x128xbf16, #tpu.memory_space<vmem>>) attributes {dimension_semantics = [#tpu.dimension_semantics<parallel>], iteration_bounds = array<i64: 1>, scalar_prefetch = 0 : i64, scratch_operands = 0 : i64, tpu.core_type = #tpu.core_type<tc>, window_params = [{transform_indices = @transform_0, window_bounds = array<i64: 4, 128, 288>}, {pipeline_mode = #tpu.pipeline_mode<synchronous>, transform_indices = @transform_1, window_bounds = array<i64: 288, 128>}, {pipeline_mode = #tpu.pipeline_mode<synchronous>, transform_indices = @transform_2, window_bounds = array<i64: 1, 128>}, {transform_indices = @transform_3, window_bounds = array<i64: 128, 128>}]} {
    %c0 = arith.constant 0 : index
    %c0_0 = arith.constant 0 : index
    %c0_1 = arith.constant 0 : index
    %0 = vector.load %arg1[%c0, %c0_0, %c0_1] : memref<4x128x288xbf16, #tpu.memory_space<vmem>>, vector<4x128x288xbf16>
    %1 = vector.shape_cast %0 : vector<4x128x288xbf16> to vector<512x288xbf16>
    %c0_2 = arith.constant 0 : index
    %c0_3 = arith.constant 0 : index
    %2 = vector.load %arg2[%c0_2, %c0_3] : memref<288x128xbf16, #tpu.memory_space<vmem>>, vector<288x128xbf16>
    %cst = arith.constant dense<0.000000e+00> : vector<512x128xf32>
    %3 = tpu.matmul %1, %2, %cst {dimension_numbers = #tpu.dot_dimension_numbers<[1], [0], [0], [1], [0, 0, 1, 1], [], []>} : vector<512x288xbf16>, vector<288x128xbf16>, vector<512x128xf32> -> vector<512x128xf32>
    %4 = vector.shape_cast %3 : vector<512x128xf32> to vector<4x128x128xf32>
    %cst_4 = arith.constant dense<0xFF800000> : vector<128x128xf32>
    %5 = vector.multi_reduction <maximumf>, %4, %cst_4 [0] : vector<4x128x128xf32> to vector<128x128xf32>
    %c0_5 = arith.constant 0 : index
    %c0_6 = arith.constant 0 : index
    %6 = vector.load %arg3[%c0_5, %c0_6] : memref<1x128xf32, #tpu.memory_space<vmem>>, vector<1x128xf32>
    %7 = vector.broadcast %6 : vector<1x128xf32> to vector<128x128xf32>
    %8 = arith.addf %5, %7 : vector<128x128xf32>
    %cst_7 = arith.constant 0.000000e+00 : f32
    %9 = vector.broadcast %cst_7 : f32 to vector<128x128xf32>
    %10 = arith.maximumf %8, %9 : vector<128x128xf32>
    %11 = arith.truncf %10 : vector<128x128xf32> to vector<128x128xbf16>
    %c0_8 = arith.constant 0 : index
    %c0_9 = arith.constant 0 : index
    %12 = vector.load %arg4[%c0_8, %c0_9] : memref<128x128xbf16, #tpu.memory_space<vmem>>, vector<128x128xbf16>
    tpu.vector_store %arg4[%c0_8, %c0_9], %11 {strides = array<i32>} : memref<128x128xbf16, #tpu.memory_space<vmem>>, vector<128x128xbf16>,
    return
  }
  func.func @transform_0(%arg0: i32) -> (i32, i32, i32) {
    %c0_i32 = arith.constant 0 : i32
    %c0_i32_0 = arith.constant 0 : i32
    %c0_i32_1 = arith.constant 0 : i32
    return %c0_i32, %arg0, %c0_i32_0 : i32, i32, i32
  }
  func.func @transform_1(%arg0: i32) -> (i32, i32) {
    %c0_i32 = arith.constant 0 : i32
    %c0_i32_0 = arith.constant 0 : i32
    %c0_i32_1 = arith.constant 0 : i32
    return %c0_i32, %c0_i32_0 : i32, i32
  }
  func.func @transform_2(%arg0: i32) -> (i32, i32) {
    %c0_i32 = arith.constant 0 : i32
    %c0_i32_0 = arith.constant 0 : i32
    %c0_i32_1 = arith.constant 0 : i32
    return %c0_i32, %c0_i32_0 : i32, i32
  }
  func.func @transform_3(%arg0: i32) -> (i32, i32) {
    %c0_i32 = arith.constant 0 : i32
    %c0_i32_0 = arith.constant 0 : i32
    return %arg0, %c0_i32 : i32, i32
  }
}

module attributes {stable_mosaic.version = 11 : i64} {
  func.func @conv3_mlp_kernel(%arg0: i32, %arg1: memref<36x16x576xbf16, #tpu.memory_space<vmem>>, %arg2: memref<576x128xbf16, #tpu.memory_space<vmem>>, %arg3: memref<1x128xf32, #tpu.memory_space<vmem>>, %arg4: memref<9x128x256xbf16, #tpu.memory_space<vmem>>, %arg5: memref<1x256xf32, #tpu.memory_space<vmem>>, %arg6: memref<256x128xbf16, #tpu.memory_space<vmem>>, %arg7: memref<1x128xf32, #tpu.memory_space<vmem>>, %arg8: memref<128x128xbf16, #tpu.memory_space<vmem>>, %arg9: memref<1x128xf32, #tpu.memory_space<vmem>>, %arg10: memref<16x128xf32, #tpu.memory_space<vmem>>) attributes {dimension_semantics = [#tpu.dimension_semantics<parallel>], iteration_bounds = array<i64: 1>, scalar_prefetch = 0 : i64, scratch_operands = 0 : i64, tpu.core_type = #tpu.core_type<tc>, window_params = [{transform_indices = @transform_0, window_bounds = array<i64: 36, 16, 576>}, {pipeline_mode = #tpu.pipeline_mode<synchronous>, transform_indices = @transform_1, window_bounds = array<i64: 576, 128>}, {pipeline_mode = #tpu.pipeline_mode<synchronous>, transform_indices = @transform_2, window_bounds = array<i64: 1, 128>}, {pipeline_mode = #tpu.pipeline_mode<synchronous>, transform_indices = @transform_3, window_bounds = array<i64: 9, 128, 256>}, {pipeline_mode = #tpu.pipeline_mode<synchronous>, transform_indices = @transform_4, window_bounds = array<i64: 1, 256>}, {pipeline_mode = #tpu.pipeline_mode<synchronous>, transform_indices = @transform_5, window_bounds = array<i64: 256, 128>}, {pipeline_mode = #tpu.pipeline_mode<synchronous>, transform_indices = @transform_6, window_bounds = array<i64: 1, 128>}, {pipeline_mode = #tpu.pipeline_mode<synchronous>, transform_indices = @transform_7, window_bounds = array<i64: 128, 128>}, {pipeline_mode = #tpu.pipeline_mode<synchronous>, transform_indices = @transform_8, window_bounds = array<i64: 1, 128>}, {transform_indices = @transform_9, window_bounds = array<i64: 16, 128>}]} {
    %c0 = arith.constant 0 : index
    %c0_0 = arith.constant 0 : index
    %c0_1 = arith.constant 0 : index
    %0 = vector.load %arg1[%c0, %c0_0, %c0_1] : memref<36x16x576xbf16, #tpu.memory_space<vmem>>, vector<36x16x576xbf16>
    %1 = vector.shape_cast %0 : vector<36x16x576xbf16> to vector<576x576xbf16>
    %c0_2 = arith.constant 0 : index
    %c0_3 = arith.constant 0 : index
    %2 = vector.load %arg2[%c0_2, %c0_3] : memref<576x128xbf16, #tpu.memory_space<vmem>>, vector<576x128xbf16>
    %cst = arith.constant dense<0.000000e+00> : vector<576x128xf32>
    %3 = tpu.matmul %1, %2, %cst {dimension_numbers = #tpu.dot_dimension_numbers<[1], [0], [0], [1], [0, 0, 1, 1], [], []>} : vector<576x576xbf16>, vector<576x128xbf16>, vector<576x128xf32> -> vector<576x128xf32>
    %4 = vector.shape_cast %3 : vector<576x128xf32> to vector<4x9x16x128xf32>
    %cst_4 = arith.constant dense<0xFF800000> : vector<9x16x128xf32>
    %5 = vector.multi_reduction <maximumf>, %4, %cst_4 [0] : vector<4x9x16x128xf32> to vector<9x16x128xf32>
    %c0_5 = arith.constant 0 : index
    %c0_6 = arith.constant 0 : index
    %6 = vector.load %arg3[%c0_5, %c0_6] : memref<1x128xf32, #tpu.memory_space<vmem>>, vector<1x128xf32>
    %7 = vector.shape_cast %6 : vector<1x128xf32> to vector<1x1x128xf32>
    %8 = vector.broadcast %7 : vector<1x1x128xf32> to vector<9x16x128xf32>
    %9 = arith.addf %5, %8 : vector<9x16x128xf32>
    %cst_7 = arith.constant 0.000000e+00 : f32
    %10 = vector.broadcast %cst_7 : f32 to vector<9x16x128xf32>
    %11 = arith.maximumf %9, %10 : vector<9x16x128xf32>
    %12 = arith.truncf %11 : vector<9x16x128xf32> to vector<9x16x128xbf16>
    %c0_8 = arith.constant 0 : index
    %c0_9 = arith.constant 0 : index
    %c0_10 = arith.constant 0 : index
    %13 = vector.load %arg4[%c0_8, %c0_9, %c0_10] : memref<9x128x256xbf16, #tpu.memory_space<vmem>>, vector<9x128x256xbf16>
    %14 = vector.extract_strided_slice %12 {offsets = [0, 0, 0], sizes = [1, 16, 128], strides = [1, 1, 1]} : vector<9x16x128xbf16> to vector<1x16x128xbf16>
    %15 = vector.shape_cast %14 : vector<1x16x128xbf16> to vector<16x128xbf16>
    %16 = vector.extract_strided_slice %13 {offsets = [0, 0, 0], sizes = [1, 128, 256], strides = [1, 1, 1]} : vector<9x128x256xbf16> to vector<1x128x256xbf16>
    %17 = vector.shape_cast %16 : vector<1x128x256xbf16> to vector<128x256xbf16>
    %cst_11 = arith.constant dense<0.000000e+00> : vector<16x256xf32>
    %18 = tpu.matmul %15, %17, %cst_11 {dimension_numbers = #tpu.dot_dimension_numbers<[1], [0], [0], [1], [0, 0, 1, 1], [], []>} : vector<16x128xbf16>, vector<128x256xbf16>, vector<16x256xf32> -> vector<16x256xf32>
    %19 = vector.extract_strided_slice %12 {offsets = [1, 0, 0], sizes = [1, 16, 128], strides = [1, 1, 1]} : vector<9x16x128xbf16> to vector<1x16x128xbf16>
    %20 = vector.shape_cast %19 : vector<1x16x128xbf16> to vector<16x128xbf16>
    %21 = vector.extract_strided_slice %13 {offsets = [1, 0, 0], sizes = [1, 128, 256], strides = [1, 1, 1]} : vector<9x128x256xbf16> to vector<1x128x256xbf16>
    %22 = vector.shape_cast %21 : vector<1x128x256xbf16> to vector<128x256xbf16>
    %cst_12 = arith.constant dense<0.000000e+00> : vector<16x256xf32>
    %23 = tpu.matmul %20, %22, %cst_12 {dimension_numbers = #tpu.dot_dimension_numbers<[1], [0], [0], [1], [0, 0, 1, 1], [], []>} : vector<16x128xbf16>, vector<128x256xbf16>, vector<16x256xf32> -> vector<16x256xf32>
    %24 = arith.addf %18, %23 : vector<16x256xf32>
    %25 = vector.extract_strided_slice %12 {offsets = [2, 0, 0], sizes = [1, 16, 128], strides = [1, 1, 1]} : vector<9x16x128xbf16> to vector<1x16x128xbf16>
    %26 = vector.shape_cast %25 : vector<1x16x128xbf16> to vector<16x128xbf16>
    %27 = vector.extract_strided_slice %13 {offsets = [2, 0, 0], sizes = [1, 128, 256], strides = [1, 1, 1]} : vector<9x128x256xbf16> to vector<1x128x256xbf16>
    %28 = vector.shape_cast %27 : vector<1x128x256xbf16> to vector<128x256xbf16>
    %cst_13 = arith.constant dense<0.000000e+00> : vector<16x256xf32>
    %29 = tpu.matmul %26, %28, %cst_13 {dimension_numbers = #tpu.dot_dimension_numbers<[1], [0], [0], [1], [0, 0, 1, 1], [], []>} : vector<16x128xbf16>, vector<128x256xbf16>, vector<16x256xf32> -> vector<16x256xf32>
    %30 = arith.addf %24, %29 : vector<16x256xf32>
    %31 = vector.extract_strided_slice %12 {offsets = [3, 0, 0], sizes = [1, 16, 128], strides = [1, 1, 1]} : vector<9x16x128xbf16> to vector<1x16x128xbf16>
    %32 = vector.shape_cast %31 : vector<1x16x128xbf16> to vector<16x128xbf16>
    %33 = vector.extract_strided_slice %13 {offsets = [3, 0, 0], sizes = [1, 128, 256], strides = [1, 1, 1]} : vector<9x128x256xbf16> to vector<1x128x256xbf16>
    %34 = vector.shape_cast %33 : vector<1x128x256xbf16> to vector<128x256xbf16>
    %cst_14 = arith.constant dense<0.000000e+00> : vector<16x256xf32>
    %35 = tpu.matmul %32, %34, %cst_14 {dimension_numbers = #tpu.dot_dimension_numbers<[1], [0], [0], [1], [0, 0, 1, 1], [], []>} : vector<16x128xbf16>, vector<128x256xbf16>, vector<16x256xf32> -> vector<16x256xf32>
    %36 = arith.addf %30, %35 : vector<16x256xf32>
    %37 = vector.extract_strided_slice %12 {offsets = [4, 0, 0], sizes = [1, 16, 128], strides = [1, 1, 1]} : vector<9x16x128xbf16> to vector<1x16x128xbf16>
    %38 = vector.shape_cast %37 : vector<1x16x128xbf16> to vector<16x128xbf16>
    %39 = vector.extract_strided_slice %13 {offsets = [4, 0, 0], sizes = [1, 128, 256], strides = [1, 1, 1]} : vector<9x128x256xbf16> to vector<1x128x256xbf16>
    %40 = vector.shape_cast %39 : vector<1x128x256xbf16> to vector<128x256xbf16>
    %cst_15 = arith.constant dense<0.000000e+00> : vector<16x256xf32>
    %41 = tpu.matmul %38, %40, %cst_15 {dimension_numbers = #tpu.dot_dimension_numbers<[1], [0], [0], [1], [0, 0, 1, 1], [], []>} : vector<16x128xbf16>, vector<128x256xbf16>, vector<16x256xf32> -> vector<16x256xf32>
    %42 = arith.addf %36, %41 : vector<16x256xf32>
    %43 = vector.extract_strided_slice %12 {offsets = [5, 0, 0], sizes = [1, 16, 128], strides = [1, 1, 1]} : vector<9x16x128xbf16> to vector<1x16x128xbf16>
    %44 = vector.shape_cast %43 : vector<1x16x128xbf16> to vector<16x128xbf16>
    %45 = vector.extract_strided_slice %13 {offsets = [5, 0, 0], sizes = [1, 128, 256], strides = [1, 1, 1]} : vector<9x128x256xbf16> to vector<1x128x256xbf16>
    %46 = vector.shape_cast %45 : vector<1x128x256xbf16> to vector<128x256xbf16>
    %cst_16 = arith.constant dense<0.000000e+00> : vector<16x256xf32>
    %47 = tpu.matmul %44, %46, %cst_16 {dimension_numbers = #tpu.dot_dimension_numbers<[1], [0], [0], [1], [0, 0, 1, 1], [], []>} : vector<16x128xbf16>, vector<128x256xbf16>, vector<16x256xf32> -> vector<16x256xf32>
    %48 = arith.addf %42, %47 : vector<16x256xf32>
    %49 = vector.extract_strided_slice %12 {offsets = [6, 0, 0], sizes = [1, 16, 128], strides = [1, 1, 1]} : vector<9x16x128xbf16> to vector<1x16x128xbf16>
    %50 = vector.shape_cast %49 : vector<1x16x128xbf16> to vector<16x128xbf16>
    %51 = vector.extract_strided_slice %13 {offsets = [6, 0, 0], sizes = [1, 128, 256], strides = [1, 1, 1]} : vector<9x128x256xbf16> to vector<1x128x256xbf16>
    %52 = vector.shape_cast %51 : vector<1x128x256xbf16> to vector<128x256xbf16>
    %cst_17 = arith.constant dense<0.000000e+00> : vector<16x256xf32>
    %53 = tpu.matmul %50, %52, %cst_17 {dimension_numbers = #tpu.dot_dimension_numbers<[1], [0], [0], [1], [0, 0, 1, 1], [], []>} : vector<16x128xbf16>, vector<128x256xbf16>, vector<16x256xf32> -> vector<16x256xf32>
    %54 = arith.addf %48, %53 : vector<16x256xf32>
    %55 = vector.extract_strided_slice %12 {offsets = [7, 0, 0], sizes = [1, 16, 128], strides = [1, 1, 1]} : vector<9x16x128xbf16> to vector<1x16x128xbf16>
    %56 = vector.shape_cast %55 : vector<1x16x128xbf16> to vector<16x128xbf16>
    %57 = vector.extract_strided_slice %13 {offsets = [7, 0, 0], sizes = [1, 128, 256], strides = [1, 1, 1]} : vector<9x128x256xbf16> to vector<1x128x256xbf16>
    %58 = vector.shape_cast %57 : vector<1x128x256xbf16> to vector<128x256xbf16>
    %cst_18 = arith.constant dense<0.000000e+00> : vector<16x256xf32>
    %59 = tpu.matmul %56, %58, %cst_18 {dimension_numbers = #tpu.dot_dimension_numbers<[1], [0], [0], [1], [0, 0, 1, 1], [], []>} : vector<16x128xbf16>, vector<128x256xbf16>, vector<16x256xf32> -> vector<16x256xf32>
    %60 = arith.addf %54, %59 : vector<16x256xf32>
    %61 = vector.extract_strided_slice %12 {offsets = [8, 0, 0], sizes = [1, 16, 128], strides = [1, 1, 1]} : vector<9x16x128xbf16> to vector<1x16x128xbf16>
    %62 = vector.shape_cast %61 : vector<1x16x128xbf16> to vector<16x128xbf16>
    %63 = vector.extract_strided_slice %13 {offsets = [8, 0, 0], sizes = [1, 128, 256], strides = [1, 1, 1]} : vector<9x128x256xbf16> to vector<1x128x256xbf16>
    %64 = vector.shape_cast %63 : vector<1x128x256xbf16> to vector<128x256xbf16>
    %cst_19 = arith.constant dense<0.000000e+00> : vector<16x256xf32>
    %65 = tpu.matmul %62, %64, %cst_19 {dimension_numbers = #tpu.dot_dimension_numbers<[1], [0], [0], [1], [0, 0, 1, 1], [], []>} : vector<16x128xbf16>, vector<128x256xbf16>, vector<16x256xf32> -> vector<16x256xf32>
    %66 = arith.addf %60, %65 : vector<16x256xf32>
    %c0_20 = arith.constant 0 : index
    %c0_21 = arith.constant 0 : index
    %67 = vector.load %arg5[%c0_20, %c0_21] : memref<1x256xf32, #tpu.memory_space<vmem>>, vector<1x256xf32>
    %68 = vector.broadcast %67 : vector<1x256xf32> to vector<16x256xf32>
    %69 = arith.addf %66, %68 : vector<16x256xf32>
    %cst_22 = arith.constant 0.000000e+00 : f32
    %70 = vector.broadcast %cst_22 : f32 to vector<16x256xf32>
    %71 = arith.maximumf %69, %70 : vector<16x256xf32>
    %72 = arith.truncf %71 : vector<16x256xf32> to vector<16x256xbf16>
    %c0_23 = arith.constant 0 : index
    %c0_24 = arith.constant 0 : index
    %73 = vector.load %arg6[%c0_23, %c0_24] : memref<256x128xbf16, #tpu.memory_space<vmem>>, vector<256x128xbf16>
    %cst_25 = arith.constant dense<0.000000e+00> : vector<16x128xf32>
    %74 = tpu.matmul %72, %73, %cst_25 {dimension_numbers = #tpu.dot_dimension_numbers<[1], [0], [0], [1], [0, 0, 1, 1], [], []>} : vector<16x256xbf16>, vector<256x128xbf16>, vector<16x128xf32> -> vector<16x128xf32>
    %c0_26 = arith.constant 0 : index
    %c0_27 = arith.constant 0 : index
    %75 = vector.load %arg7[%c0_26, %c0_27] : memref<1x128xf32, #tpu.memory_space<vmem>>, vector<1x128xf32>
    %76 = vector.broadcast %75 : vector<1x128xf32> to vector<16x128xf32>
    %77 = arith.addf %74, %76 : vector<16x128xf32>
    %cst_28 = arith.constant 0.000000e+00 : f32
    %78 = vector.broadcast %cst_28 : f32 to vector<16x128xf32>
    %79 = arith.maximumf %77, %78 : vector<16x128xf32>
    %80 = arith.truncf %79 : vector<16x128xf32> to vector<16x128xbf16>
    %c0_29 = arith.constant 0 : index
    %c0_30 = arith.constant 0 : index
    %81 = vector.load %arg8[%c0_29, %c0_30] : memref<128x128xbf16, #tpu.memory_space<vmem>>, vector<128x128xbf16>
    %cst_31 = arith.constant dense<0.000000e+00> : vector<16x128xf32>
    %82 = tpu.matmul %80, %81, %cst_31 {dimension_numbers = #tpu.dot_dimension_numbers<[1], [0], [0], [1], [0, 0, 1, 1], [], []>} : vector<16x128xbf16>, vector<128x128xbf16>, vector<16x128xf32> -> vector<16x128xf32>
    %c0_32 = arith.constant 0 : index
    %c0_33 = arith.constant 0 : index
    %83 = vector.load %arg9[%c0_32, %c0_33] : memref<1x128xf32, #tpu.memory_space<vmem>>, vector<1x128xf32>
    %84 = vector.broadcast %83 : vector<1x128xf32> to vector<16x128xf32>
    %85 = arith.addf %82, %84 : vector<16x128xf32>
    %c0_34 = arith.constant 0 : index
    %c0_35 = arith.constant 0 : index
    %86 = vector.load %arg10[%c0_34, %c0_35] : memref<16x128xf32, #tpu.memory_space<vmem>>, vector<16x128xf32>
    tpu.vector_store %arg10[%c0_34, %c0_35], %85 {strides = array<i32>} : memref<16x128xf32, #tpu.memory_space<vmem>>, vector<16x128xf32>,
    return
  }
  func.func @transform_0(%arg0: i32) -> (i32, i32, i32) {
    %c0_i32 = arith.constant 0 : i32
    %c0_i32_0 = arith.constant 0 : i32
    %c0_i32_1 = arith.constant 0 : i32
    return %c0_i32, %arg0, %c0_i32_0 : i32, i32, i32
  }
  func.func @transform_1(%arg0: i32) -> (i32, i32) {
    %c0_i32 = arith.constant 0 : i32
    %c0_i32_0 = arith.constant 0 : i32
    %c0_i32_1 = arith.constant 0 : i32
    return %c0_i32, %c0_i32_0 : i32, i32
  }
  func.func @transform_2(%arg0: i32) -> (i32, i32) {
    %c0_i32 = arith.constant 0 : i32
    %c0_i32_0 = arith.constant 0 : i32
    %c0_i32_1 = arith.constant 0 : i32
    return %c0_i32, %c0_i32_0 : i32, i32
  }
  func.func @transform_3(%arg0: i32) -> (i32, i32, i32) {
    %c0_i32 = arith.constant 0 : i32
    %c0_i32_0 = arith.constant 0 : i32
    %c0_i32_1 = arith.constant 0 : i32
    %c0_i32_2 = arith.constant 0 : i32
    return %c0_i32, %c0_i32_0, %c0_i32_1 : i32, i32, i32
  }
  func.func @transform_4(%arg0: i32) -> (i32, i32) {
    %c0_i32 = arith.constant 0 : i32
    %c0_i32_0 = arith.constant 0 : i32
    %c0_i32_1 = arith.constant 0 : i32
    return %c0_i32, %c0_i32_0 : i32, i32
  }
  func.func @transform_5(%arg0: i32) -> (i32, i32) {
    %c0_i32 = arith.constant 0 : i32
    %c0_i32_0 = arith.constant 0 : i32
    %c0_i32_1 = arith.constant 0 : i32
    return %c0_i32, %c0_i32_0 : i32, i32
  }
  func.func @transform_6(%arg0: i32) -> (i32, i32) {
    %c0_i32 = arith.constant 0 : i32
    %c0_i32_0 = arith.constant 0 : i32
    %c0_i32_1 = arith.constant 0 : i32
    return %c0_i32, %c0_i32_0 : i32, i32
  }
  func.func @transform_7(%arg0: i32) -> (i32, i32) {
    %c0_i32 = arith.constant 0 : i32
    %c0_i32_0 = arith.constant 0 : i32
    %c0_i32_1 = arith.constant 0 : i32
    return %c0_i32, %c0_i32_0 : i32, i32
  }
  func.func @transform_8(%arg0: i32) -> (i32, i32) {
    %c0_i32 = arith.constant 0 : i32
    %c0_i32_0 = arith.constant 0 : i32
    %c0_i32_1 = arith.constant 0 : i32
    return %c0_i32, %c0_i32_0 : i32, i32
  }
  func.func @transform_9(%arg0: i32) -> (i32, i32) {
    %c0_i32 = arith.constant 0 : i32
    %c0_i32_0 = arith.constant 0 : i32
    return %arg0, %c0_i32 : i32, i32
  }
}

</mosaic_0001>

<bundles_post_ra>
// kernel: net_forward.3
= control target key start
LH: loop header
LB: loop body
LE: loop exit
PB: predicated region body
PF: predicated region fallthrough
CT: control target
= control target key end

     0   :  { %s2940_s12 = smov 0   ;;  %s2942_s13 = smov 0   ;;  %s3504_s0 = inlined_call_operand.vmem [shape: bf16[4,512,16], index: 0, kind: input, shape index: {}]   ;;  %s3505_s1 = inlined_call_operand.vmem [shape: bf16[16,128], index: 1, kind: input, shape index: {}]   ;;  %s3506_s2 = inlined_call_operand.vmem [shape: f32[1,128], index: 2, kind: input, shape index: {}]   ;;  %s3507_s3 = inlined_call_operand.vmem [shape: bf16[512,128], index: 3, kind: output, shape index: {}]  }
   0x1   :  { %s2944_s14 = smov 0  }
   0x2 LB: > { %s2307_s15 = sadd.s32 4294967295, %s2918_s14   ;;  %s2957_s16 = sadd.s32 1, %s2918_s14   ;;  %s2918_s14 = sphi %s2944_s14, %s3542_s14   ;;  %s2914_s13 = sphi %s2942_s13, %s3541_s13   ;;  %s2910_s12 = sphi %s2940_s12, %s3540_s12  }
   0x3   : > { %s17_s17 = ssub.s32 %s2918_s14, %s2957_s16  ;;  %s20_s18 = sadd.s32 1, %s2914_s13 }
   0x4   : > { %p18_p0 = scmp.eq.s32.totalorder %s17_s17, 0  ;;  %p27_p1 = scmp.ne.s32.totalorder %s2914_s13, %s2910_s12 }
   0x5   : > { %p28_p2 = scmp.eq.s32.totalorder %s2918_s14, 0  ;;  %p2310_p4 = scmp.ge.s32.totalorder %s2918_s14, 2 }
   0x6   : > { %s2966_s19 = scalar_select %p18_p0, %s2914_s13, %s20_s18  }
   0x7   : > { %p29_p3 = por %p28_p2, %p27_p1  ;;  %127 = sbr.rel (%p2310_p4) target bundleno = 50 (0x32), region = 24 }
   0xe   : > { %130 = sbr.rel (!%p29_p3) target bundleno = 50 (0x32), region = 28  ;;  %s132_s20 = sand.u32 (%p29_p3), 1, %s2914_s13  }
   0xf   : > { %s2482_s21 = sshll.u32 (%p29_p3), %s2918_s14, 7  ;;  %s2311_s22 = sshll.u32 (%p29_p3), %s132_s20, 9 }
  0x10   : > { %s2974_s25 = scalar_lea.vmem (%p29_p3), %s3504_s0, %s2482_s21  ;;  %s2979_s26 = scalar_lea.vmem (%p29_p3), [#allocation2], %s2311_s22 }
  0x11   : > { %v153_v0 = vld [vmem:[%s2974_s25] sm:$0xff] (%p29_p3)   ;;  %v157_v1 = vld [vmem:[%s2974_s25 + $0x8] sm:$0xff] (%p29_p3)   ;;  %v161_v2 = vld [vmem:[%s2974_s25 + $0x10] sm:$0xff] (%p29_p3)  }
  0x12   : > { %154 = vst [vmem:[%s2979_s26] sm:$0xff] (%p29_p3), %v153_v0   ;;  %158 = vst [vmem:[%s2979_s26 + $0x8] sm:$0xff] (%p29_p3), %v157_v1   ;;  %v165_v3 = vld [vmem:[%s2974_s25 + $0x18] sm:$0xff] (%p29_p3)   ;;  %v169_v4 = vld [vmem:[%s2974_s25 + $0x20] sm:$0xff] (%p29_p3)  }
  0x13   : > { %162 = vst [vmem:[%s2979_s26 + $0x10] sm:$0xff] (%p29_p3), %v161_v2   ;;  %v173_v5 = vld [vmem:[%s2974_s25 + $0x28] sm:$0xff] (%p29_p3)   ;;  %166 = vst [vmem:[%s2979_s26 + $0x18] sm:$0xff] (%p29_p3), %v165_v3   ;;  %v177_v6 = vld [vmem:[%s2974_s25 + $0x30] sm:$0xff] (%p29_p3)  }
  0x14   : > { %170 = vst [vmem:[%s2979_s26 + $0x20] sm:$0xff] (%p29_p3), %v169_v4   ;;  %174 = vst [vmem:[%s2979_s26 + $0x28] sm:$0xff] (%p29_p3), %v173_v5   ;;  %v181_v7 = vld [vmem:[%s2974_s25 + $0x38] sm:$0xff] (%p29_p3)   ;;  %v185_v8 = vld [vmem:[%s2974_s25 + $0x40] sm:$0xff] (%p29_p3)  }
  0x15   : > { %178 = vst [vmem:[%s2979_s26 + $0x30] sm:$0xff] %v177_v6   ;;  %182 = vst [vmem:[%s2979_s26 + $0x38] sm:$0xff] %v181_v7   ;;  %v189_v9 = vld [vmem:[%s2974_s25 + $0x48] sm:$0xff]   ;;  %v193_v10 = vld [vmem:[%s2974_s25 + $0x50] sm:$0xff]  }
  0x16   : > { %186 = vst [vmem:[%s2979_s26 + $0x40] sm:$0xff] %v185_v8   ;;  %v197_v11 = vld [vmem:[%s2974_s25 + $0x58] sm:$0xff]   ;;  %190 = vst [vmem:[%s2979_s26 + $0x48] sm:$0xff] %v189_v9   ;;  %v201_v12 = vld [vmem:[%s2974_s25 + $0x60] sm:$0xff]  }
  0x17   : > { %194 = vst [vmem:[%s2979_s26 + $0x50] sm:$0xff] %v193_v10   ;;  %198 = vst [vmem:[%s2979_s26 + $0x58] sm:$0xff] %v197_v11   ;;  %v205_v13 = vld [vmem:[%s2974_s25 + $0x68] sm:$0xff]   ;;  %v209_v14 = vld [vmem:[%s2974_s25 + $0x70] sm:$0xff]  }
  0x18   : > { %202 = vst [vmem:[%s2979_s26 + $0x60] sm:$0xff] %v201_v12   ;;  %206 = vst [vmem:[%s2979_s26 + $0x68] sm:$0xff] %v205_v13   ;;  %v213_v15 = vld [vmem:[%s2974_s25 + $0x78] sm:$0xff]   ;;  %v217_v16 = vld [vmem:[%s2974_s25 + $0x100] sm:$0xff]  }
  0x19   : > { %210 = vst [vmem:[%s2979_s26 + $0x70] sm:$0xff] %v209_v14   ;;  %v221_v17 = vld [vmem:[%s2974_s25 + $0x108] sm:$0xff]   ;;  %214 = vst [vmem:[%s2979_s26 + $0x78] sm:$0xff] %v213_v15   ;;  %v225_v18 = vld [vmem:[%s2974_s25 + $0x110] sm:$0xff]  }
  0x1a   : > { %218 = vst [vmem:[%s2979_s26 + $0x80] sm:$0xff] %v217_v16   ;;  %222 = vst [vmem:[%s2979_s26 + $0x88] sm:$0xff] %v221_v17   ;;  %v229_v19 = vld [vmem:[%s2974_s25 + $0x118] sm:$0xff]   ;;  %v233_v20 = vld [vmem:[%s2974_s25 + $0x120] sm:$0xff]  }
  0x1b   : > { %226 = vst [vmem:[%s2979_s26 + $0x90] sm:$0xff] %v225_v18   ;;  %230 = vst [vmem:[%s2979_s26 + $0x98] sm:$0xff] %v229_v19   ;;  %v237_v21 = vld [vmem:[%s2974_s25 + $0x128] sm:$0xff]   ;;  %v241_v22 = vld [vmem:[%s2974_s25 + $0x130] sm:$0xff]  }
  0x1c   : > { %234 = vst [vmem:[%s2979_s26 + $0xa0] sm:$0xff] %v233_v20   ;;  %v245_v23 = vld [vmem:[%s2974_s25 + $0x138] sm:$0xff]   ;;  %238 = vst [vmem:[%s2979_s26 + $0xa8] sm:$0xff] %v237_v21   ;;  %v249_v24 = vld [vmem:[%s2974_s25 + $0x140] sm:$0xff]  }
  0x1d   : > { %242 = vst [vmem:[%s2979_s26 + $0xb0] sm:$0xff] %v241_v22   ;;  %246 = vst [vmem:[%s2979_s26 + $0xb8] sm:$0xff] %v245_v23   ;;  %v253_v25 = vld [vmem:[%s2974_s25 + $0x148] sm:$0xff]   ;;  %v257_v26 = vld [vmem:[%s2974_s25 + $0x150] sm:$0xff]  }
  0x1e   : > { %250 = vst [vmem:[%s2979_s26 + $0xc0] sm:$0xff] %v249_v24   ;;  %254 = vst [vmem:[%s2979_s26 + $0xc8] sm:$0xff] %v253_v25   ;;  %v261_v27 = vld [vmem:[%s2974_s25 + $0x158] sm:$0xff]   ;;  %v265_v28 = vld [vmem:[%s2974_s25 + $0x160] sm:$0xff]  }
  0x1f   : > { %258 = vst [vmem:[%s2979_s26 + $0xd0] sm:$0xff] %v257_v26   ;;  %v269_v29 = vld [vmem:[%s2974_s25 + $0x168] sm:$0xff]   ;;  %262 = vst [vmem:[%s2979_s26 + $0xd8] sm:$0xff] %v261_v27   ;;  %v273_v30 = vld [vmem:[%s2974_s25 + $0x170] sm:$0xff]  }
  0x20   : > { %266 = vst [vmem:[%s2979_s26 + $0xe0] sm:$0xff] %v265_v28   ;;  %270 = vst [vmem:[%s2979_s26 + $0xe8] sm:$0xff] %v269_v29   ;;  %v277_v31 = vld [vmem:[%s2974_s25 + $0x178] sm:$0xff]   ;;  %v281_v32 = vld [vmem:[%s2974_s25 + $0x200] sm:$0xff]  }
  0x21   : > { %274 = vst [vmem:[%s2979_s26 + $0xf0] sm:$0xff] %v273_v30   ;;  %278 = vst [vmem:[%s2979_s26 + $0xf8] sm:$0xff] %v277_v31   ;;  %v285_v33 = vld [vmem:[%s2974_s25 + $0x208] sm:$0xff]   ;;  %v289_v34 = vld [vmem:[%s2974_s25 + $0x210] sm:$0xff]  }
  0x22   : > { %282 = vst [vmem:[%s2979_s26 + $0x100] sm:$0xff] %v281_v32   ;;  %v293_v35 = vld [vmem:[%s2974_s25 + $0x218] sm:$0xff]   ;;  %286 = vst [vmem:[%s2979_s26 + $0x108] sm:$0xff] %v285_v33   ;;  %v297_v36 = vld [vmem:[%s2974_s25 + $0x220] sm:$0xff]  }
  0x23   : > { %290 = vst [vmem:[%s2979_s26 + $0x110] sm:$0xff] %v289_v34   ;;  %294 = vst [vmem:[%s2979_s26 + $0x118] sm:$0xff] %v293_v35   ;;  %v301_v37 = vld [vmem:[%s2974_s25 + $0x228] sm:$0xff]   ;;  %v305_v38 = vld [vmem:[%s2974_s25 + $0x230] sm:$0xff]  }
  0x24   : > { %298 = vst [vmem:[%s2979_s26 + $0x120] sm:$0xff] %v297_v36   ;;  %302 = vst [vmem:[%s2979_s26 + $0x128] sm:$0xff] %v301_v37   ;;  %v309_v39 = vld [vmem:[%s2974_s25 + $0x238] sm:$0xff]   ;;  %v313_v40 = vld [vmem:[%s2974_s25 + $0x240] sm:$0xff]  }
  0x25   : > { %306 = vst [vmem:[%s2979_s26 + $0x130] sm:$0xff] %v305_v38   ;;  %v317_v41 = vld [vmem:[%s2974_s25 + $0x248] sm:$0xff]   ;;  %310 = vst [vmem:[%s2979_s26 + $0x138] sm:$0xff] %v309_v39   ;;  %v321_v42 = vld [vmem:[%s2974_s25 + $0x250] sm:$0xff]  }
  0x26   : > { %314 = vst [vmem:[%s2979_s26 + $0x140] sm:$0xff] %v313_v40   ;;  %318 = vst [vmem:[%s2979_s26 + $0x148] sm:$0xff] %v317_v41   ;;  %v325_v43 = vld [vmem:[%s2974_s25 + $0x258] sm:$0xff]   ;;  %v329_v44 = vld [vmem:[%s2974_s25 + $0x260] sm:$0xff]  }
  0x27   : > { %322 = vst [vmem:[%s2979_s26 + $0x150] sm:$0xff] %v321_v42   ;;  %326 = vst [vmem:[%s2979_s26 + $0x158] sm:$0xff] %v325_v43   ;;  %v333_v45 = vld [vmem:[%s2974_s25 + $0x268] sm:$0xff]   ;;  %v337_v46 = vld [vmem:[%s2974_s25 + $0x270] sm:$0xff]  }
  0x28   : > { %330 = vst [vmem:[%s2979_s26 + $0x160] sm:$0xff] %v329_v44   ;;  %v341_v47 = vld [vmem:[%s2974_s25 + $0x278] sm:$0xff]   ;;  %334 = vst [vmem:[%s2979_s26 + $0x168] sm:$0xff] %v333_v45   ;;  %v345_v48 = vld [vmem:[%s2974_s25 + $0x300] sm:$0xff]  }
  0x29   : > { %338 = vst [vmem:[%s2979_s26 + $0x170] sm:$0xff] %v337_v46   ;;  %342 = vst [vmem:[%s2979_s26 + $0x178] sm:$0xff] %v341_v47   ;;  %v349_v49 = vld [vmem:[%s2974_s25 + $0x308] sm:$0xff]   ;;  %v353_v50 = vld [vmem:[%s2974_s25 + $0x310] sm:$0xff]  }
  0x2a   : > { %346 = vst [vmem:[%s2979_s26 + $0x180] sm:$0xff] %v345_v48   ;;  %350 = vst [vmem:[%s2979_s26 + $0x188] sm:$0xff] %v349_v49   ;;  %v357_v51 = vld [vmem:[%s2974_s25 + $0x318] sm:$0xff]   ;;  %v361_v52 = vld [vmem:[%s2974_s25 + $0x320] sm:$0xff]  }
  0x2b   : > { %354 = vst [vmem:[%s2979_s26 + $0x190] sm:$0xff] %v353_v50   ;;  %v365_v53 = vld [vmem:[%s2974_s25 + $0x328] sm:$0xff]   ;;  %358 = vst [vmem:[%s2979_s26 + $0x198] sm:$0xff] %v357_v51   ;;  %v369_v54 = vld [vmem:[%s2974_s25 + $0x330] sm:$0xff]  }
  0x2c   : > { %362 = vst [vmem:[%s2979_s26 + $0x1a0] sm:$0xff] %v361_v52   ;;  %366 = vst [vmem:[%s2979_s26 + $0x1a8] sm:$0xff] %v365_v53   ;;  %v373_v55 = vld [vmem:[%s2974_s25 + $0x338] sm:$0xff]   ;;  %v377_v56 = vld [vmem:[%s2974_s25 + $0x340] sm:$0xff]  }
  0x2d   : > { %370 = vst [vmem:[%s2979_s26 + $0x1b0] sm:$0xff] %v369_v54   ;;  %374 = vst [vmem:[%s2979_s26 + $0x1b8] sm:$0xff] %v373_v55   ;;  %v381_v57 = vld [vmem:[%s2974_s25 + $0x348] sm:$0xff]   ;;  %v385_v58 = vld [vmem:[%s2974_s25 + $0x350] sm:$0xff]  }
  0x2e   : > { %378 = vst [vmem:[%s2979_s26 + $0x1c0] sm:$0xff] %v377_v56   ;;  %v389_v59 = vld [vmem:[%s2974_s25 + $0x358] sm:$0xff]   ;;  %382 = vst [vmem:[%s2979_s26 + $0x1c8] sm:$0xff] %v381_v57   ;;  %v393_v60 = vld [vmem:[%s2974_s25 + $0x360] sm:$0xff]  }
  0x2f   : > { %386 = vst [vmem:[%s2979_s26 + $0x1d0] sm:$0xff] %v385_v58   ;;  %390 = vst [vmem:[%s2979_s26 + $0x1d8] sm:$0xff] %v389_v59   ;;  %v397_v61 = vld [vmem:[%s2974_s25 + $0x368] sm:$0xff]   ;;  %v401_v62 = vld [vmem:[%s2974_s25 + $0x370] sm:$0xff]  }
  0x30   : > { %394 = vst [vmem:[%s2979_s26 + $0x1e0] sm:$0xff] %v393_v60   ;;  %398 = vst [vmem:[%s2979_s26 + $0x1e8] sm:$0xff] %v397_v61   ;;  %v405_v63 = vld [vmem:[%s2974_s25 + $0x378] sm:$0xff]  }
  0x31   : > { %402 = vst [vmem:[%s2979_s26 + $0x1f0] sm:$0xff] %v401_v62   ;;  %406 = vst [vmem:[%s2979_s26 + $0x1f8] sm:$0xff] %v405_v63  }
  0x32 PF: > { %p2314_p5 = scmp.ge.s32.totalorder %s2918_s14, 1  ;;  %p686_p6 = scmp.lt.s32.totalorder %s2918_s14, 3 }
  0x34   : > { %p687_p7 = pnand %p2314_p5, %p686_p6 }
  0x36   : > { %690 = sbr.rel (%p687_p7) target bundleno = 414 (0x19e), region = 69 }
  0x3d   : > { %v2831_v0 = vld [vmem:[%s3505_s1] sm:$0xff]   ;;  %s693_s29 = sand.u32 1, %s2910_s12   ;;  %vm1180_vm0 = vcmask 130048   ;;  %s2316_s5 = sshll.u32 %s2307_s15, 5 }
  0x3e   : > { %s2315_s30 = sshll.u32 %s693_s29, 9  ;;  %2675 = vmatprep.subr.bf16.mxu0 %v2831_v0  ;;  %2805 = vmatprep.subr.bf16.mxu1 %v2831_v0  ;;  %p718_p8 = scmp.lt.s32.totalorder %s2316_s5, 63 }
  0x3f   : > { %2676 = vmatpush3.bf16.msra.mxu0 %v2831_v0  ;;  %2806 = vmatpush3.bf16.msra.mxu1 %v2831_v0  ;;  %s3112_s4 = scalar_lea.vmem [#allocation2], %s2315_s30 }
  0x40   : > { %v2832_v1 = vld [vmem:[%s3112_s4] sm:$0xff]   ;;  %v2833_v2 = vld [vmem:[%s3112_s4 + $0x8] sm:$0xff]   ;;  %v2836_v5 = vld [vmem:[%s3112_s4 + $0x10] sm:$0xff]   ;;  %s3544_s5 = smov (!%p718_p8, %s2316_s5), 63 }
  0x41   : > { %2677 = vmatprep.mubr.msk.bf16.mxu0 %vm1180_vm0, %v2832_v1  ;;  %v2834_v3 = vld [vmem:[%s3112_s4 + $0x100] sm:$0xff]   ;;  %v2835_v4 = vld [vmem:[%s3112_s4 + $0x108] sm:$0xff]   ;;  %v2838_v6 = vld [vmem:[%s3112_s4 + $0x110] sm:$0xff]   ;;  %s2317_s8 = sshll.u32 %s3544_s5, 2 }
  0x42   : > { %2678 = vmatmul.mubr.msk.bf16.vlgmr.msra.gmra.mrb[0].mxu0 %vm1180_vm0, %v2833_v2  ;;  %2741 = vmatprep.mubr.msk.bf16.mxu1 %vm1180_vm0, %v2834_v3  ;;  %v2837_v7 = vld [vmem:[%s3112_s4 + $0x18] sm:$0xff]   ;;  %v2840_v8 = vld [vmem:[%s3112_s4 + $0x20] sm:$0xff]   ;;  %v2841_v11 = vld [vmem:[%s3112_s4 + $0x28] sm:$0xff]   ;;  %s3396_s11 = scalar_lea.vmem %s3507_s3, %s2317_s8 }
  0x43   : > { %2742 = vmatmul.mubr.msk.bf16.vlgmr.msra.gmra.mrb[0].mxu1 %vm1180_vm0, %v2835_v4  ;;  %2681 = vmatprep.mubr.msk.bf16.mxu0 %vm1180_vm0, %v2836_v5  ;;  %v2839_v9 = vld [vmem:[%s3112_s4 + $0x118] sm:$0xff]   ;;  %v2842_v10 = vld [vmem:[%s3112_s4 + $0x120] sm:$0xff]   ;;  %v2844_v12 = vld [vmem:[%s3112_s4 + $0x30] sm:$0xff]  }
  0x44   : > { %2745 = vmatprep.mubr.msk.bf16.mxu1 %vm1180_vm0, %v2838_v6  ;;  %v2843_v13 = vld [vmem:[%s3112_s4 + $0x128] sm:$0xff]   ;;  %v2846_v14 = vld [vmem:[%s3112_s4 + $0x130] sm:$0xff]   ;;  %v2845_v15 = vld [vmem:[%s3112_s4 + $0x38] sm:$0xff]  }
  0x45   : > { %v2848_v16 = vld [vmem:[%s3112_s4 + $0x40] sm:$0xff]   ;;  %v2847_v17 = vld [vmem:[%s3112_s4 + $0x138] sm:$0xff]   ;;  %v2849_v19 = vld [vmem:[%s3112_s4 + $0x48] sm:$0xff]  }
  0x46   : > { %v2850_v18 = vld [vmem:[%s3112_s4 + $0x140] sm:$0xff]   ;;  %v2852_v20 = vld [vmem:[%s3112_s4 + $0x50] sm:$0xff]   ;;  %v2851_v21 = vld [vmem:[%s3112_s4 + $0x148] sm:$0xff]  }
  0x47   : > { %v2854_v22 = vld [vmem:[%s3112_s4 + $0x150] sm:$0xff]   ;;  %v2853_v23 = vld [vmem:[%s3112_s4 + $0x58] sm:$0xff]   ;;  %v2856_v24 = vld [vmem:[%s3112_s4 + $0x60] sm:$0xff]  }
  0x48   : > { %v2855_v25 = vld [vmem:[%s3112_s4 + $0x158] sm:$0xff]   ;;  %v2858_v26 = vld [vmem:[%s3112_s4 + $0x160] sm:$0xff]   ;;  %v2857_v27 = vld [vmem:[%s3112_s4 + $0x68] sm:$0xff]  }
  0x49   : > { %v2860_v28 = vld [vmem:[%s3112_s4 + $0x70] sm:$0xff]   ;;  %v2859_v29 = vld [vmem:[%s3112_s4 + $0x168] sm:$0xff]   ;;  %v2861_v31 = vld [vmem:[%s3112_s4 + $0x78] sm:$0xff]  }
  0x4a   : > { %2682 = vmatmul.mubr.msk.bf16.gmra.mrb[4].mxu0 %vm1180_vm0, %v2837_v7  ;;  %v2862_v30 = vld [vmem:[%s3112_s4 + $0x170] sm:$0xff]   ;;  %v2864_v32 = vld [vmem:[%s3112_s4 + $0x80] sm:$0xff]   ;;  %v2863_v33 = vld [vmem:[%s3112_s4 + $0x178] sm:$0xff]  }
  0x4b   : > { %2685 = vmatprep.mubr.msk.bf16.mxu0 %vm1180_vm0, %v2840_v8  ;;  %2746 = vmatmul.mubr.msk.bf16.gmra.mrb[4].mxu1 %vm1180_vm0, %v2839_v9  ;;  %v2866_v34 = vld [vmem:[%s3112_s4 + $0x180] sm:$0xff]   ;;  %v2865_v35 = vld [vmem:[%s3112_s4 + $0x88] sm:$0xff]   ;;  %v2868_v36 = vld [vmem:[%s3112_s4 + $0x90] sm:$0xff]  }
  0x4c   : > { %2749 = vmatprep.mubr.msk.bf16.mxu1 %vm1180_vm0, %v2842_v10  ;;  %v2867_v37 = vld [vmem:[%s3112_s4 + $0x188] sm:$0xff]   ;;  %v2870_v38 = vld [vmem:[%s3112_s4 + $0x190] sm:$0xff]   ;;  %v2869_v39 = vld [vmem:[%s3112_s4 + $0x98] sm:$0xff]  }
  0x4d   : > { %v2872_v40 = vld [vmem:[%s3112_s4 + $0xa0] sm:$0xff]   ;;  %v2871_v41 = vld [vmem:[%s3112_s4 + $0x198] sm:$0xff]   ;;  %v2873_v43 = vld [vmem:[%s3112_s4 + $0xa8] sm:$0xff]  }
  0x4e   : > { %v2874_v42 = vld [vmem:[%s3112_s4 + $0x1a0] sm:$0xff]   ;;  %v2876_v44 = vld [vmem:[%s3112_s4 + $0xb0] sm:$0xff]   ;;  %v2875_v45 = vld [vmem:[%s3112_s4 + $0x1a8] sm:$0xff]  }
  0x4f   : > { %v2878_v46 = vld [vmem:[%s3112_s4 + $0x1b0] sm:$0xff]   ;;  %v2877_v47 = vld [vmem:[%s3112_s4 + $0xb8] sm:$0xff]   ;;  %v2880_v48 = vld [vmem:[%s3112_s4 + $0xc0] sm:$0xff]  }
  0x50   : > { %v2879_v49 = vld [vmem:[%s3112_s4 + $0x1b8] sm:$0xff]   ;;  %v2882_v50 = vld [vmem:[%s3112_s4 + $0x1c0] sm:$0xff]   ;;  %v2881_v51 = vld [vmem:[%s3112_s4 + $0xc8] sm:$0xff]  }
  0x51   : > { %v2884_v52 = vld [vmem:[%s3112_s4 + $0xd0] sm:$0xff]   ;;  %v2883_v53 = vld [vmem:[%s3112_s4 + $0x1c8] sm:$0xff]   ;;  %v2885_v55 = vld [vmem:[%s3112_s4 + $0xd8] sm:$0xff]  }
  0x52   : > { %2686 = vmatmul.mubr.msk.bf16.gmra.mrb[8].mxu0 %vm1180_vm0, %v2841_v11  ;;  %v2886_v54 = vld [vmem:[%s3112_s4 + $0x1d0] sm:$0xff]   ;;  %v2888_v56 = vld [vmem:[%s3112_s4 + $0xe0] sm:$0xff]   ;;  %v2887_v57 = vld [vmem:[%s3112_s4 + $0x1d8] sm:$0xff]  }
  0x53   : > { %2689 = vmatprep.mubr.msk.bf16.mxu0 %vm1180_vm0, %v2844_v12  ;;  %2750 = vmatmul.mubr.msk.bf16.gmra.mrb[8].mxu1 %vm1180_vm0, %v2843_v13  ;;  %v2890_v58 = vld [vmem:[%s3112_s4 + $0x1e0] sm:$0xff]   ;;  %v2889_v59 = vld [vmem:[%s3112_s4 + $0xe8] sm:$0xff]   ;;  %v2892_v60 = vld [vmem:[%s3112_s4 + $0xf0] sm:$0xff]  }
  0x54   : > { %2753 = vmatprep.mubr.msk.bf16.mxu1 %vm1180_vm0, %v2846_v14  ;;  %v2891_v61 = vld [vmem:[%s3112_s4 + $0x1e8] sm:$0xff]   ;;  %v2894_v62 = vld [vmem:[%s3112_s4 + $0x1f0] sm:$0xff]   ;;  %v2893_v63 = vld [vmem:[%s3112_s4 + $0xf8] sm:$0xff]  }
  0x55   : > { %v2895_v0 = vld [vmem:[%s3112_s4 + $0x1f8] sm:$0xff]  }
  0x5a   : > { %2690 = vmatmul.mubr.msk.bf16.gmra.mrb[12].mxu0 %vm1180_vm0, %v2845_v15 }
  0x5b   : > { %2693 = vmatprep.mubr.msk.bf16.mxu0 %vm1180_vm0, %v2848_v16  ;;  %2754 = vmatmul.mubr.msk.bf16.gmra.mrb[12].mxu1 %vm1180_vm0, %v2847_v17 }
  0x5c   : > { %2757 = vmatprep.mubr.msk.bf16.mxu1 %vm1180_vm0, %v2850_v18 }
  0x62   : > { %2694 = vmatmul.mubr.msk.bf16.gmra.mrb[16].mxu0 %vm1180_vm0, %v2849_v19 }
  0x63   : > { %2697 = vmatprep.mubr.msk.bf16.mxu0 %vm1180_vm0, %v2852_v20  ;;  %2758 = vmatmul.mubr.msk.bf16.gmra.mrb[16].mxu1 %vm1180_vm0, %v2851_v21 }
  0x64   : > { %2761 = vmatprep.mubr.msk.bf16.mxu1 %vm1180_vm0, %v2854_v22 }
  0x6a   : > { %2698 = vmatmul.mubr.msk.bf16.gmra.mrb[20].mxu0 %vm1180_vm0, %v2853_v23 }
  0x6b   : > { %2701 = vmatprep.mubr.msk.bf16.mxu0 %vm1180_vm0, %v2856_v24  ;;  %2762 = vmatmul.mubr.msk.bf16.gmra.mrb[20].mxu1 %vm1180_vm0, %v2855_v25 }
  0x6c   : > { %2765 = vmatprep.mubr.msk.bf16.mxu1 %vm1180_vm0, %v2858_v26 }
  0x72   : > { %2702 = vmatmul.mubr.msk.bf16.gmra.mrb[24].mxu0 %vm1180_vm0, %v2857_v27 }
  0x73   : > { %2705 = vmatprep.mubr.msk.bf16.mxu0 %vm1180_vm0, %v2860_v28  ;;  %2766 = vmatmul.mubr.msk.bf16.gmra.mrb[24].mxu1 %vm1180_vm0, %v2859_v29 }
  0x74   : > { %2769 = vmatprep.mubr.msk.bf16.mxu1 %vm1180_vm0, %v2862_v30 }
  0x7a   : > { %2706 = vmatmul.mubr.msk.bf16.gmra.mrb[28].mxu0 %vm1180_vm0, %v2861_v31 }
  0x7b   : > { %2709 = vmatprep.mubr.msk.bf16.mxu0 %vm1180_vm0, %v2864_v32  ;;  %2770 = vmatmul.mubr.msk.bf16.gmra.mrb[28].mxu1 %vm1180_vm0, %v2863_v33 }
  0x7c   : > { %2773 = vmatprep.mubr.msk.bf16.mxu1 %vm1180_vm0, %v2866_v34 }
  0x82   : > { %2710 = vmatmul.mubr.msk.bf16.gmra.mrb[32].mxu0 %vm1180_vm0, %v2865_v35 }
  0x83   : > { %2713 = vmatprep.mubr.msk.bf16.mxu0 %vm1180_vm0, %v2868_v36  ;;  %2774 = vmatmul.mubr.msk.bf16.gmra.mrb[32].mxu1 %vm1180_vm0, %v2867_v37 }
  0x84   : > { %2777 = vmatprep.mubr.msk.bf16.mxu1 %vm1180_vm0, %v2870_v38 }
  0x8a   : > { %2714 = vmatmul.mubr.msk.bf16.gmra.mrb[36].mxu0 %vm1180_vm0, %v2869_v39 }
  0x8b   : > { %2717 = vmatprep.mubr.msk.bf16.mxu0 %vm1180_vm0, %v2872_v40  ;;  %2778 = vmatmul.mubr.msk.bf16.gmra.mrb[36].mxu1 %vm1180_vm0, %v2871_v41 }
  0x8c   : > { %2781 = vmatprep.mubr.msk.bf16.mxu1 %vm1180_vm0, %v2874_v42 }
  0x92   : > { %2718 = vmatmul.mubr.msk.bf16.gmra.mrb[40].mxu0 %vm1180_vm0, %v2873_v43 }
  0x93   : > { %2721 = vmatprep.mubr.msk.bf16.mxu0 %vm1180_vm0, %v2876_v44  ;;  %2782 = vmatmul.mubr.msk.bf16.gmra.mrb[40].mxu1 %vm1180_vm0, %v2875_v45 }
  0x94   : > { %2785 = vmatprep.mubr.msk.bf16.mxu1 %vm1180_vm0, %v2878_v46 }
  0x9a   : > { %2722 = vmatmul.mubr.msk.bf16.gmra.mrb[44].mxu0 %vm1180_vm0, %v2877_v47 }
  0x9b   : > { %2725 = vmatprep.mubr.msk.bf16.mxu0 %vm1180_vm0, %v2880_v48  ;;  %2786 = vmatmul.mubr.msk.bf16.gmra.mrb[44].mxu1 %vm1180_vm0, %v2879_v49 }
  0x9c   : > { %2789 = vmatprep.mubr.msk.bf16.mxu1 %vm1180_vm0, %v2882_v50 }
  0xa2   : > { %2726 = vmatmul.mubr.msk.bf16.gmra.mrb[48].mxu0 %vm1180_vm0, %v2881_v51 }
  0xa3   : > { %2729 = vmatprep.mubr.msk.bf16.mxu0 %vm1180_vm0, %v2884_v52  ;;  %2790 = vmatmul.mubr.msk.bf16.gmra.mrb[48].mxu1 %vm1180_vm0, %v2883_v53 }
  0xa4   : > { %2793 = vmatprep.mubr.msk.bf16.mxu1 %vm1180_vm0, %v2886_v54 }
  0xaa   : > { %2730 = vmatmul.mubr.msk.bf16.gmra.mrb[52].mxu0 %vm1180_vm0, %v2885_v55 }
  0xab   : > { %2733 = vmatprep.mubr.msk.bf16.mxu0 %vm1180_vm0, %v2888_v56  ;;  %2794 = vmatmul.mubr.msk.bf16.gmra.mrb[52].mxu1 %vm1180_vm0, %v2887_v57 }
  0xac   : > { %2797 = vmatprep.mubr.msk.bf16.mxu1 %vm1180_vm0, %v2890_v58 }
  0xb2   : > { %2734 = vmatmul.mubr.msk.bf16.gmra.mrb[56].mxu0 %vm1180_vm0, %v2889_v59 }
  0xb3   : > { %2737 = vmatprep.mubr.msk.bf16.mxu0 %vm1180_vm0, %v2892_v60  ;;  %2798 = vmatmul.mubr.msk.bf16.gmra.mrb[56].mxu1 %vm1180_vm0, %v2891_v61 }
  0xb4   : > { %2801 = vmatprep.mubr.msk.bf16.mxu1 %vm1180_vm0, %v2894_v62 }
  0xba   : > { %2738 = vmatmul.mubr.msk.bf16.gmra.mrb[60].mxu0 %vm1180_vm0, %v2893_v63 }
  0xbb   : > { %2802 = vmatmul.mubr.msk.bf16.gmra.mrb[60].mxu1 %vm1180_vm0, %v2895_v0 }
 0x115   : > { %v3242_v1 = vpop.f32.mrb[0].mxu0 }
 0x116   : > { %v3244_v2 = vpop.f32.mrb[1].mxu0  ;;  %v3246_v3 = vpop.f32.mrb[0].mxu1 }
 0x117   : > { %v3248_v4 = vpop.f32.mrb[2].mxu0  ;;  %v3250_v5 = vpop.f32.mrb[1].mxu1 }
 0x118   : > { %v3252_v6 = vpop.f32.mrb[3].mxu0  ;;  %v3254_v7 = vpop.f32.mrb[2].mxu1 }
 0x119   : > { %v3256_v8 = vpop.f32.mrb[3].mxu1 }
 0x11d   : > { %v3258_v9 = vpop.f32.mrb[4].mxu0 }
 0x11e   : > { %v3260_v10 = vpop.f32.mrb[5].mxu0  ;;  %v3262_v11 = vpop.f32.mrb[4].mxu1 }
 0x11f   : > { %v3264_v12 = vpop.f32.mrb[6].mxu0  ;;  %v3266_v13 = vpop.f32.mrb[5].mxu1 }
 0x120   : > { %v3268_v14 = vpop.f32.mrb[7].mxu0  ;;  %v3270_v15 = vpop.f32.mrb[6].mxu1 }
 0x121   : > { %v3272_v16 = vpop.f32.mrb[7].mxu1 }
 0x125   : > { %v3274_v17 = vpop.f32.mrb[8].mxu0 }
 0x126   : > { %v3276_v18 = vpop.f32.mrb[9].mxu0  ;;  %v3278_v19 = vpop.f32.mrb[8].mxu1 }
 0x127   : > { %v3280_v20 = vpop.f32.mrb[10].mxu0  ;;  %v3282_v21 = vpop.f32.mrb[9].mxu1 }
 0x128   : > { %v3284_v22 = vpop.f32.mrb[11].mxu0  ;;  %v3286_v23 = vpop.f32.mrb[10].mxu1 }
 0x129   : > { %v3288_v24 = vpop.f32.mrb[11].mxu1 }
 0x12d   : > { %v3290_v25 = vpop.f32.mrb[12].mxu0 }
 0x12e   : > { %v3292_v26 = vpop.f32.mrb[13].mxu0  ;;  %v3294_v27 = vpop.f32.mrb[12].mxu1 }
 0x12f   : > { %v3296_v28 = vpop.f32.mrb[14].mxu0  ;;  %v3298_v29 = vpop.f32.mrb[13].mxu1 }
 0x130   : > { %v3300_v30 = vpop.f32.mrb[15].mxu0  ;;  %v3302_v31 = vpop.f32.mrb[14].mxu1 }
 0x131   : > { %v3304_v32 = vpop.f32.mrb[15].mxu1 }
 0x135   : > { %v3306_v33 = vpop.f32.mrb[16].mxu0 }
 0x136   : > { %v3308_v34 = vpop.f32.mrb[17].mxu0  ;;  %v3310_v35 = vpop.f32.mrb[16].mxu1 }
 0x137   : > { %v3312_v36 = vpop.f32.mrb[18].mxu0  ;;  %v3314_v37 = vpop.f32.mrb[17].mxu1 }
 0x138   : > { %v3316_v38 = vpop.f32.mrb[19].mxu0  ;;  %v3318_v39 = vpop.f32.mrb[18].mxu1 }
 0x139   : > { %v3320_v40 = vpop.f32.mrb[19].mxu1 }
 0x13d   : > { %v3322_v41 = vpop.f32.mrb[20].mxu0 }
 0x13e   : > { %v3324_v42 = vpop.f32.mrb[21].mxu0  ;;  %v3326_v43 = vpop.f32.mrb[20].mxu1 }
 0x13f   : > { %v3328_v44 = vpop.f32.mrb[22].mxu0  ;;  %v3330_v45 = vpop.f32.mrb[21].mxu1 }
 0x140   : > { %v3332_v46 = vpop.f32.mrb[23].mxu0  ;;  %v3334_v47 = vpop.f32.mrb[22].mxu1 }
 0x141   : > { %v3336_v48 = vpop.f32.mrb[23].mxu1 }
 0x145   : > { %v3338_v49 = vpop.f32.mrb[24].mxu0 }
 0x146   : > { %3508 = vst [vmem:[#allocation3_spill] sm:$0xff] %v3338_v49  ;;  %v3340_v50 = vpop.f32.mrb[25].mxu0  ;;  %v3342_v51 = vpop.f32.mrb[24].mxu1 }
 0x147   : > { %3509 = vst [vmem:[#allocation4_spill] sm:$0xff] %v3340_v50  ;;  %3510 = vst [vmem:[#allocation5_spill] sm:$0xff] %v3342_v51  ;;  %v3344_v52 = vpop.f32.mrb[26].mxu0  ;;  %v3346_v53 = vpop.f32.mrb[25].mxu1 }
 0x148   : > { %3511 = vst [vmem:[#allocation6_spill] sm:$0xff] %v3344_v52  ;;  %3512 = vst [vmem:[#allocation7_spill] sm:$0xff] %v3346_v53  ;;  %v3348_v54 = vpop.f32.mrb[27].mxu0  ;;  %v3350_v55 = vpop.f32.mrb[26].mxu1 }
 0x149   : > { %3513 = vst [vmem:[#allocation8_spill] sm:$0xff] %v3348_v54  ;;  %3514 = vst [vmem:[#allocation9_spill] sm:$0xff] %v3350_v55  ;;  %v3352_v56 = vpop.f32.mrb[27].mxu1 }
 0x14a   : > { %3515 = vst [vmem:[#allocation10_spill] sm:$0xff] %v3352_v56 }
 0x14d   : > { %v3354_v57 = vpop.f32.mrb[28].mxu0 }
 0x14e   : > { %3516 = vst [vmem:[#allocation11_spill] sm:$0xff] %v3354_v57  ;;  %v3356_v58 = vpop.f32.mrb[29].mxu0  ;;  %v3358_v59 = vpop.f32.mrb[28].mxu1 }
 0x14f   : > { %3517 = vst [vmem:[#allocation12_spill] sm:$0xff] %v3356_v58  ;;  %3518 = vst [vmem:[#allocation13_spill] sm:$0xff] %v3358_v59  ;;  %v3360_v60 = vpop.f32.mrb[30].mxu0  ;;  %v3362_v61 = vpop.f32.mrb[29].mxu1 }
 0x150   : > { %3519 = vst [vmem:[#allocation14_spill] sm:$0xff] %v3360_v60  ;;  %3520 = vst [vmem:[#allocation15_spill] sm:$0xff] %v3362_v61  ;;  %v3364_v62 = vpop.f32.mrb[31].mxu0  ;;  %v3366_v63 = vpop.f32.mrb[30].mxu1 }
 0x151   : > { %3521 = vst [vmem:[#allocation16_spill] sm:$0xff] %v3364_v62  ;;  %3522 = vst [vmem:[#allocation17_spill] sm:$0xff] %v3366_v63  ;;  %v3368_v0 = vpop.f32.mrb[31].mxu1 }
 0x152   : > { %3523 = vst [vmem:[#allocation18_spill] sm:$0xff] %v3368_v0  ;;  %v3379_v0 = vld [vmem:[%s3506_s2] ss:$0 sm:$0xff] }
 0x155   : > { %v2711_v55 = vpop.f32.mrb[32].mxu0 }
 0x156   : > { %v1924_v56 = vmax.f32 %v3242_v1, %v2711_v55  ;;  %v1535_v57 = vpop.f32.mrb[33].mxu0  ;;  %v2775_v59 = vpop.f32.mrb[32].mxu1 }
 0x157   : > { %v1918_v58 = vmax.f32 %v3244_v2, %v1535_v57  ;;  %v2712_v54 = vpop.f32.mrb[34].mxu0  ;;  %v1791_v62 = vpop.f32.mrb[33].mxu1 }
 0x158   : > { %v1925_v60 = vmax.f32 %v1924_v56, %v3246_v3  ;;  %v1927_v61 = vmax.f32 %v3248_v4, %v2712_v54  ;;  %v1538_v53 = vpop.f32.mrb[35].mxu0  ;;  %v2776_v55 = vpop.f32.mrb[34].mxu1 }
 0x159   : > { %v1919_v63 = vmax.f32 %v1918_v58, %v3250_v5  ;;  %v1921_v1 = vmax.f32 %v3252_v6, %v1538_v53  ;;  %v1794_v57 = vpop.f32.mrb[35].mxu1 }
 0x15a   : > { %v1926_v52 = vmax.f32 %v1925_v60, %v2775_v59  ;;  %v1928_v2 = vmax.f32 %v1927_v61, %v3254_v7 }
 0x15b   : > { %v1920_v3 = vmax.f32 %v1919_v63, %v1791_v62  ;;  %v1922_v4 = vmax.f32 %v1921_v1, %v3256_v8 }
 0x15c   : > { %v2023_v54 = vadd.f32 %v3379_v0, %v1926_v52  ;;  %v1929_v56 = vmax.f32 %v1928_v2, %v2776_v55 }
 0x15d   : > { %v2021_v51 = vadd.f32 %v3379_v0, %v1920_v3  ;;  %v1923_v50 = vmax.f32 %v1922_v4, %v1794_v57  ;;  %v2715_v49 = vpop.f32.mrb[36].mxu0 }
 0x15e   : > { %v2024_v5 = vadd.f32 %v3379_v0, %v1929_v56  ;;  %v1936_v6 = vmax.f32 %v3258_v9, %v2715_v49  ;;  %v1551_v53 = vpop.f32.mrb[37].mxu0  ;;  %v2779_v59 = vpop.f32.mrb[36].mxu1  ;;  %v2055_v8 = vmax.f32 %v2023_v54, 0.0 }
 0x15f   : > { %v2022_v58 = vadd.f32 %v3379_v0, %v1923_v50  ;;  %v1930_v7 = vmax.f32 %v3260_v10, %v1551_v53  ;;  %v2716_v60 = vpop.f32.mrb[38].mxu0  ;;  %v1807_v63 = vpop.f32.mrb[37].mxu1  ;;  %v2053_v55 = vmax.f32 %v2021_v51, 0.0 }
 0x160   : > { %v2056_v61 = vmax.f32 %v2024_v5, 0.0  ;;  %v1937_v52 = vmax.f32 %v1936_v6, %v3262_v11  ;;  %v1939_v62 = vmax.f32 %v3264_v12, %v2716_v60  ;;  %v1554_v1 = vpop.f32.mrb[39].mxu0  ;;  %v2780_v50 = vpop.f32.mrb[38].mxu1 }
 0x161   : > { %v2054_v9 = vmax.f32 %v2022_v58, 0.0  ;;  %v1931_v10 = vmax.f32 %v1930_v7, %v3266_v13  ;;  %v1933_v49 = vmax.f32 %v3268_v14, %v1554_v1  ;;  %v1810_v57 = vpop.f32.mrb[39].mxu1 }
 0x162   : > { %v2523_v2 = vpack.c.bf16 %v2056_v61, %v2055_v8  ;;  %v1938_v11 = vmax.f32 %v1937_v52, %v2779_v59  ;;  %v1940_v12 = vmax.f32 %v1939_v62, %v3270_v15 }
 0x163   : > { %v2518_v3 = vpack.c.bf16 %v2054_v9, %v2053_v55  ;;  %v1932_v51 = vmax.f32 %v1931_v10, %v1807_v63  ;;  %v1934_v4 = vmax.f32 %v1933_v49, %v3272_v16 }
 0x164   : > { %2595 = vst [vmem:[%s3396_s11 + $0x8] sm:$0xff] %v2523_v2   ;;  %v2027_v54 = vadd.f32 %v3379_v0, %v1938_v11  ;;  %v1941_v56 = vmax.f32 %v1940_v12, %v2780_v50 }
 0x165   : > { %2519 = vst [vmem:[%s3396_s11] sm:$0xff] %v2518_v3   ;;  %v2025_v5 = vadd.f32 %v3379_v0, %v1932_v51  ;;  %v1935_v13 = vmax.f32 %v1934_v4, %v1810_v57  ;;  %v2719_v6 = vpop.f32.mrb[40].mxu0 }
 0x166   : > { %v2028_v14 = vadd.f32 %v3379_v0, %v1941_v56  ;;  %v1948_v53 = vmax.f32 %v3274_v17, %v2719_v6  ;;  %v1567_v58 = vpop.f32.mrb[41].mxu0  ;;  %v2783_v59 = vpop.f32.mrb[40].mxu1  ;;  %v2059_v60 = vmax.f32 %v2027_v54, 0.0 }
 0x167   : > { %v2026_v15 = vadd.f32 %v3379_v0, %v1935_v13  ;;  %v1942_v7 = vmax.f32 %v3276_v18, %v1567_v58  ;;  %v2720_v16 = vpop.f32.mrb[42].mxu0  ;;  %v1823_v62 = vpop.f32.mrb[41].mxu1  ;;  %v2057_v1 = vmax.f32 %v2025_v5, 0.0 }
 0x168   : > { %v2060_v8 = vmax.f32 %v2028_v14, 0.0  ;;  %v1949_v61 = vmax.f32 %v1948_v53, %v3278_v19  ;;  %v1951_v52 = vmax.f32 %v3280_v20, %v2720_v16  ;;  %v1570_v63 = vpop.f32.mrb[43].mxu0  ;;  %v2784_v10 = vpop.f32.mrb[42].mxu1 }
 0x169   : > { %v2058_v55 = vmax.f32 %v2026_v15, 0.0  ;;  %v1943_v17 = vmax.f32 %v1942_v7, %v3282_v21  ;;  %v1945_v9 = vmax.f32 %v3284_v22, %v1570_v63  ;;  %v1826_v2 = vpop.f32.mrb[43].mxu1 }
 0x16a   : > { %v2533_v18 = vpack.c.bf16 %v2060_v8, %v2059_v60  ;;  %v1950_v49 = vmax.f32 %v1949_v61, %v2783_v59  ;;  %v1952_v50 = vmax.f32 %v1951_v52, %v3286_v23 }
 0x16b   : > { %v2528_v11 = vpack.c.bf16 %v2058_v55, %v2057_v1  ;;  %v1944_v19 = vmax.f32 %v1943_v17, %v1823_v62  ;;  %v1946_v12 = vmax.f32 %v1945_v9, %v3288_v24 }
 0x16c   : > { %2597 = vst [vmem:[%s3396_s11 + $0x18] sm:$0xff] %v2533_v18   ;;  %v2031_v20 = vadd.f32 %v3379_v0, %v1950_v49  ;;  %v1953_v57 = vmax.f32 %v1952_v50, %v2784_v10 }
 0x16d   : > { %2596 = vst [vmem:[%s3396_s11 + $0x10] sm:$0xff] %v2528_v11   ;;  %v2029_v3 = vadd.f32 %v3379_v0, %v1944_v19  ;;  %v1947_v21 = vmax.f32 %v1946_v12, %v1826_v2  ;;  %v2723_v51 = vpop.f32.mrb[44].mxu0 }
 0x16e   : > { %v2032_v22 = vadd.f32 %v3379_v0, %v1953_v57  ;;  %v1960_v4 = vmax.f32 %v3290_v25, %v2723_v51  ;;  %v1583_v54 = vpop.f32.mrb[45].mxu0  ;;  %v2787_v5 = vpop.f32.mrb[44].mxu1  ;;  %v2063_v13 = vmax.f32 %v2031_v20, 0.0 }
 0x16f   : > { %v2030_v23 = vadd.f32 %v3379_v0, %v1947_v21  ;;  %v1954_v56 = vmax.f32 %v3292_v26, %v1583_v54  ;;  %v2724_v24 = vpop.f32.mrb[46].mxu0  ;;  %v1839_v58 = vpop.f32.mrb[45].mxu1  ;;  %v2061_v7 = vmax.f32 %v2029_v3, 0.0 }
 0x170   : > { %v2064_v6 = vmax.f32 %v2032_v22, 0.0  ;;  %v1961_v14 = vmax.f32 %v1960_v4, %v3294_v27  ;;  %v1963_v53 = vmax.f32 %v3296_v28, %v2724_v24  ;;  %v1586_v15 = vpop.f32.mrb[47].mxu0  ;;  %v2788_v60 = vpop.f32.mrb[46].mxu1 }
 0x171   : > { %v2062_v59 = vmax.f32 %v2030_v23, 0.0  ;;  %v1955_v25 = vmax.f32 %v1954_v56, %v3298_v29  ;;  %v1957_v16 = vmax.f32 %v3300_v30, %v1586_v15  ;;  %v1842_v52 = vpop.f32.mrb[47].mxu1 }
 0x172   : > { %v2543_v26 = vpack.c.bf16 %v2064_v6, %v2063_v13  ;;  %v1962_v8 = vmax.f32 %v1961_v14, %v2787_v5  ;;  %v1964_v61 = vmax.f32 %v1963_v53, %v3302_v31 }
 0x173   : > { %v2538_v62 = vpack.c.bf16 %v2062_v59, %v2061_v7  ;;  %v1956_v27 = vmax.f32 %v1955_v25, %v1839_v58  ;;  %v1958_v63 = vmax.f32 %v1957_v16, %v3304_v32 }
 0x174   : > { %2599 = vst [vmem:[%s3396_s11 + $0x28] sm:$0xff] %v2543_v26   ;;  %v2035_v28 = vadd.f32 %v3379_v0, %v1962_v8  ;;  %v1965_v1 = vmax.f32 %v1964_v61, %v2788_v60 }
 0x175   : > { %2598 = vst [vmem:[%s3396_s11 + $0x20] sm:$0xff] %v2538_v62   ;;  %v2033_v55 = vadd.f32 %v3379_v0, %v1956_v27  ;;  %v1959_v29 = vmax.f32 %v1958_v63, %v1842_v52  ;;  %v2727_v17 = vpop.f32.mrb[48].mxu0 }
 0x176   : > { %v2036_v30 = vadd.f32 %v3379_v0, %v1965_v1  ;;  %v1972_v9 = vmax.f32 %v3306_v33, %v2727_v17  ;;  %v1599_v10 = vpop.f32.mrb[49].mxu0  ;;  %v2791_v49 = vpop.f32.mrb[48].mxu1  ;;  %v2067_v50 = vmax.f32 %v2035_v28, 0.0 }
 0x177   : > { %v2034_v31 = vadd.f32 %v3379_v0, %v1959_v29  ;;  %v1966_v18 = vmax.f32 %v3308_v34, %v1599_v10  ;;  %v2728_v32 = vpop.f32.mrb[50].mxu0  ;;  %v1855_v12 = vpop.f32.mrb[49].mxu1  ;;  %v2065_v57 = vmax.f32 %v2033_v55, 0.0 }
 0x178   : > { %v2068_v2 = vmax.f32 %v2036_v30, 0.0  ;;  %v1973_v11 = vmax.f32 %v1972_v9, %v3310_v35  ;;  %v1975_v19 = vmax.f32 %v3312_v36, %v2728_v32  ;;  %v1602_v20 = vpop.f32.mrb[51].mxu0  ;;  %v2792_v51 = vpop.f32.mrb[50].mxu1  ;;  %v3524_v30 = vld [vmem:[#allocation3_spill] sm:$0xff] }
 0x179   : > { %v2066_v3 = vmax.f32 %v2034_v31, 0.0  ;;  %v1967_v33 = vmax.f32 %v1966_v18, %v3314_v37  ;;  %v1969_v21 = vmax.f32 %v3316_v38, %v1602_v20  ;;  %v1858_v54 = vpop.f32.mrb[51].mxu1  ;;  %v3525_v31 = vld [vmem:[#allocation4_spill] sm:$0xff] }
 0x17a   : > { %v2553_v34 = vpack.c.bf16 %v2068_v2, %v2067_v50  ;;  %v1974_v22 = vmax.f32 %v1973_v11, %v2791_v49  ;;  %v1976_v4 = vmax.f32 %v1975_v19, %v3318_v39  ;;  %v3526_v2 = vld [vmem:[#allocation5_spill] sm:$0xff]  ;;  %v3527_v19 = vld [vmem:[#allocation6_spill] sm:$0xff] }
 0x17b   : > { %v2548_v23 = vpack.c.bf16 %v2066_v3, %v2065_v57  ;;  %v1968_v35 = vmax.f32 %v1967_v33, %v1855_v12  ;;  %v1970_v56 = vmax.f32 %v1969_v21, %v3320_v40  ;;  %v3528_v21 = vld [vmem:[#allocation7_spill] sm:$0xff] }
 0x17c   : > { %2601 = vst [vmem:[%s3396_s11 + $0x38] sm:$0xff] %v2553_v34   ;;  %v2039_v36 = vadd.f32 %v3379_v0, %v1974_v22  ;;  %v1977_v5 = vmax.f32 %v1976_v4, %v2792_v51  ;;  %v3529_v34 = vld [vmem:[#allocation8_spill] sm:$0xff] }
 0x17d   : > { %2600 = vst [vmem:[%s3396_s11 + $0x30] sm:$0xff] %v2548_v23   ;;  %v2037_v24 = vadd.f32 %v3379_v0, %v1968_v35  ;;  %v1971_v37 = vmax.f32 %v1970_v56, %v1858_v54  ;;  %v2731_v13 = vpop.f32.mrb[52].mxu0  ;;  %v3530_v35 = vld [vmem:[#allocation9_spill] sm:$0xff] }
 0x17e   : > { %v2040_v38 = vadd.f32 %v3379_v0, %v1977_v5  ;;  %v1984_v6 = vmax.f32 %v3322_v41, %v2731_v13  ;;  %v1615_v14 = vpop.f32.mrb[53].mxu0  ;;  %v2795_v58 = vpop.f32.mrb[52].mxu1  ;;  %v2071_v15 = vmax.f32 %v2039_v36, 0.0 }
 0x17f   : > { %v2038_v39 = vadd.f32 %v3379_v0, %v1971_v37  ;;  %v1978_v53 = vmax.f32 %v3324_v42, %v1615_v14  ;;  %v2732_v40 = vpop.f32.mrb[54].mxu0  ;;  %v1871_v16 = vpop.f32.mrb[53].mxu1  ;;  %v2069_v26 = vmax.f32 %v2037_v24, 0.0  ;;  %v3531_v37 = vld [vmem:[#allocation10_spill] sm:$0xff] }
 0x180   : > { %v2072_v7 = vmax.f32 %v2040_v38, 0.0  ;;  %v1985_v59 = vmax.f32 %v1984_v6, %v3326_v43  ;;  %v1987_v25 = vmax.f32 %v3328_v44, %v2732_v40  ;;  %v1618_v60 = vpop.f32.mrb[55].mxu0  ;;  %v2796_v52 = vpop.f32.mrb[54].mxu1  ;;  %v3532_v40 = vld [vmem:[#allocation11_spill] sm:$0xff] }
 0x181   : > { %v2070_v8 = vmax.f32 %v2038_v39, 0.0  ;;  %v1979_v41 = vmax.f32 %v1978_v53, %v3330_v45  ;;  %v1981_v61 = vmax.f32 %v3332_v46, %v1618_v60  ;;  %v1874_v63 = vpop.f32.mrb[55].mxu1 }
 0x182   : > { %v2563_v42 = vpack.c.bf16 %v2072_v7, %v2071_v15  ;;  %v1986_v62 = vmax.f32 %v1985_v59, %v2795_v58  ;;  %v1988_v27 = vmax.f32 %v1987_v25, %v3334_v47  ;;  %v3533_v25 = vld [vmem:[#allocation12_spill] sm:$0xff] }
 0x183   : > { %v2558_v28 = vpack.c.bf16 %v2070_v8, %v2069_v26  ;;  %v1980_v43 = vmax.f32 %v1979_v41, %v1871_v16  ;;  %v1982_v1 = vmax.f32 %v1981_v61, %v3336_v48  ;;  %v3534_v61 = vld [vmem:[#allocation13_spill] sm:$0xff] }
 0x184   : > { %2603 = vst [vmem:[%s3396_s11 + $0x48] sm:$0xff] %v2563_v42   ;;  %v2043_v44 = vadd.f32 %v3379_v0, %v1986_v62  ;;  %v1989_v55 = vmax.f32 %v1988_v27, %v2796_v52  ;;  %v3535_v42 = vld [vmem:[#allocation14_spill] sm:$0xff] }
 0x185   : > { %2602 = vst [vmem:[%s3396_s11 + $0x40] sm:$0xff] %v2558_v28   ;;  %v2041_v29 = vadd.f32 %v3379_v0, %v1980_v43  ;;  %v1983_v45 = vmax.f32 %v1982_v1, %v1874_v63  ;;  %v2735_v17 = vpop.f32.mrb[56].mxu0  ;;  %v3536_v1 = vld [vmem:[#allocation15_spill] sm:$0xff] }
 0x186   : > { %v2044_v46 = vadd.f32 %v3379_v0, %v1989_v55  ;;  %v1996_v9 = vmax.f32 %v3524_v30, %v2735_v17  ;;  %v1631_v10 = vpop.f32.mrb[57].mxu0  ;;  %v2799_v49 = vpop.f32.mrb[56].mxu1  ;;  %v2075_v32 = vmax.f32 %v2043_v44, 0.0  ;;  %v3537_v55 = vld [vmem:[#allocation16_spill] sm:$0xff]  ;;  %v3538_v30 = vld [vmem:[#allocation17_spill] sm:$0xff] }
 0x187   : > { %v2042_v47 = vadd.f32 %v3379_v0, %v1983_v45  ;;  %v1990_v18 = vmax.f32 %v3525_v31, %v1631_v10  ;;  %v2736_v48 = vpop.f32.mrb[58].mxu0  ;;  %v1887_v20 = vpop.f32.mrb[57].mxu1  ;;  %v2073_v3 = vmax.f32 %v2041_v29, 0.0 }
 0x188   : > { %v2076_v50 = vmax.f32 %v2044_v46, 0.0  ;;  %v1997_v11 = vmax.f32 %v1996_v9, %v3526_v2  ;;  %v1999_v12 = vmax.f32 %v3527_v19, %v2736_v48  ;;  %v1634_v57 = vpop.f32.mrb[59].mxu0  ;;  %v2800_v4 = vpop.f32.mrb[58].mxu1 }
 0x189   : > { %v2074_v33 = vmax.f32 %v2042_v47, 0.0  ;;  %v1991_v51 = vmax.f32 %v1990_v18, %v3528_v21  ;;  %v1993_v22 = vmax.f32 %v3529_v34, %v1634_v57  ;;  %v1890_v36 = vpop.f32.mrb[59].mxu1  ;;  %v3539_v18 = vld [vmem:[#allocation18_spill] sm:$0xff] }
 0x18a   : > { %v2573_v54 = vpack.c.bf16 %v2076_v50, %v2075_v32  ;;  %v1998_v23 = vmax.f32 %v1997_v11, %v2799_v49  ;;  %v2000_v56 = vmax.f32 %v1999_v12, %v3530_v35 }
 0x18b   : > { %v2568_v5 = vpack.c.bf16 %v2074_v33, %v2073_v3  ;;  %v1992_v24 = vmax.f32 %v1991_v51, %v1887_v20  ;;  %v1994_v13 = vmax.f32 %v1993_v22, %v3531_v37 }
 0x18c   : > { %2605 = vst [vmem:[%s3396_s11 + $0x58] sm:$0xff] %v2573_v54   ;;  %v2047_v38 = vadd.f32 %v3379_v0, %v1998_v23  ;;  %v2001_v6 = vmax.f32 %v2000_v56, %v2800_v4 }
 0x18d   : > { %2604 = vst [vmem:[%s3396_s11 + $0x50] sm:$0xff] %v2568_v5   ;;  %v2045_v14 = vadd.f32 %v3379_v0, %v1992_v24  ;;  %v1995_v39 = vmax.f32 %v1994_v13, %v1890_v36  ;;  %v2739_v53 = vpop.f32.mrb[60].mxu0 }
 0x18e   : > { %v2048_v58 = vadd.f32 %v3379_v0, %v2001_v6  ;;  %v2008_v15 = vmax.f32 %v3532_v40, %v2739_v53  ;;  %v1647_v7 = vpop.f32.mrb[61].mxu0  ;;  %v2803_v60 = vpop.f32.mrb[60].mxu1  ;;  %v2079_v8 = vmax.f32 %v2047_v38, 0.0 }
 0x18f   : > { %v2046_v59 = vadd.f32 %v3379_v0, %v1995_v39  ;;  %v2002_v16 = vmax.f32 %v3533_v25, %v1647_v7  ;;  %v2740_v26 = vpop.f32.mrb[62].mxu0  ;;  %v1903_v27 = vpop.f32.mrb[61].mxu1  ;;  %v2077_v28 = vmax.f32 %v2045_v14, 0.0 }
 0x190   : > { %v2080_v41 = vmax.f32 %v2048_v58, 0.0  ;;  %v2009_v52 = vmax.f32 %v2008_v15, %v3534_v61  ;;  %v2011_v62 = vmax.f32 %v3535_v42, %v2740_v26  ;;  %v1650_v63 = vpop.f32.mrb[63].mxu0  ;;  %v2804_v45 = vpop.f32.mrb[62].mxu1 }
 0x191   : > { %v2078_v43 = vmax.f32 %v2046_v59, 0.0  ;;  %v2003_v44 = vmax.f32 %v2002_v16, %v3536_v1  ;;  %v2005_v29 = vmax.f32 %v3537_v55, %v1650_v63  ;;  %v1906_v10 = vpop.f32.mrb[63].mxu1 }
 0x192   : > { %v2583_v17 = vpack.c.bf16 %v2080_v41, %v2079_v8  ;;  %v2010_v46 = vmax.f32 %v2009_v52, %v2803_v60  ;;  %v2012_v9 = vmax.f32 %v2011_v62, %v3538_v30 }
 0x193   : > { %v2578_v47 = vpack.c.bf16 %v2078_v43, %v2077_v28  ;;  %v2004_v31 = vmax.f32 %v2003_v44, %v1903_v27  ;;  %v2006_v49 = vmax.f32 %v2005_v29, %v3539_v18 }
 0x194   : > { %2607 = vst [vmem:[%s3396_s11 + $0x68] sm:$0xff] %v2583_v17   ;;  %v2051_v48 = vadd.f32 %v3379_v0, %v2010_v46  ;;  %v2013_v32 = vmax.f32 %v2012_v9, %v2804_v45 }
 0x195   : > { %2606 = vst [vmem:[%s3396_s11 + $0x60] sm:$0xff] %v2578_v47   ;;  %v2049_v50 = vadd.f32 %v3379_v0, %v2004_v31  ;;  %v2007_v2 = vmax.f32 %v2006_v49, %v1906_v10 }
 0x196   : > { %v2052_v11 = vadd.f32 %v3379_v0, %v2013_v32  ;;  %v2083_v12 = vmax.f32 %v2051_v48, 0.0 }
 0x197   : > { %v2050_v19 = vadd.f32 %v3379_v0, %v2007_v2  ;;  %v2081_v57 = vmax.f32 %v2049_v50, 0.0 }
 0x198   : > { %v2084_v20 = vmax.f32 %v2052_v11, 0.0 }
 0x199   : > { %v2082_v3 = vmax.f32 %v2050_v19, 0.0 }
 0x19a   : > { %v2593_v33 = vpack.c.bf16 %v2084_v20, %v2083_v12 }
 0x19b   : > { %v2588_v21 = vpack.c.bf16 %v2082_v3, %v2081_v57 }
 0x19c   : > { %2609 = vst [vmem:[%s3396_s11 + $0x78] sm:$0xff] %v2593_v33  }
 0x19d   : > { %2608 = vst [vmem:[%s3396_s11 + $0x70] sm:$0xff] %v2588_v21  }
 0x19e PF: > { %p10_p9 = scmp.ge.s32.totalorder %s2957_s16, 4   ;;  %s3540_s12 = smov %s2914_s13 }
 0x19f   : > { %s3541_s13 = smov %s2966_s19  ;;  %s3542_s14 = smov %s2957_s16 }
 0x1a0   :  { %12 = sbr.rel (!%p10_p9) target bundleno = 2 (0x2), region = 108 }

// kernel: net_forward.4
= control target key start
LH: loop header
LB: loop body
LE: loop exit
PB: predicated region body
PF: predicated region fallthrough
CT: control target
= control target key end

     0   :  { %v2120_v0 = vmov 0   ;;  %vm767_vm0 = vcmask 261120   ;;  %s2820_s1 = inlined_call_operand.vmem [shape: bf16[288,128], index: 1, kind: input, shape index: {}]   ;;  %s2821_s0 = inlined_call_operand.vmem [shape: bf16[4,128,288], index: 0, kind: input, shape index: {}]   ;;  %s2822_s2 = inlined_call_operand.vmem [shape: f32[1,128], index: 2, kind: input, shape index: {}]   ;;  %s2823_s3 = inlined_call_operand.vmem [shape: bf16[128,128], index: 3, kind: output, shape index: {}]  }
   0x1   :  { %864 = vmatprep.subr.bf16.mxu0 %v2120_v0  ;;  %1941 = vmatprep.subr.bf16.mxu1 %v2120_v0  ;;  %v1974_v1 = vld [vmem:[%s2820_s1] sm:$0xff]   ;;  %v1975_v2 = vld [vmem:[%s2820_s1 + $0x8] sm:$0xff]   ;;  %v1976_v3 = vld [vmem:[%s2820_s1 + $0x10] sm:$0xff]  }
   0x2   :  { %865 = vmatpush1.bf16.msra.mxu0 %v1974_v1  ;;  %1957 = vmatpush1.bf16.msra.mxu1 %v1974_v1  ;;  %v1977_v4 = vld [vmem:[%s2820_s1 + $0x18] sm:$0xff]   ;;  %v1978_v5 = vld [vmem:[%s2820_s1 + $0x20] sm:$0xff]   ;;  %v1979_v7 = vld [vmem:[%s2820_s1 + $0x28] sm:$0xff]  }
   0x3   :  { %866 = vmatprep.subr.bf16.mxu0 %v2120_v0  ;;  %1942 = vmatprep.subr.bf16.mxu1 %v2120_v0  ;;  %v1992_v6 = vld [vmem:[%s2821_s0 + $0x4] ss:$12 sps:$4 sm:$0xff]   ;;  %v1981_v10 = vld [vmem:[%s2820_s1 + $0x38] sm:$0xff]   ;;  %v1983_v12 = vld [vmem:[%s2820_s1 + $0x48] sm:$0xff]  }
   0x4   :  { %v1995_v8 = vld [vmem:[%s2821_s0 + $0x244] ss:$12 sps:$4 sm:$0xff]   ;;  %896 = vmatprep.mubr.bf16.mxu0 %v1992_v6  ;;  %v1985_v14 = vld [vmem:[%s2820_s1 + $0x58] sm:$0xff]   ;;  %v1987_v16 = vld [vmem:[%s2820_s1 + $0x68] sm:$0xff]  }
   0x5   :  { %1088 = vmatprep.mubr.bf16.mxu1 %v1995_v8  ;;  %v1980_v9 = vld [vmem:[%s2820_s1 + $0x30] sm:$0xff]   ;;  %v1982_v11 = vld [vmem:[%s2820_s1 + $0x40] sm:$0xff]   ;;  %v1989_v18 = vld [vmem:[%s2820_s1 + $0x78] sm:$0xff]  }
   0x6   :  { %867 = vmatpush1.bf16.msra.mxu0 %v1975_v2  ;;  %1958 = vmatpush1.bf16.msra.mxu1 %v1975_v2  ;;  %v1984_v13 = vld [vmem:[%s2820_s1 + $0x50] sm:$0xff]   ;;  %v1986_v15 = vld [vmem:[%s2820_s1 + $0x60] sm:$0xff]   ;;  %v1997_v22 = vld [vmem:[%s2821_s0 + $0x1c] ss:$12 sps:$4 sm:$0xff]  }
   0x7   :  { %868 = vmatprep.subr.bf16.mxu0 %v2120_v0  ;;  %1943 = vmatprep.subr.bf16.mxu1 %v2120_v0  ;;  %v1988_v17 = vld [vmem:[%s2820_s1 + $0x70] sm:$0xff]   ;;  %v1996_v19 = vld [vmem:[%s2820_s1 + $0x80] sm:$0xff]   ;;  %v1999_v23 = vld [vmem:[%s2821_s0 + $0x25c] ss:$12 sps:$4 sm:$0xff]  }
   0x8   :  { %v1990_v20 = vld [vmem:[%s2821_s0] ss:$12 sps:$4 sm:$0xff]   ;;  %v2001_v25 = vld [vmem:[%s2821_s0 + $0x18] ss:$12 sps:$4 sm:$0xff]   ;;  %v2007_v29 = vld [vmem:[%s2821_s0 + $0x30] ss:$12 sps:$4 sm:$0xff]  }
   0x9   :  { %v1993_v21 = vld [vmem:[%s2821_s0 + $0x240] ss:$12 sps:$4 sm:$0xff]   ;;  %v2002_v26 = vld [vmem:[%s2821_s0 + $0x258] ss:$12 sps:$4 sm:$0xff]   ;;  %v2008_v30 = vld [vmem:[%s2821_s0 + $0x270] ss:$12 sps:$4 sm:$0xff]  }
   0xa   :  { %869 = vmatpush1.bf16.msra.mxu0 %v1976_v3  ;;  %1959 = vmatpush1.bf16.msra.mxu1 %v1976_v3  ;;  %v2021_v24 = vld [vmem:[%s2820_s1 + $0x88] sm:$0xff]   ;;  %v2003_v27 = vld [vmem:[%s2821_s0 + $0x34] ss:$12 sps:$4 sm:$0xff]   ;;  %v2015_v35 = vld [vmem:[%s2821_s0 + $0x64] ss:$12 sps:$4 sm:$0xff]  }
   0xb   :  { %870 = vmatprep.subr.bf16.mxu0 %v2120_v0  ;;  %1944 = vmatprep.subr.bf16.mxu1 %v2120_v0  ;;  %v2005_v28 = vld [vmem:[%s2821_s0 + $0x274] ss:$12 sps:$4 sm:$0xff]   ;;  %v2009_v31 = vld [vmem:[%s2821_s0 + $0x4c] ss:$12 sps:$4 sm:$0xff]   ;;  %v2017_v36 = vld [vmem:[%s2821_s0 + $0x2a4] ss:$12 sps:$4 sm:$0xff]  }
   0xc   :  { %v2011_v32 = vld [vmem:[%s2821_s0 + $0x28c] ss:$12 sps:$4 sm:$0xff]   ;;  %v2013_v33 = vld [vmem:[%s2821_s0 + $0x48] ss:$12 sps:$4 sm:$0xff]   ;;  %v2032_v45 = vld [vmem:[%s2821_s0 + $0x90] ss:$12 sps:$4 sm:$0xff]  }
   0xd   :  { %v2014_v34 = vld [vmem:[%s2821_s0 + $0x288] ss:$12 sps:$4 sm:$0xff]   ;;  %v2019_v37 = vld [vmem:[%s2821_s0 + $0x60] ss:$12 sps:$4 sm:$0xff]   ;;  %v2026_v41 = vld [vmem:[%s2821_s0 + $0x78] ss:$12 sps:$4 sm:$0xff]  }
   0xe   :  { %871 = vmatpush1.bf16.msra.mxu0 %v1977_v4  ;;  %1960 = vmatpush1.bf16.msra.mxu1 %v1977_v4  ;;  %v2020_v38 = vld [vmem:[%s2821_s0 + $0x2a0] ss:$12 sps:$4 sm:$0xff]   ;;  %v2022_v39 = vld [vmem:[%s2821_s0 + $0x7c] ss:$12 sps:$4 sm:$0xff]   ;;  %v2027_v42 = vld [vmem:[%s2821_s0 + $0x2b8] ss:$12 sps:$4 sm:$0xff]  }
   0xf   :  { %872 = vmatprep.subr.bf16.mxu0 %v2120_v0  ;;  %1945 = vmatprep.subr.bf16.mxu1 %v2120_v0  ;;  %v2024_v40 = vld [vmem:[%s2821_s0 + $0x2bc] ss:$12 sps:$4 sm:$0xff]   ;;  %v2028_v43 = vld [vmem:[%s2821_s0 + $0x94] ss:$12 sps:$4 sm:$0xff]   ;;  %v2034_v47 = vld [vmem:[%s2821_s0 + $0xac] ss:$12 sps:$4 sm:$0xff]  }
  0x10   :  { %v2030_v44 = vld [vmem:[%s2821_s0 + $0x2d4] ss:$12 sps:$4 sm:$0xff]   ;;  %v2033_v46 = vld [vmem:[%s2821_s0 + $0x2d0] ss:$12 sps:$4 sm:$0xff]   ;;  %v2036_v48 = vld [vmem:[%s2821_s0 + $0x2ec] ss:$12 sps:$4 sm:$0xff]  }
  0x11   :  { %v2038_v49 = vld [vmem:[%s2821_s0 + $0xa8] ss:$12 sps:$4 sm:$0xff]   ;;  %v2040_v51 = vld [vmem:[%s2821_s0 + $0xc4] ss:$12 sps:$4 sm:$0xff]   ;;  %v2043_v53 = vld [vmem:[%s2821_s0 + $0xc0] ss:$12 sps:$4 sm:$0xff]  }
  0x12   :  { %873 = vmatpush1.bf16.msra.mxu0 %v1978_v5  ;;  %1961 = vmatpush1.bf16.msra.mxu1 %v1978_v5  ;;  %v2039_v50 = vld [vmem:[%s2821_s0 + $0x2e8] ss:$12 sps:$4 sm:$0xff]   ;;  %v2044_v54 = vld [vmem:[%s2821_s0 + $0x20] ss:$12 sps:$4 sm:$0xff]   ;;  %v2047_v56 = vld [vmem:[%s2821_s0 + $0x38] ss:$12 sps:$4 sm:$0xff]  }
  0x13   :  { %874 = vmatprep.subr.bf16.mxu0 %v2120_v0  ;;  %1946 = vmatprep.subr.bf16.mxu1 %v2120_v0  ;;  %v2042_v52 = vld [vmem:[%s2821_s0 + $0x8] ss:$12 sps:$4 sm:$0xff]   ;;  %v2048_v57 = vld [vmem:[%s2821_s0 + $0xd8] ss:$12 sps:$4 sm:$0xff]   ;;  %v2049_v58 = vld [vmem:[%s2821_s0 + $0x50] ss:$12 sps:$4 sm:$0xff]  }
  0x14   :  { %v2045_v55 = vld [vmem:[%s2821_s0 + $0xdc] ss:$12 sps:$4 sm:$0xff]   ;;  %v2050_v59 = vld [vmem:[%s2821_s0 + $0xf4] ss:$12 sps:$4 sm:$0xff]   ;;  %v2055_v63 = vld [vmem:[%s2821_s0 + $0x10c] ss:$12 sps:$4 sm:$0xff]  }
  0x15   :  { %v2052_v60 = vld [vmem:[%s2821_s0 + $0x68] ss:$12 sps:$4 sm:$0xff]   ;;  %v2053_v61 = vld [vmem:[%s2821_s0 + $0xf0] ss:$12 sps:$4 sm:$0xff]   ;;  %v2054_v62 = vld [vmem:[%s2821_s0 + $0x80] ss:$12 sps:$4 sm:$0xff]  }
  0x16   :  { %875 = vmatpush1.bf16.msra.mxu0 %v1979_v7  ;;  %1962 = vmatpush1.bf16.msra.mxu1 %v1979_v7  ;;  %v2058_v1 = vld [vmem:[%s2821_s0 + $0x108] ss:$12 sps:$4 sm:$0xff]   ;;  %v2059_v2 = vld [vmem:[%s2821_s0 + $0xb0] ss:$12 sps:$4 sm:$0xff]   ;;  %v2063_v5 = vld [vmem:[%s2821_s0 + $0x120] ss:$12 sps:$4 sm:$0xff]  }
  0x17   :  { %876 = vmatprep.subr.bf16.mxu0 %v2120_v0  ;;  %1947 = vmatprep.subr.bf16.mxu1 %v2120_v0  ;;  %v2060_v3 = vld [vmem:[%s2821_s0 + $0x124] ss:$12 sps:$4 sm:$0xff]   ;;  %v2062_v4 = vld [vmem:[%s2821_s0 + $0xc8] ss:$12 sps:$4 sm:$0xff]   ;;  %v2064_v6 = vld [vmem:[%s2821_s0 + $0xe0] ss:$12 sps:$4 sm:$0xff]  }
  0x18   :  { %v2065_v7 = vld [vmem:[%s2821_s0 + $0x13c] ss:$12 sps:$4 sm:$0xff]   ;;  %v2067_v8 = vld [vmem:[%s2821_s0 + $0xf8] ss:$12 sps:$4 sm:$0xff]  }
  0x1a   :  { %877 = vmatpush1.bf16.msra.mxu0 %v1980_v9  ;;  %1963 = vmatpush1.bf16.msra.mxu1 %v1980_v9  ;;  %v2068_v9 = vld [vmem:[%s2821_s0 + $0x138] ss:$12 sps:$4 sm:$0xff]  }
  0x1b   :  { %878 = vmatprep.subr.bf16.mxu0 %v2120_v0  ;;  %1948 = vmatprep.subr.bf16.mxu1 %v2120_v0 }
  0x1e   :  { %879 = vmatpush1.bf16.msra.mxu0 %v1981_v10  ;;  %1964 = vmatpush1.bf16.msra.mxu1 %v1981_v10  ;;  %v2069_v10 = vld [vmem:[%s2821_s0 + $0x110] ss:$12 sps:$4 sm:$0xff]  }
  0x1f   :  { %880 = vmatprep.subr.bf16.mxu0 %v2120_v0  ;;  %1949 = vmatprep.subr.bf16.mxu1 %v2120_v0 }
  0x22   :  { %881 = vmatpush1.bf16.msra.mxu0 %v1982_v11  ;;  %1965 = vmatpush1.bf16.msra.mxu1 %v1982_v11  ;;  %v2070_v11 = vld [vmem:[%s2821_s0 + $0x154] ss:$12 sps:$4 sm:$0xff]  }
  0x23   :  { %882 = vmatprep.subr.bf16.mxu0 %v2120_v0  ;;  %1950 = vmatprep.subr.bf16.mxu1 %v2120_v0 }
  0x26   :  { %883 = vmatpush1.bf16.msra.mxu0 %v1983_v12  ;;  %1966 = vmatpush1.bf16.msra.mxu1 %v1983_v12  ;;  %v2072_v12 = vld [vmem:[%s2821_s0 + $0x128] ss:$12 sps:$4 sm:$0xff]  }
  0x27   :  { %884 = vmatprep.subr.bf16.mxu0 %v2120_v0  ;;  %1951 = vmatprep.subr.bf16.mxu1 %v2120_v0 }
  0x2a   :  { %885 = vmatpush1.bf16.msra.mxu0 %v1984_v13  ;;  %1967 = vmatpush1.bf16.msra.mxu1 %v1984_v13  ;;  %v2073_v13 = vld [vmem:[%s2821_s0 + $0x150] ss:$12 sps:$4 sm:$0xff]  }
  0x2b   :  { %886 = vmatprep.subr.bf16.mxu0 %v2120_v0  ;;  %1952 = vmatprep.subr.bf16.mxu1 %v2120_v0 }
  0x2e   :  { %887 = vmatpush1.bf16.msra.mxu0 %v1985_v14  ;;  %1968 = vmatpush1.bf16.msra.mxu1 %v1985_v14  ;;  %v2074_v14 = vld [vmem:[%s2821_s0 + $0x140] ss:$12 sps:$4 sm:$0xff]  }
  0x2f   :  { %888 = vmatprep.subr.bf16.mxu0 %v2120_v0  ;;  %1953 = vmatprep.subr.bf16.mxu1 %v2120_v0 }
  0x32   :  { %889 = vmatpush1.bf16.msra.mxu0 %v1986_v15  ;;  %1969 = vmatpush1.bf16.msra.mxu1 %v1986_v15  ;;  %v2075_v15 = vld [vmem:[%s2821_s0 + $0x16c] ss:$12 sps:$4 sm:$0xff]  }
  0x33   :  { %890 = vmatprep.subr.bf16.mxu0 %v2120_v0  ;;  %1954 = vmatprep.subr.bf16.mxu1 %v2120_v0 }
  0x36   :  { %891 = vmatpush1.bf16.msra.mxu0 %v1987_v16  ;;  %1970 = vmatpush1.bf16.msra.mxu1 %v1987_v16  ;;  %v2077_v16 = vld [vmem:[%s2821_s0 + $0x158] ss:$12 sps:$4 sm:$0xff]  }
  0x37   :  { %892 = vmatprep.subr.bf16.mxu0 %v2120_v0  ;;  %1955 = vmatprep.subr.bf16.mxu1 %v2120_v0 }
  0x3a   :  { %893 = vmatpush1.bf16.msra.mxu0 %v1988_v17  ;;  %1971 = vmatpush1.bf16.msra.mxu1 %v1988_v17  ;;  %v2078_v17 = vld [vmem:[%s2821_s0 + $0x168] ss:$12 sps:$4 sm:$0xff]  }
  0x3b   :  { %894 = vmatprep.subr.bf16.mxu0 %v2120_v0  ;;  %1956 = vmatprep.subr.bf16.mxu1 %v2120_v0  ;;  %v2057_v0 = vld [vmem:[%s2821_s0 + $0x98] ss:$12 sps:$4 sm:$0xff]  }
  0x3e   :  { %895 = vmatpush1.bf16.msra.mxu0 %v1989_v18  ;;  %1972 = vmatpush1.bf16.msra.mxu1 %v1989_v18  ;;  %v2079_v18 = vld [vmem:[%s2821_s0 + $0x170] ss:$12 sps:$4 sm:$0xff]  }
  0x3f   :  { %1873 = vmatprep.subr.bf16.mxu1 %v1996_v19 }
  0x41   :  { %897 = vmatmul.mubr.bf16.vlgmr.msra.gmra.mrb[0].mxu0 %v1990_v20  ;;  %1089 = vmatmul.mubr.bf16.vlgmr.msra.gmra.mrb[0].mxu1 %v1993_v21  ;;  %v2082_v20 = vld [vmem:[%s2821_s0 + $0x188] ss:$12 sps:$4 sm:$0xff]   ;;  %v2083_v21 = vld [vmem:[%s2821_s0 + $0x180] ss:$12 sps:$4 sm:$0xff]  }
  0x42   :  { %1874 = vmatpush3.bf16.msra.mxu1 %v1996_v19  ;;  %904 = vmatprep.mubr.bf16.mxu0 %v1997_v22  ;;  %v2080_v19 = vld [vmem:[%s2821_s0 + $0x184] ss:$12 sps:$4 sm:$0xff]   ;;  %v2084_v22 = vld [vmem:[%s2821_s0 + $0x1a0] ss:$12 sps:$4 sm:$0xff]  }
  0x43   :  { %1096 = vmatprep.mubr.bf16.mxu1 %v1999_v23  ;;  %1875 = vmatprep.subr.bf16.mxu1 %v2021_v24  ;;  %v2085_v23 = vld [vmem:[%s2821_s0 + $0x19c] ss:$12 sps:$4 sm:$0xff]  }
  0x46   :  { %1876 = vmatpush3.bf16.msra.mxu1 %v2021_v24  ;;  %v2087_v24 = vld [vmem:[%s2821_s0 + $0x1b8] ss:$12 sps:$4 sm:$0xff]  }
  0x49   :  { %905 = vmatmul.mubr.bf16.gmra.mrb[4].mxu0 %v2001_v25  ;;  %1097 = vmatmul.mubr.bf16.gmra.mrb[4].mxu1 %v2002_v26  ;;  %v2088_v25 = vld [vmem:[%s2821_s0 + $0x198] ss:$12 sps:$4 sm:$0xff]   ;;  %v2089_v26 = vld [vmem:[%s2821_s0 + $0x1d0] ss:$12 sps:$4 sm:$0xff]  }
  0x4a   :  { %912 = vmatprep.mubr.bf16.mxu0 %v2003_v27  ;;  %1104 = vmatprep.mubr.bf16.mxu1 %v2005_v28  ;;  %v2090_v27 = vld [vmem:[%s2821_s0 + $0x1b4] ss:$12 sps:$4 sm:$0xff]  }
  0x4b   :  { %v2092_v28 = vld [vmem:[%s2821_s0 + $0x1e8] ss:$12 sps:$4 sm:$0xff]  }
  0x51   :  { %913 = vmatmul.mubr.bf16.gmra.mrb[8].mxu0 %v2007_v29  ;;  %1105 = vmatmul.mubr.bf16.gmra.mrb[8].mxu1 %v2008_v30  ;;  %v2093_v29 = vld [vmem:[%s2821_s0 + $0x1b0] ss:$12 sps:$4 sm:$0xff]   ;;  %v2094_v30 = vld [vmem:[%s2821_s0 + $0x200] ss:$12 sps:$4 sm:$0xff]  }
  0x52   :  { %920 = vmatprep.mubr.bf16.mxu0 %v2009_v31  ;;  %1112 = vmatprep.mubr.bf16.mxu1 %v2011_v32  ;;  %v2095_v31 = vld [vmem:[%s2821_s0 + $0x1cc] ss:$12 sps:$4 sm:$0xff]  }
  0x53   :  { %v2097_v32 = vld [vmem:[%s2821_s0 + $0x218] ss:$12 sps:$4 sm:$0xff]  }
  0x59   :  { %921 = vmatmul.mubr.bf16.gmra.mrb[12].mxu0 %v2013_v33  ;;  %1113 = vmatmul.mubr.bf16.gmra.mrb[12].mxu1 %v2014_v34  ;;  %v2098_v33 = vld [vmem:[%s2821_s0 + $0x1c8] ss:$12 sps:$4 sm:$0xff]   ;;  %v2099_v34 = vld [vmem:[%s2821_s0 + $0x230] ss:$12 sps:$4 sm:$0xff]  }
  0x5a   :  { %928 = vmatprep.mubr.bf16.mxu0 %v2015_v35  ;;  %1120 = vmatprep.mubr.bf16.mxu1 %v2017_v36  ;;  %v2100_v35 = vld [vmem:[%s2821_s0 + $0x1e4] ss:$12 sps:$4 sm:$0xff]   ;;  %v2102_v36 = vld [vmem:[%s2821_s0 + $0x248] ss:$12 sps:$4 sm:$0xff]  }
  0x61   :  { %929 = vmatmul.mubr.bf16.gmra.mrb[16].mxu0 %v2019_v37  ;;  %1121 = vmatmul.mubr.bf16.gmra.mrb[16].mxu1 %v2020_v38  ;;  %v2103_v37 = vld [vmem:[%s2821_s0 + $0x1e0] ss:$12 sps:$4 sm:$0xff]  }
  0x62   :  { %936 = vmatprep.mubr.bf16.mxu0 %v2022_v39  ;;  %1128 = vmatprep.mubr.bf16.mxu1 %v2024_v40  ;;  %v2104_v38 = vld [vmem:[%s2821_s0 + $0x260] ss:$12 sps:$4 sm:$0xff]   ;;  %v2105_v39 = vld [vmem:[%s2821_s0 + $0x1fc] ss:$12 sps:$4 sm:$0xff]   ;;  %v2107_v40 = vld [vmem:[%s2821_s0 + $0x278] ss:$12 sps:$4 sm:$0xff]  }
  0x69   :  { %937 = vmatmul.mubr.bf16.gmra.mrb[20].mxu0 %v2026_v41  ;;  %1129 = vmatmul.mubr.bf16.gmra.mrb[20].mxu1 %v2027_v42  ;;  %v2108_v41 = vld [vmem:[%s2821_s0 + $0x1f8] ss:$12 sps:$4 sm:$0xff]   ;;  %v2109_v42 = vld [vmem:[%s2821_s0 + $0x290] ss:$12 sps:$4 sm:$0xff]  }
  0x6a   :  { %944 = vmatprep.mubr.bf16.mxu0 %v2028_v43  ;;  %1136 = vmatprep.mubr.bf16.mxu1 %v2030_v44  ;;  %v2110_v43 = vld [vmem:[%s2821_s0 + $0x214] ss:$12 sps:$4 sm:$0xff]  }
  0x6b   :  { %v2112_v44 = vld [vmem:[%s2821_s0 + $0x2a8] ss:$12 sps:$4 sm:$0xff]  }
  0x71   :  { %945 = vmatmul.mubr.bf16.gmra.mrb[24].mxu0 %v2032_v45  ;;  %1137 = vmatmul.mubr.bf16.gmra.mrb[24].mxu1 %v2033_v46  ;;  %v2113_v45 = vld [vmem:[%s2821_s0 + $0x210] ss:$12 sps:$4 sm:$0xff]   ;;  %v2114_v46 = vld [vmem:[%s2821_s0 + $0x2c0] ss:$12 sps:$4 sm:$0xff]  }
  0x72   :  { %952 = vmatprep.mubr.bf16.mxu0 %v2034_v47  ;;  %1144 = vmatprep.mubr.bf16.mxu1 %v2036_v48  ;;  %v2115_v47 = vld [vmem:[%s2821_s0 + $0x22c] ss:$12 sps:$4 sm:$0xff]  }
  0x73   :  { %v2117_v48 = vld [vmem:[%s2821_s0 + $0x2d8] ss:$12 sps:$4 sm:$0xff]  }
  0x79   :  { %953 = vmatmul.mubr.bf16.gmra.mrb[28].mxu0 %v2038_v49  ;;  %1145 = vmatmul.mubr.bf16.gmra.mrb[28].mxu1 %v2039_v50  ;;  %v2118_v49 = vld [vmem:[%s2821_s0 + $0x228] ss:$12 sps:$4 sm:$0xff]   ;;  %v2119_v50 = vld [vmem:[%s2821_s0 + $0x2f0] ss:$12 sps:$4 sm:$0xff]  }
  0x7a   :  { %960 = vmatprep.mubr.bf16.mxu0 %v2040_v51  ;;  %1877 = vmatprep.mubr.msk.bf16.mxu1 %vm767_vm0, %v2042_v52 }
  0x81   :  { %961 = vmatmul.mubr.bf16.gmra.mrb[32].mxu0 %v2043_v53  ;;  %1878 = vmatmul.mubr.msk.bf16.vlgmr.msra.gmra.mrb[32].mxu1 %vm767_vm0, %v2044_v54 }
  0x82   :  { %968 = vmatprep.mubr.bf16.mxu0 %v2045_v55  ;;  %1881 = vmatprep.mubr.msk.bf16.mxu1 %vm767_vm0, %v2047_v56 }
  0x89   :  { %969 = vmatmul.mubr.bf16.gmra.mrb[36].mxu0 %v2048_v57  ;;  %1882 = vmatmul.mubr.msk.bf16.gmra.mrb[36].mxu1 %vm767_vm0, %v2049_v58 }
  0x8a   :  { %976 = vmatprep.mubr.bf16.mxu0 %v2050_v59  ;;  %1885 = vmatprep.mubr.msk.bf16.mxu1 %vm767_vm0, %v2052_v60 }
  0x91   :  { %977 = vmatmul.mubr.bf16.gmra.mrb[40].mxu0 %v2053_v61  ;;  %1886 = vmatmul.mubr.msk.bf16.gmra.mrb[40].mxu1 %vm767_vm0, %v2054_v62 }
  0x92   :  { %984 = vmatprep.mubr.bf16.mxu0 %v2055_v63  ;;  %1889 = vmatprep.mubr.msk.bf16.mxu1 %vm767_vm0, %v2057_v0 }
  0x99   :  { %985 = vmatmul.mubr.bf16.gmra.mrb[44].mxu0 %v2058_v1  ;;  %1890 = vmatmul.mubr.msk.bf16.gmra.mrb[44].mxu1 %vm767_vm0, %v2059_v2 }
  0x9a   :  { %992 = vmatprep.mubr.bf16.mxu0 %v2060_v3  ;;  %1893 = vmatprep.mubr.msk.bf16.mxu1 %vm767_vm0, %v2062_v4 }
  0xa1   :  { %993 = vmatmul.mubr.bf16.gmra.mrb[48].mxu0 %v2063_v5  ;;  %1894 = vmatmul.mubr.msk.bf16.gmra.mrb[48].mxu1 %vm767_vm0, %v2064_v6 }
  0xa2   :  { %1000 = vmatprep.mubr.bf16.mxu0 %v2065_v7  ;;  %1897 = vmatprep.mubr.msk.bf16.mxu1 %vm767_vm0, %v2067_v8 }
  0xa9   :  { %1001 = vmatmul.mubr.bf16.gmra.mrb[52].mxu0 %v2068_v9  ;;  %1898 = vmatmul.mubr.msk.bf16.gmra.mrb[52].mxu1 %vm767_vm0, %v2069_v10 }
  0xaa   :  { %1008 = vmatprep.mubr.bf16.mxu0 %v2070_v11  ;;  %1901 = vmatprep.mubr.msk.bf16.mxu1 %vm767_vm0, %v2072_v12 }
  0xb1   :  { %1009 = vmatmul.mubr.bf16.gmra.mrb[56].mxu0 %v2073_v13  ;;  %1902 = vmatmul.mubr.msk.bf16.gmra.mrb[56].mxu1 %vm767_vm0, %v2074_v14 }
  0xb2   :  { %1016 = vmatprep.mubr.bf16.mxu0 %v2075_v15  ;;  %1905 = vmatprep.mubr.msk.bf16.mxu1 %vm767_vm0, %v2077_v16 }
  0xb9   :  { %1017 = vmatmul.mubr.bf16.gmra.mrb[60].mxu0 %v2078_v17  ;;  %1906 = vmatmul.mubr.msk.bf16.gmra.mrb[60].mxu1 %vm767_vm0, %v2079_v18 }
  0xba   :  { %1024 = vmatprep.mubr.bf16.mxu0 %v2080_v19  ;;  %1909 = vmatprep.mubr.msk.bf16.mxu1 %vm767_vm0, %v2082_v20 }
  0xc1   :  { %1025 = vmatmul.mubr.bf16.gmra.mrb[64].mxu0 %v2083_v21  ;;  %1910 = vmatmul.mubr.msk.bf16.gmra.mrb[64].mxu1 %vm767_vm0, %v2084_v22 }
  0xc2   :  { %1032 = vmatprep.mubr.bf16.mxu0 %v2085_v23  ;;  %1913 = vmatprep.mubr.msk.bf16.mxu1 %vm767_vm0, %v2087_v24 }
  0xc9   :  { %1033 = vmatmul.mubr.bf16.gmra.mrb[68].mxu0 %v2088_v25  ;;  %1914 = vmatmul.mubr.msk.bf16.gmra.mrb[68].mxu1 %vm767_vm0, %v2089_v26 }
  0xca   :  { %1040 = vmatprep.mubr.bf16.mxu0 %v2090_v27  ;;  %1917 = vmatprep.mubr.msk.bf16.mxu1 %vm767_vm0, %v2092_v28 }
  0xd1   :  { %1041 = vmatmul.mubr.bf16.gmra.mrb[72].mxu0 %v2093_v29  ;;  %1918 = vmatmul.mubr.msk.bf16.gmra.mrb[72].mxu1 %vm767_vm0, %v2094_v30 }
  0xd2   :  { %1048 = vmatprep.mubr.bf16.mxu0 %v2095_v31  ;;  %1921 = vmatprep.mubr.msk.bf16.mxu1 %vm767_vm0, %v2097_v32 }
  0xd9   :  { %1049 = vmatmul.mubr.bf16.gmra.mrb[76].mxu0 %v2098_v33  ;;  %1922 = vmatmul.mubr.msk.bf16.gmra.mrb[76].mxu1 %vm767_vm0, %v2099_v34 }
  0xda   :  { %1056 = vmatprep.mubr.bf16.mxu0 %v2100_v35  ;;  %1925 = vmatprep.mubr.msk.bf16.mxu1 %vm767_vm0, %v2102_v36 }
  0xe1   :  { %1057 = vmatmul.mubr.bf16.gmra.mrb[80].mxu0 %v2103_v37  ;;  %1926 = vmatmul.mubr.msk.bf16.gmra.mrb[80].mxu1 %vm767_vm0, %v2104_v38 }
  0xe2   :  { %1064 = vmatprep.mubr.bf16.mxu0 %v2105_v39  ;;  %1929 = vmatprep.mubr.msk.bf16.mxu1 %vm767_vm0, %v2107_v40 }
  0xe9   :  { %1065 = vmatmul.mubr.bf16.gmra.mrb[84].mxu0 %v2108_v41  ;;  %1930 = vmatmul.mubr.msk.bf16.gmra.mrb[84].mxu1 %vm767_vm0, %v2109_v42 }
  0xea   :  { %1072 = vmatprep.mubr.bf16.mxu0 %v2110_v43  ;;  %1933 = vmatprep.mubr.msk.bf16.mxu1 %vm767_vm0, %v2112_v44 }
  0xf1   :  { %1073 = vmatmul.mubr.bf16.gmra.mrb[88].mxu0 %v2113_v45  ;;  %1934 = vmatmul.mubr.msk.bf16.gmra.mrb[88].mxu1 %vm767_vm0, %v2114_v46 }
  0xf2   :  { %1080 = vmatprep.mubr.bf16.mxu0 %v2115_v47  ;;  %1937 = vmatprep.mubr.msk.bf16.mxu1 %vm767_vm0, %v2117_v48 }
  0xf9   :  { %1081 = vmatmul.mubr.bf16.gmra.mrb[92].mxu0 %v2118_v49  ;;  %1938 = vmatmul.mubr.msk.bf16.gmra.mrb[92].mxu1 %vm767_vm0, %v2119_v50 }
 0x114   :  { %v2547_v51 = vpop.f32.mrb[0].mxu0  ;;  %v2549_v52 = vpop.f32.mrb[0].mxu1 }
 0x115   :  { %v900_v53 = vpop.f32.mrb[1].mxu0  ;;  %v1092_v54 = vpop.f32.mrb[1].mxu1 }
 0x116   :  { %v2551_v55 = vpop.f32.mrb[2].mxu0  ;;  %v2553_v56 = vpop.f32.mrb[2].mxu1 }
 0x117   :  { %v903_v57 = vpop.f32.mrb[3].mxu0  ;;  %v1095_v58 = vpop.f32.mrb[3].mxu1 }
 0x11c   :  { %v906_v59 = vpop.f32.mrb[4].mxu0  ;;  %v2555_v60 = vpop.f32.mrb[4].mxu1 }
 0x11d   :  { %v908_v61 = vpop.f32.mrb[5].mxu0  ;;  %v1100_v62 = vpop.f32.mrb[5].mxu1 }
 0x11e   :  { %v909_v63 = vpop.f32.mrb[6].mxu0  ;;  %v2557_v0 = vpop.f32.mrb[6].mxu1 }
 0x11f   :  { %v911_v1 = vpop.f32.mrb[7].mxu0  ;;  %v1103_v2 = vpop.f32.mrb[7].mxu1 }
 0x124   :  { %v2559_v3 = vpop.f32.mrb[8].mxu0  ;;  %v2561_v4 = vpop.f32.mrb[8].mxu1 }
 0x125   :  { %v916_v5 = vpop.f32.mrb[9].mxu0  ;;  %v1108_v6 = vpop.f32.mrb[9].mxu1 }
 0x126   :  { %v2563_v7 = vpop.f32.mrb[10].mxu0  ;;  %v2565_v8 = vpop.f32.mrb[10].mxu1 }
 0x127   :  { %v919_v9 = vpop.f32.mrb[11].mxu0  ;;  %v1111_v10 = vpop.f32.mrb[11].mxu1 }
 0x12c   :  { %v922_v11 = vpop.f32.mrb[12].mxu0  ;;  %v2567_v12 = vpop.f32.mrb[12].mxu1 }
 0x12d   :  { %v924_v13 = vpop.f32.mrb[13].mxu0  ;;  %v1116_v14 = vpop.f32.mrb[13].mxu1 }
 0x12e   :  { %v925_v15 = vpop.f32.mrb[14].mxu0  ;;  %v2569_v16 = vpop.f32.mrb[14].mxu1 }
 0x12f   :  { %v927_v17 = vpop.f32.mrb[15].mxu0  ;;  %v1119_v18 = vpop.f32.mrb[15].mxu1 }
 0x134   :  { %v930_v19 = vpop.f32.mrb[16].mxu0  ;;  %v2571_v20 = vpop.f32.mrb[16].mxu1 }
 0x135   :  { %v932_v21 = vpop.f32.mrb[17].mxu0  ;;  %v1124_v22 = vpop.f32.mrb[17].mxu1 }
 0x136   :  { %v2573_v23 = vpop.f32.mrb[18].mxu0  ;;  %v2575_v24 = vpop.f32.mrb[18].mxu1 }
 0x137   :  { %v935_v25 = vpop.f32.mrb[19].mxu0  ;;  %v1127_v26 = vpop.f32.mrb[19].mxu1 }
 0x13c   :  { %v938_v27 = vpop.f32.mrb[20].mxu0  ;;  %v2577_v28 = vpop.f32.mrb[20].mxu1 }
 0x13d   :  { %v940_v29 = vpop.f32.mrb[21].mxu0  ;;  %v1132_v30 = vpop.f32.mrb[21].mxu1 }
 0x13e   :  { %v941_v31 = vpop.f32.mrb[22].mxu0  ;;  %v2579_v32 = vpop.f32.mrb[22].mxu1 }
 0x13f   :  { %v943_v33 = vpop.f32.mrb[23].mxu0  ;;  %v1135_v34 = vpop.f32.mrb[23].mxu1 }
 0x144   :  { %v946_v35 = vpop.f32.mrb[24].mxu0  ;;  %v2581_v36 = vpop.f32.mrb[24].mxu1 }
 0x145   :  { %v948_v37 = vpop.f32.mrb[25].mxu0  ;;  %v1140_v38 = vpop.f32.mrb[25].mxu1 }
 0x146   :  { %v949_v39 = vpop.f32.mrb[26].mxu0  ;;  %v2583_v40 = vpop.f32.mrb[26].mxu1 }
 0x147   :  { %2826 = vst [vmem:[#allocation2_spill] sm:$0xff] %v2583_v40  ;;  %v951_v41 = vpop.f32.mrb[27].mxu0  ;;  %v1143_v42 = vpop.f32.mrb[27].mxu1 }
 0x14c   :  { %v954_v43 = vpop.f32.mrb[28].mxu0  ;;  %v2585_v44 = vpop.f32.mrb[28].mxu1 }
 0x14d   :  { %v956_v45 = vpop.f32.mrb[29].mxu0  ;;  %v1148_v46 = vpop.f32.mrb[29].mxu1 }
 0x14e   :  { %v957_v47 = vpop.f32.mrb[30].mxu0  ;;  %v2587_v48 = vpop.f32.mrb[30].mxu1 }
 0x14f   :  { %2827 = vst [vmem:[#allocation3_spill] sm:$0xff] %v2587_v48  ;;  %v959_v49 = vpop.f32.mrb[31].mxu0  ;;  %v1151_v50 = vpop.f32.mrb[31].mxu1 }
 0x154   :  { %v962_v53 = vpop.f32.mrb[32].mxu0  ;;  %v1879_v54 = vpop.f32.mrb[32].mxu1 }
 0x155   :  { %v2589_v57 = vadd.f32 %v1879_v54, %v906_v59  ;;  %v964_v58 = vpop.f32.mrb[33].mxu0  ;;  %v1187_v61 = vpop.f32.mrb[33].mxu1 }
 0x156   :  { %v2592_v62 = vadd.f32 %v1187_v61, %v2547_v51  ;;  %v965_v1 = vpop.f32.mrb[34].mxu0  ;;  %v1880_v2 = vpop.f32.mrb[34].mxu1 }
 0x157   :  { %v2594_v5 = vadd.f32 %v1880_v2, %v909_v63  ;;  %v967_v6 = vpop.f32.mrb[35].mxu0  ;;  %v1190_v9 = vpop.f32.mrb[35].mxu1 }
 0x158   :  { %v2597_v10 = vadd.f32 %v1190_v9, %v2551_v55 }
 0x15c   :  { %v970_v13 = vpop.f32.mrb[36].mxu0  ;;  %v1883_v14 = vpop.f32.mrb[36].mxu1 }
 0x15d   :  { %v2599_v17 = vadd.f32 %v1883_v14, %v922_v11  ;;  %v972_v59 = vpop.f32.mrb[37].mxu0  ;;  %v1203_v18 = vpop.f32.mrb[37].mxu1 }
 0x15e   :  { %v2602_v21 = vadd.f32 %v1203_v18, %v2559_v3  ;;  %v973_v51 = vpop.f32.mrb[38].mxu0  ;;  %v1884_v22 = vpop.f32.mrb[38].mxu1 }
 0x15f   :  { %v2604_v25 = vadd.f32 %v1884_v22, %v925_v15  ;;  %v975_v63 = vpop.f32.mrb[39].mxu0  ;;  %v1206_v26 = vpop.f32.mrb[39].mxu1 }
 0x160   :  { %v2607_v29 = vadd.f32 %v1206_v26, %v2563_v7 }
 0x164   :  { %v978_v55 = vpop.f32.mrb[40].mxu0  ;;  %v1887_v30 = vpop.f32.mrb[40].mxu1 }
 0x165   :  { %v2609_v33 = vadd.f32 %v1887_v30, %v938_v27  ;;  %v980_v11 = vpop.f32.mrb[41].mxu0  ;;  %v1219_v34 = vpop.f32.mrb[41].mxu1 }
 0x166   :  { %v2611_v37 = vadd.f32 %v1219_v34, %v930_v19  ;;  %v981_v38 = vpop.f32.mrb[42].mxu0  ;;  %v1888_v3 = vpop.f32.mrb[42].mxu1 }
 0x167   :  { %v2613_v41 = vadd.f32 %v1888_v3, %v941_v31  ;;  %v983_v42 = vpop.f32.mrb[43].mxu0  ;;  %v1222_v15 = vpop.f32.mrb[43].mxu1 }
 0x168   :  { %v2616_v45 = vadd.f32 %v1222_v15, %v2573_v23 }
 0x16c   :  { %v986_v46 = vpop.f32.mrb[44].mxu0  ;;  %v1891_v7 = vpop.f32.mrb[44].mxu1 }
 0x16d   :  { %v2618_v49 = vadd.f32 %v1891_v7, %v954_v43  ;;  %v988_v50 = vpop.f32.mrb[45].mxu0  ;;  %v1235_v27 = vpop.f32.mrb[45].mxu1 }
 0x16e   :  { %v2620_v54 = vadd.f32 %v1235_v27, %v946_v35  ;;  %v989_v58 = vpop.f32.mrb[46].mxu0  ;;  %v1892_v19 = vpop.f32.mrb[46].mxu1 }
 0x16f   :  { %v2622_v61 = vadd.f32 %v1892_v19, %v957_v47  ;;  %v991_v2 = vpop.f32.mrb[47].mxu0  ;;  %v1238_v31 = vpop.f32.mrb[47].mxu1 }
 0x170   :  { %v2624_v6 = vadd.f32 %v1238_v31, %v949_v39 }
 0x171   :  { %2828 = vst [vmem:[#allocation4_spill] sm:$0xff] %v2622_v61 }
 0x174   :  { %v994_v9 = vpop.f32.mrb[48].mxu0  ;;  %v1895_v14 = vpop.f32.mrb[48].mxu1 }
 0x175   :  { %v2626_v23 = vadd.f32 %v1895_v14, %v970_v13  ;;  %v996_v59 = vpop.f32.mrb[49].mxu0  ;;  %v1251_v18 = vpop.f32.mrb[49].mxu1 }
 0x176   :  { %v2628_v43 = vadd.f32 %v1251_v18, %v962_v53  ;;  %v997_v22 = vpop.f32.mrb[50].mxu0  ;;  %v1896_v63 = vpop.f32.mrb[50].mxu1 }
 0x177   :  { %v2632_v26 = vadd.f32 %v1896_v63, %v973_v51  ;;  %v999_v47 = vpop.f32.mrb[51].mxu0  ;;  %v1254_v30 = vpop.f32.mrb[51].mxu1 }
 0x178   :  { %v1442_v39 = vmax.f32 %v2592_v62, %v2628_v43  ;;  %v2636_v11 = vadd.f32 %v1254_v30, %v965_v1 }
 0x17a   :  { %v1445_v53 = vmax.f32 %v2597_v10, %v2636_v11 }
 0x17c   :  { %v1002_v34 = vpop.f32.mrb[52].mxu0  ;;  %v1899_v3 = vpop.f32.mrb[52].mxu1 }
 0x17d   :  { %v2642_v42 = vadd.f32 %v1899_v3, %v986_v46  ;;  %v1004_v15 = vpop.f32.mrb[53].mxu0  ;;  %v1267_v51 = vpop.f32.mrb[53].mxu1 }
 0x17e   :  { %v2644_v7 = vadd.f32 %v1267_v51, %v978_v55  ;;  %v1005_v50 = vpop.f32.mrb[54].mxu0  ;;  %v1900_v27 = vpop.f32.mrb[54].mxu1 }
 0x17f   :  { %v2648_v1 = vadd.f32 %v1900_v27, %v989_v58  ;;  %v1007_v19 = vpop.f32.mrb[55].mxu0  ;;  %v1270_v2 = vpop.f32.mrb[55].mxu1 }
 0x180   :  { %v2652_v31 = vadd.f32 %v1270_v2, %v981_v38 }
 0x184   :  { %v1010_v14 = vpop.f32.mrb[56].mxu0  ;;  %v1903_v59 = vpop.f32.mrb[56].mxu1 }
 0x185   :  { %v2658_v18 = vadd.f32 %v1903_v59, %v1002_v34  ;;  %v1012_v43 = vpop.f32.mrb[57].mxu0  ;;  %v1283_v58 = vpop.f32.mrb[57].mxu1 }
 0x186   :  { %v2660_v63 = vadd.f32 %v1283_v58, %v994_v9  ;;  %v1013_v47 = vpop.f32.mrb[58].mxu0  ;;  %v1904_v30 = vpop.f32.mrb[58].mxu1 }
 0x187   :  { %v2664_v11 = vadd.f32 %v1904_v30, %v1005_v50  ;;  %v1015_v3 = vpop.f32.mrb[59].mxu0  ;;  %v1286_v15 = vpop.f32.mrb[59].mxu1 }
 0x188   :  { %v2668_v27 = vadd.f32 %v1286_v15, %v997_v22 }
 0x18c   :  { %v1018_v19 = vpop.f32.mrb[60].mxu0  ;;  %v1907_v2 = vpop.f32.mrb[60].mxu1 }
 0x18d   :  { %v2674_v59 = vadd.f32 %v1907_v2, %v1018_v19  ;;  %v1020_v43 = vpop.f32.mrb[61].mxu0  ;;  %v1299_v50 = vpop.f32.mrb[61].mxu1 }
 0x18e   :  { %v2676_v58 = vadd.f32 %v1299_v50, %v1010_v14  ;;  %v1021_v30 = vpop.f32.mrb[62].mxu0  ;;  %v1908_v3 = vpop.f32.mrb[62].mxu1 }
 0x18f   :  { %v2680_v15 = vadd.f32 %v1908_v3, %v1021_v30  ;;  %v1023_v38 = vpop.f32.mrb[63].mxu0  ;;  %v1302_v34 = vpop.f32.mrb[63].mxu1 }
 0x190   :  { %v2684_v51 = vadd.f32 %v1302_v34, %v1013_v47 }
 0x191   :  { %2829 = vst [vmem:[#allocation5_spill] sm:$0xff] %v2680_v15 }
 0x194   :  { %v1026_v2 = vpop.f32.mrb[64].mxu0  ;;  %v1911_v43 = vpop.f32.mrb[64].mxu1 }
 0x195   :  { %v1028_v50 = vpop.f32.mrb[65].mxu0  ;;  %v1315_v46 = vpop.f32.mrb[65].mxu1 }
 0x196   :  { %v1316_v22 = vadd.f32 %v1315_v46, %v1026_v2  ;;  %v1029_v30 = vpop.f32.mrb[66].mxu0  ;;  %v1912_v3 = vpop.f32.mrb[66].mxu1  ;;  %v2830_v50 = vmax.f32 %v2589_v57, %v2626_v23 }
 0x197   :  { %v1031_v38 = vpop.f32.mrb[67].mxu0  ;;  %v1318_v62 = vpop.f32.mrb[67].mxu1 }
 0x198   :  { %v1443_v55 = vmax.f32 %v1442_v39, %v1316_v22  ;;  %v1319_v10 = vadd.f32 %v1318_v62, %v1029_v30  ;;  %v2831_v39 = vmax.f32 %v2594_v5, %v2632_v26 }
 0x19a   :  { %v2690_v9 = vmax.f32 %v1445_v53, %v1319_v10 }
 0x19c   :  { %v1034_v47 = vpop.f32.mrb[68].mxu0  ;;  %v1915_v34 = vpop.f32.mrb[68].mxu1 }
 0x19d   :  { %v1324_v13 = vadd.f32 %v1911_v43, %v1034_v47  ;;  %v1036_v19 = vpop.f32.mrb[69].mxu0  ;;  %v1331_v35 = vpop.f32.mrb[69].mxu1  ;;  %v2832_v47 = vmax.f32 %v2602_v21, %v2644_v7 }
 0x19e   :  { %v1037_v15 = vpop.f32.mrb[70].mxu0  ;;  %v1916_v14 = vpop.f32.mrb[70].mxu1 }
 0x19f   :  { %v1449_v61 = vmax.f32 %v2830_v50, %v1324_v13  ;;  %v1327_v46 = vadd.f32 %v1912_v3, %v1037_v15  ;;  %v1039_v2 = vpop.f32.mrb[71].mxu0  ;;  %v1334_v40 = vpop.f32.mrb[71].mxu1  ;;  %v2833_v15 = vmax.f32 %v2607_v29, %v2652_v31  ;;  %v2835_v29 = vmax.f32 %v2604_v25, %v2648_v1 }
 0x1a0   :  { %v2836_v25 = vmax.f32 %v2611_v37, %v2660_v63 }
 0x1a1   :  { %v1452_v62 = vmax.f32 %v2831_v39, %v1327_v46 }
 0x1a4   :  { %v1042_v53 = vpop.f32.mrb[72].mxu0  ;;  %v1919_v10 = vpop.f32.mrb[72].mxu1 }
 0x1a5   :  { %v1332_v22 = vadd.f32 %v1331_v35, %v1042_v53  ;;  %v1044_v30 = vpop.f32.mrb[73].mxu0  ;;  %v1347_v43 = vpop.f32.mrb[73].mxu1 }
 0x1a6   :  { %v1045_v19 = vpop.f32.mrb[74].mxu0  ;;  %v1920_v38 = vpop.f32.mrb[74].mxu1 }
 0x1a7   :  { %v2701_v48 = vmax.f32 %v2832_v47, %v1332_v22  ;;  %v1335_v57 = vadd.f32 %v1334_v40, %v1045_v19  ;;  %v1047_v23 = vpop.f32.mrb[75].mxu0  ;;  %v1350_v13 = vpop.f32.mrb[75].mxu1  ;;  %v2834_v40 = vmax.f32 %v2599_v17, %v2642_v42  ;;  %v2726_v17 = vld [vmem:[%s2822_s2] ss:$0 sm:$0xff] }
 0x1a9   :  { %v2706_v5 = vmax.f32 %v2833_v15, %v1335_v57 }
 0x1ac   :  { %v1050_v26 = vpop.f32.mrb[76].mxu0  ;;  %v2708_v3 = vpop.f32.mrb[76].mxu1 }
 0x1ad   :  { %v1340_v35 = vadd.f32 %v1915_v34, %v1050_v26  ;;  %v1052_v50 = vpop.f32.mrb[77].mxu0  ;;  %v2710_v46 = vpop.f32.mrb[77].mxu1 }
 0x1ae   :  { %v1053_v2 = vpop.f32.mrb[78].mxu0  ;;  %v2712_v39 = vpop.f32.mrb[78].mxu1 }
 0x1af   :  { %v1461_v21 = vmax.f32 %v2834_v40, %v1340_v35  ;;  %v1343_v7 = vadd.f32 %v1916_v14, %v1053_v2  ;;  %v1055_v53 = vpop.f32.mrb[79].mxu0  ;;  %v2717_v22 = vpop.f32.mrb[79].mxu1 }
 0x1b1   :  { %v1464_v31 = vmax.f32 %v2835_v29, %v1343_v7 }
 0x1b4   :  { %v1058_v30 = vpop.f32.mrb[80].mxu0  ;;  %v1927_v34 = vpop.f32.mrb[80].mxu1 }
 0x1b5   :  { %v1348_v19 = vadd.f32 %v1347_v43, %v1058_v30  ;;  %v1388_v47 = vadd.f32 %v1927_v34, %v2555_v60  ;;  %v1060_v57 = vpop.f32.mrb[81].mxu0  ;;  %v1379_v23 = vpop.f32.mrb[81].mxu1 }
 0x1b6   :  { %v1380_v42 = vadd.f32 %v1379_v23, %v2549_v52  ;;  %v1061_v14 = vpop.f32.mrb[82].mxu0  ;;  %v1928_v15 = vpop.f32.mrb[82].mxu1  ;;  %v2837_v52 = vmax.f32 %v2616_v45, %v2668_v27 }
 0x1b7   :  { %v2732_v1 = vmax.f32 %v2836_v25, %v1348_v19  ;;  %v1450_v26 = vmax.f32 %v1449_v61, %v1388_v47  ;;  %v1351_v43 = vadd.f32 %v1350_v13, %v1061_v14  ;;  %v1391_v60 = vadd.f32 %v1928_v15, %v2557_v0  ;;  %v1063_v35 = vpop.f32.mrb[83].mxu0  ;;  %v1382_v50 = vpop.f32.mrb[83].mxu1 }
 0x1b8   :  { %v1444_v2 = vmax.f32 %v1443_v55, %v1380_v42  ;;  %v1383_v40 = vadd.f32 %v1382_v50, %v2553_v56  ;;  %v2838_v14 = vmax.f32 %v2609_v33, %v2658_v18  ;;  %v2839_v33 = vmax.f32 %v2613_v41, %v2664_v11 }
 0x1b9   :  { %v1499_v7 = vadd.f32 %v2726_v17, %v1450_v26  ;;  %v2740_v53 = vmax.f32 %v2837_v52, %v1351_v43  ;;  %v1453_v29 = vmax.f32 %v1452_v62, %v1391_v60 }
 0x1ba   :  { %v1497_v37 = vadd.f32 %v2726_v17, %v1444_v2  ;;  %v1447_v61 = vmax.f32 %v2690_v9, %v1383_v40 }
 0x1bb   :  { %v1500_v63 = vadd.f32 %v2726_v17, %v1453_v29  ;;  %v1515_v30 = vmax.f32 %v1499_v7, 0.0 }
 0x1bc   :  { %v1498_v0 = vadd.f32 %v2726_v17, %v1447_v61  ;;  %v1066_v13 = vpop.f32.mrb[84].mxu0  ;;  %v1931_v55 = vpop.f32.mrb[84].mxu1  ;;  %v1513_v27 = vmax.f32 %v1497_v37, 0.0 }
 0x1bd   :  { %v1516_v56 = vmax.f32 %v1500_v63, 0.0  ;;  %v1356_v34 = vadd.f32 %v1919_v10, %v1066_v13  ;;  %v1404_v19 = vadd.f32 %v1931_v55, %v2567_v12  ;;  %v1068_v47 = vpop.f32.mrb[85].mxu0  ;;  %v1395_v45 = vpop.f32.mrb[85].mxu1  ;;  %v2840_v13 = vmax.f32 %v2620_v54, %v2676_v58 }
 0x1be   :  { %v1514_v57 = vmax.f32 %v1498_v0, 0.0  ;;  %v1396_v62 = vadd.f32 %v1395_v45, %v2561_v4  ;;  %v1069_v23 = vpop.f32.mrb[86].mxu0  ;;  %v1932_v42 = vpop.f32.mrb[86].mxu1 }
 0x1bf   :  { %v1800_v9 = vpack.c.bf16 %v1516_v56, %v1515_v30  ;;  %v1473_v15 = vmax.f32 %v2838_v14, %v1356_v34  ;;  %v1462_v25 = vmax.f32 %v1461_v21, %v1404_v19  ;;  %v1359_v26 = vadd.f32 %v1920_v38, %v1069_v23  ;;  %v1071_v43 = vpop.f32.mrb[87].mxu0  ;;  %v1398_v60 = vpop.f32.mrb[87].mxu1 }
 0x1c0   :  { %v1795_v10 = vpack.c.bf16 %v1514_v57, %v1513_v27  ;;  %v1456_v12 = vmax.f32 %v2701_v48, %v1396_v62  ;;  %v1407_v35 = vadd.f32 %v1932_v42, %v2569_v16  ;;  %v1399_v50 = vadd.f32 %v1398_v60, %v2565_v8 }
 0x1c1   :  { %1832 = vst [vmem:[%s2823_s3 + $0x8] sm:$0xff] %v1800_v9   ;;  %v1503_v4 = vadd.f32 %v2726_v17, %v1462_v25  ;;  %v1476_v18 = vmax.f32 %v2839_v33, %v1359_v26  ;;  %v2841_v57 = vmax.f32 %v2624_v6, %v2684_v51 }
 0x1c2   :  { %1796 = vst [vmem:[%s2823_s3] sm:$0xff] %v1795_v10   ;;  %v1501_v48 = vadd.f32 %v2726_v17, %v1456_v12  ;;  %v1465_v38 = vmax.f32 %v1464_v31, %v1407_v35  ;;  %v1459_v16 = vmax.f32 %v2706_v5, %v1399_v50  ;;  %v2842_v12 = vmax.f32 %v2618_v49, %v2674_v59 }
 0x1c3   :  { %v1519_v7 = vmax.f32 %v1503_v4, 0.0  ;;  %v2843_v4 = vld [vmem:[#allocation3_spill] sm:$0xff] }
 0x1c4   :  { %v1504_v8 = vadd.f32 %v2726_v17, %v1465_v38  ;;  %v1502_v21 = vadd.f32 %v2726_v17, %v1459_v16  ;;  %v1074_v2 = vpop.f32.mrb[88].mxu0  ;;  %v1935_v40 = vpop.f32.mrb[88].mxu1  ;;  %v1517_v37 = vmax.f32 %v1501_v48, 0.0  ;;  %v2844_v38 = vld [vmem:[#allocation2_spill] sm:$0xff] }
 0x1c5   :  { %v1364_v52 = vadd.f32 %v2710_v46, %v1074_v2  ;;  %v1420_v41 = vadd.f32 %v1935_v40, %v2577_v28  ;;  %v1076_v11 = vpop.f32.mrb[89].mxu0  ;;  %v1411_v29 = vpop.f32.mrb[89].mxu1 }
 0x1c6   :  { %v1520_v61 = vmax.f32 %v1504_v8, 0.0  ;;  %v1518_v63 = vmax.f32 %v1502_v21, 0.0  ;;  %v1412_v31 = vadd.f32 %v1411_v29, %v2571_v20  ;;  %v1077_v0 = vpop.f32.mrb[90].mxu0  ;;  %v1936_v5 = vpop.f32.mrb[90].mxu1  ;;  %v2845_v8 = vld [vmem:[#allocation4_spill] sm:$0xff]  ;;  %v2846_v21 = vld [vmem:[#allocation5_spill] sm:$0xff] }
 0x1c7   :  { %v1479_v55 = vmax.f32 %v2840_v13, %v1364_v52  ;;  %v1474_v30 = vmax.f32 %v1473_v15, %v1420_v41  ;;  %v1367_v56 = vadd.f32 %v2717_v22, %v1077_v0  ;;  %v1423_v46 = vadd.f32 %v1936_v5, %v2579_v32  ;;  %v1079_v34 = vpop.f32.mrb[91].mxu0  ;;  %v1414_v28 = vpop.f32.mrb[91].mxu1 }
 0x1c8   :  { %v1810_v19 = vpack.c.bf16 %v1520_v61, %v1519_v7  ;;  %v1805_v47 = vpack.c.bf16 %v1518_v63, %v1517_v37  ;;  %v1468_v45 = vmax.f32 %v2732_v1, %v1412_v31  ;;  %v1415_v27 = vadd.f32 %v1414_v28, %v2575_v24 }
 0x1c9   :  { %v1507_v20 = vadd.f32 %v2726_v17, %v1474_v30  ;;  %v1482_v54 = vmax.f32 %v2841_v57, %v1367_v56  ;;  %v1477_v58 = vmax.f32 %v1476_v18, %v1423_v46  ;;  %v2847_v2 = vmax.f32 %v2845_v8, %v2846_v21 }
 0x1ca   :  { %1834 = vst [vmem:[%s2823_s3 + $0x18] sm:$0xff] %v1810_v19   ;;  %1833 = vst [vmem:[%s2823_s3 + $0x10] sm:$0xff] %v1805_v47   ;;  %v1505_v32 = vadd.f32 %v2726_v17, %v1468_v45  ;;  %v1471_v22 = vmax.f32 %v2740_v53, %v1415_v27 }
 0x1cb   :  { %v1508_v24 = vadd.f32 %v2726_v17, %v1477_v58  ;;  %v1523_v51 = vmax.f32 %v1507_v20, 0.0 }
 0x1cc   :  { %v1506_v1 = vadd.f32 %v2726_v17, %v1471_v22  ;;  %v1082_v62 = vpop.f32.mrb[92].mxu0  ;;  %v1939_v6 = vpop.f32.mrb[92].mxu1  ;;  %v1521_v25 = vmax.f32 %v1505_v32, 0.0 }
 0x1cd   :  { %v1524_v23 = vmax.f32 %v1508_v24, 0.0  ;;  %v1372_v42 = vadd.f32 %v2708_v3, %v1082_v62  ;;  %v1436_v9 = vadd.f32 %v1939_v6, %v2585_v44  ;;  %v1084_v14 = vpop.f32.mrb[93].mxu0  ;;  %v1427_v15 = vpop.f32.mrb[93].mxu1 }
 0x1ce   :  { %v1522_v26 = vmax.f32 %v1506_v1, 0.0  ;;  %v1428_v43 = vadd.f32 %v1427_v15, %v2581_v36  ;;  %v1085_v60 = vpop.f32.mrb[94].mxu0  ;;  %v1940_v53 = vpop.f32.mrb[94].mxu1 }
 0x1cf   :  { %v1820_v10 = vpack.c.bf16 %v1524_v23, %v1523_v51  ;;  %v1485_v35 = vmax.f32 %v2842_v12, %v1372_v42  ;;  %v1375_v50 = vadd.f32 %v2712_v39, %v1085_v60  ;;  %v1439_v33 = vadd.f32 %v1940_v53, %v2843_v4  ;;  %v1087_v3 = vpop.f32.mrb[95].mxu0  ;;  %v1430_v18 = vpop.f32.mrb[95].mxu1 }
 0x1d0   :  { %v1815_v44 = vpack.c.bf16 %v1522_v26, %v1521_v25  ;;  %v1480_v48 = vmax.f32 %v1479_v55, %v1428_v43  ;;  %v1431_v16 = vadd.f32 %v1430_v18, %v2844_v38 }
 0x1d1   :  { %1836 = vst [vmem:[%s2823_s3 + $0x28] sm:$0xff] %v1820_v10   ;;  %v1486_v36 = vmax.f32 %v1485_v35, %v1436_v9  ;;  %v1488_v49 = vmax.f32 %v2847_v2, %v1375_v50 }
 0x1d2   :  { %1835 = vst [vmem:[%s2823_s3 + $0x20] sm:$0xff] %v1815_v44   ;;  %v1509_v59 = vadd.f32 %v2726_v17, %v1480_v48  ;;  %v1483_v39 = vmax.f32 %v1482_v54, %v1431_v16 }
 0x1d3   :  { %v1511_v40 = vadd.f32 %v2726_v17, %v1486_v36  ;;  %v1489_v7 = vmax.f32 %v1488_v49, %v1439_v33 }
 0x1d4   :  { %v1510_v52 = vadd.f32 %v2726_v17, %v1483_v39  ;;  %v1525_v11 = vmax.f32 %v1509_v59, 0.0 }
 0x1d5   :  { %v1512_v41 = vadd.f32 %v2726_v17, %v1489_v7  ;;  %v1527_v37 = vmax.f32 %v1511_v40, 0.0 }
 0x1d6   :  { %v1526_v29 = vmax.f32 %v1510_v52, 0.0 }
 0x1d7   :  { %v1528_v61 = vmax.f32 %v1512_v41, 0.0 }
 0x1d8   :  { %v1825_v63 = vpack.c.bf16 %v1526_v29, %v1525_v11 }
 0x1d9   :  { %v1830_v31 = vpack.c.bf16 %v1528_v61, %v1527_v37 }
 0x1da   :  { %1837 = vst [vmem:[%s2823_s3 + $0x30] sm:$0xff] %v1825_v63  }
 0x1db   :  { %1838 = vst [vmem:[%s2823_s3 + $0x38] sm:$0xff] %v1830_v31  }

// kernel: net_forward.5
= control target key start
LH: loop header
LB: loop body
LE: loop exit
PB: predicated region body
PF: predicated region fallthrough
CT: control target
= control target key end

     0   :  { %v7372_v0 = vmov 0   ;;  %vm1437_vm0 = vcmask 523264   ;;  %vm5536_vm1 = vmmov 0   ;;  %s7362_s1 = inlined_call_operand.vmem [shape: bf16[576,128], index: 1, kind: input, shape index: {}]   ;;  %s7363_s0 = inlined_call_operand.vmem [shape: bf16[36,16,576], index: 0, kind: input, shape index: {}]   ;;  %s7364_s3 = inlined_call_operand.vmem [shape: bf16[9,128,256], index: 3, kind: input, shape index: {}]   ;;  %s7365_s2 = inlined_call_operand.vmem [shape: f32[1,128], index: 2, kind: input, shape index: {}]   ;;  %s7366_s5 = inlined_call_operand.vmem [shape: bf16[256,128], index: 5, kind: input, shape index: {}]   ;;  %s7367_s7 = inlined_call_operand.vmem [shape: bf16[128,128], index: 7, kind: input, shape index: {}]   ;;  %s7368_s4 = inlined_call_operand.vmem [shape: f32[1,256], index: 4, kind: input, shape index: {}]   ;;  %s7369_s6 = inlined_call_operand.vmem [shape: f32[1,128], index: 6, kind: input, shape index: {}]   ;;  %s7370_s8 = inlined_call_operand.vmem [shape: f32[1,128], index: 8, kind: input, shape index: {}]   ;;  %s7371_s9 = inlined_call_operand.vmem [shape: f32[16,128], index: 9, kind: output, shape index: {}]  }
   0x1   :  { %1546 = vmatprep.subr.bf16.mxu0 %v7372_v0  ;;  %v5006_v1 = vld [vmem:[%s7362_s1] sm:$0xff]   ;;  %4807 = vmatprep.subr.bf16.mxu1 %v7372_v0  ;;  %v5007_v2 = vld [vmem:[%s7362_s1 + $0x8] sm:$0xff]   ;;  %v5008_v3 = vld [vmem:[%s7362_s1 + $0x10] sm:$0xff]  }
   0x2   :  { %1547 = vmatpush1.bf16.msra.mxu0 %v5006_v1  ;;  %4823 = vmatpush1.bf16.msra.mxu1 %v5006_v1  ;;  %v5009_v4 = vld [vmem:[%s7362_s1 + $0x18] sm:$0xff]   ;;  %v5010_v5 = vld [vmem:[%s7362_s1 + $0x20] sm:$0xff]   ;;  %v5011_v7 = vld [vmem:[%s7362_s1 + $0x28] sm:$0xff]  }
   0x3   :  { %1548 = vmatprep.subr.bf16.mxu0 %v7372_v0  ;;  %4808 = vmatprep.subr.bf16.mxu1 %v7372_v0  ;;  %v5024_v6 = vld [vmem:[%s7363_s0 + $0x4] ss:$20 sps:$4 sm:$0xff]   ;;  %v5012_v8 = vld [vmem:[%s7362_s1 + $0x30] sm:$0xff]   ;;  %v5015_v11 = vld [vmem:[%s7362_s1 + $0x48] sm:$0xff]  }
   0x4   :  { %1578 = vmatprep.mubr.bf16.mxu0 %v5024_v6  ;;  %v5013_v9 = vld [vmem:[%s7362_s1 + $0x38] sm:$0xff]   ;;  %v5014_v10 = vld [vmem:[%s7362_s1 + $0x40] sm:$0xff]   ;;  %v5016_v12 = vld [vmem:[%s7362_s1 + $0x50] sm:$0xff]  }
   0x5   :  { %v5017_v13 = vld [vmem:[%s7362_s1 + $0x58] sm:$0xff]   ;;  %v5018_v14 = vld [vmem:[%s7362_s1 + $0x60] sm:$0xff]   ;;  %v5019_v15 = vld [vmem:[%s7362_s1 + $0x68] sm:$0xff]  }
   0x6   :  { %1549 = vmatpush1.bf16.msra.mxu0 %v5007_v2  ;;  %4824 = vmatpush1.bf16.msra.mxu1 %v5007_v2  ;;  %v5020_v16 = vld [vmem:[%s7362_s1 + $0x70] sm:$0xff]   ;;  %v5021_v17 = vld [vmem:[%s7362_s1 + $0x78] sm:$0xff]   ;;  %v5025_v19 = vld [vmem:[%s7362_s1 + $0x80] sm:$0xff]  }
   0x7   :  { %1550 = vmatprep.subr.bf16.mxu0 %v7372_v0  ;;  %4809 = vmatprep.subr.bf16.mxu1 %v7372_v0  ;;  %v5022_v18 = vld [vmem:[%s7363_s0] ss:$20 sps:$4 sm:$0xff]   ;;  %v5032_v21 = vld [vmem:[%s7362_s1 + $0x88] sm:$0xff]   ;;  %v5043_v25 = vld [vmem:[%s7362_s1 + $0x98] sm:$0xff]  }
   0x8   :  { %v5026_v20 = vld [vmem:[%s7363_s0 + $0x2c] ss:$20 sps:$4 sm:$0xff]   ;;  %v5028_v22 = vld [vmem:[%s7363_s0 + $0x28] ss:$20 sps:$4 sm:$0xff]   ;;  %v5038_v24 = vld [vmem:[%s7362_s1 + $0x90] sm:$0xff]  }
   0x9   :  { %v5029_v23 = vld [vmem:[%s7363_s0 + $0x54] ss:$20 sps:$4 sm:$0xff]   ;;  %v5031_v26 = vld [vmem:[%s7363_s0 + $0x50] ss:$20 sps:$4 sm:$0xff]   ;;  %v5035_v30 = vld [vmem:[%s7363_s0 + $0x78] ss:$20 sps:$4 sm:$0xff]  }
   0xa   :  { %1551 = vmatpush1.bf16.msra.mxu0 %v5008_v3  ;;  %4825 = vmatpush1.bf16.msra.mxu1 %v5008_v3  ;;  %v5033_v27 = vld [vmem:[%s7363_s0 + $0x7c] ss:$20 sps:$4 sm:$0xff]   ;;  %v5050_v28 = vld [vmem:[%s7362_s1 + $0xa0] sm:$0xff]   ;;  %v5057_v29 = vld [vmem:[%s7362_s1 + $0xa8] sm:$0xff]  }
   0xb   :  { %1552 = vmatprep.subr.bf16.mxu0 %v7372_v0  ;;  %4810 = vmatprep.subr.bf16.mxu1 %v7372_v0  ;;  %v5036_v31 = vld [vmem:[%s7363_s0 + $0xa4] ss:$20 sps:$4 sm:$0xff]   ;;  %v5064_v32 = vld [vmem:[%s7362_s1 + $0xb0] sm:$0xff]   ;;  %v5040_v35 = vld [vmem:[%s7363_s0 + $0xcc] ss:$20 sps:$4 sm:$0xff]  }
   0xc   :  { %v5071_v33 = vld [vmem:[%s7362_s1 + $0xb8] sm:$0xff]   ;;  %v5039_v34 = vld [vmem:[%s7363_s0 + $0xa0] ss:$20 sps:$4 sm:$0xff]   ;;  %v5085_v37 = vld [vmem:[%s7362_s1 + $0xc8] sm:$0xff]  }
   0xd   :  { %v5078_v36 = vld [vmem:[%s7362_s1 + $0xc0] sm:$0xff]   ;;  %v5042_v38 = vld [vmem:[%s7363_s0 + $0xc8] ss:$20 sps:$4 sm:$0xff]   ;;  %v5091_v40 = vld [vmem:[%s7362_s1 + $0xd0] sm:$0xff]  }
   0xe   :  { %1553 = vmatpush1.bf16.msra.mxu0 %v5009_v4  ;;  %4826 = vmatpush1.bf16.msra.mxu1 %v5009_v4  ;;  %v5044_v39 = vld [vmem:[%s7363_s0 + $0xf4] ss:$20 sps:$4 sm:$0xff]   ;;  %v5096_v41 = vld [vmem:[%s7362_s1 + $0xd8] sm:$0xff]   ;;  %v5046_v42 = vld [vmem:[%s7363_s0 + $0xf0] ss:$20 sps:$4 sm:$0xff]  }
   0xf   :  { %1554 = vmatprep.subr.bf16.mxu0 %v7372_v0  ;;  %4811 = vmatprep.subr.bf16.mxu1 %v7372_v0  ;;  %v5047_v43 = vld [vmem:[%s7363_s0 + $0x11c] ss:$20 sps:$4 sm:$0xff]   ;;  %v5103_v44 = vld [vmem:[%s7362_s1 + $0xe0] sm:$0xff]   ;;  %v5049_v45 = vld [vmem:[%s7363_s0 + $0x118] ss:$20 sps:$4 sm:$0xff]  }
  0x10   :  { %v5051_v46 = vld [vmem:[%s7363_s0 + $0x144] ss:$20 sps:$4 sm:$0xff]   ;;  %v5109_v48 = vld [vmem:[%s7363_s0 + $0x4b4] ss:$20 sps:$4 sm:$0xff]   ;;  %v5054_v50 = vld [vmem:[%s7363_s0 + $0x16c] ss:$20 sps:$4 sm:$0xff]  }
  0x11   :  { %v5107_v47 = vld [vmem:[%s7363_s0 + $0x4b0] ss:$20 sps:$4 sm:$0xff]   ;;  %1818 = vmatprep.mubr.bf16.mxu1 %v5109_v48  ;;  %v5053_v49 = vld [vmem:[%s7363_s0 + $0x140] ss:$20 sps:$4 sm:$0xff]   ;;  %v5113_v51 = vld [vmem:[%s7362_s1 + $0xe8] sm:$0xff]  }
  0x12   :  { %1555 = vmatpush1.bf16.msra.mxu0 %v5010_v5  ;;  %4827 = vmatpush1.bf16.msra.mxu1 %v5010_v5  ;;  %v5114_v52 = vld [vmem:[%s7363_s0 + $0x4dc] ss:$20 sps:$4 sm:$0xff]   ;;  %v5118_v53 = vld [vmem:[%s7363_s0 + $0x4d8] ss:$20 sps:$4 sm:$0xff]   ;;  %v5058_v55 = vld [vmem:[%s7363_s0 + $0x194] ss:$20 sps:$4 sm:$0xff]  }
  0x13   :  { %1556 = vmatprep.subr.bf16.mxu0 %v7372_v0  ;;  %4812 = vmatprep.subr.bf16.mxu1 %v7372_v0  ;;  %v5056_v54 = vld [vmem:[%s7363_s0 + $0x168] ss:$20 sps:$4 sm:$0xff]   ;;  %v5120_v56 = vld [vmem:[%s7363_s0 + $0x504] ss:$20 sps:$4 sm:$0xff]   ;;  %v5124_v57 = vld [vmem:[%s7363_s0 + $0x500] ss:$20 sps:$4 sm:$0xff]  }
  0x14   :  { %v5060_v58 = vld [vmem:[%s7363_s0 + $0x190] ss:$20 sps:$4 sm:$0xff]   ;;  %v5127_v61 = vld [vmem:[%s7363_s0 + $0x52c] ss:$20 sps:$4 sm:$0xff]   ;;  %v5131_v62 = vld [vmem:[%s7363_s0 + $0x528] ss:$20 sps:$4 sm:$0xff]  }
  0x15   :  { %v5061_v59 = vld [vmem:[%s7363_s0 + $0x1bc] ss:$20 sps:$4 sm:$0xff]   ;;  %v5063_v63 = vld [vmem:[%s7363_s0 + $0x1b8] ss:$20 sps:$4 sm:$0xff]   ;;  %v5133_v2 = vld [vmem:[%s7363_s0 + $0x554] ss:$20 sps:$4 sm:$0xff]  }
  0x16   :  { %1557 = vmatpush1.bf16.msra.mxu0 %v5011_v7  ;;  %4828 = vmatpush1.bf16.msra.mxu1 %v5011_v7  ;;  %v5126_v60 = vld [vmem:[%s7362_s1 + $0xf0] sm:$0xff]   ;;  %v5065_v1 = vld [vmem:[%s7363_s0 + $0x1e4] ss:$20 sps:$4 sm:$0xff]   ;;  %v5068_v6 = vld [vmem:[%s7363_s0 + $0x20c] ss:$20 sps:$4 sm:$0xff]  }
  0x17   :  { %1558 = vmatprep.subr.bf16.mxu0 %v7372_v0  ;;  %4813 = vmatprep.subr.bf16.mxu1 %v7372_v0  ;;  %v5137_v3 = vld [vmem:[%s7363_s0 + $0x550] ss:$20 sps:$4 sm:$0xff]   ;;  %v5067_v5 = vld [vmem:[%s7363_s0 + $0x1e0] ss:$20 sps:$4 sm:$0xff]   ;;  %v5140_v7 = vld [vmem:[%s7362_s1 + $0xf8] sm:$0xff]  }
  0x18   :  { %v5138_v4 = vld [vmem:[%s7362_s1 + $0x100] sm:$0xff]  }
  0x19   :  { %v5116_v48 = vld [vmem:[%s7363_s0 + $0x3ec] ss:$20 sps:$4 sm:$0xff]  }
  0x1a   :  { %1559 = vmatpush1.bf16.msra.mxu0 %v5012_v8  ;;  %4829 = vmatpush1.bf16.msra.mxu1 %v5012_v8  ;;  %v5141_v8 = vld [vmem:[%s7362_s1 + $0x108] sm:$0xff]  }
  0x1b   :  { %1560 = vmatprep.subr.bf16.mxu0 %v7372_v0  ;;  %4814 = vmatprep.subr.bf16.mxu1 %v7372_v0 }
  0x1e   :  { %1561 = vmatpush1.bf16.msra.mxu0 %v5013_v9  ;;  %4830 = vmatpush1.bf16.msra.mxu1 %v5013_v9  ;;  %v5142_v9 = vld [vmem:[%s7363_s0 + $0x57c] ss:$20 sps:$4 sm:$0xff]  }
  0x1f   :  { %1562 = vmatprep.subr.bf16.mxu0 %v7372_v0  ;;  %4815 = vmatprep.subr.bf16.mxu1 %v7372_v0 }
  0x22   :  { %1563 = vmatpush1.bf16.msra.mxu0 %v5014_v10  ;;  %4831 = vmatpush1.bf16.msra.mxu1 %v5014_v10  ;;  %v5146_v10 = vld [vmem:[%s7363_s0 + $0x578] ss:$20 sps:$4 sm:$0xff]  }
  0x23   :  { %1564 = vmatprep.subr.bf16.mxu0 %v7372_v0  ;;  %4816 = vmatprep.subr.bf16.mxu1 %v7372_v0 }
  0x26   :  { %1565 = vmatpush1.bf16.msra.mxu0 %v5015_v11  ;;  %4832 = vmatpush1.bf16.msra.mxu1 %v5015_v11  ;;  %v5147_v11 = vld [vmem:[%s7362_s1 + $0x110] sm:$0xff]  }
  0x27   :  { %1566 = vmatprep.subr.bf16.mxu0 %v7372_v0  ;;  %4817 = vmatprep.subr.bf16.mxu1 %v7372_v0 }
  0x2a   :  { %1567 = vmatpush1.bf16.msra.mxu0 %v5016_v12  ;;  %4833 = vmatpush1.bf16.msra.mxu1 %v5016_v12  ;;  %v5070_v12 = vld [vmem:[%s7363_s0 + $0x208] ss:$20 sps:$4 sm:$0xff]  }
  0x2b   :  { %1568 = vmatprep.subr.bf16.mxu0 %v7372_v0  ;;  %4818 = vmatprep.subr.bf16.mxu1 %v7372_v0 }
  0x2e   :  { %1569 = vmatpush1.bf16.msra.mxu0 %v5017_v13  ;;  %4834 = vmatpush1.bf16.msra.mxu1 %v5017_v13  ;;  %v5072_v13 = vld [vmem:[%s7363_s0 + $0x234] ss:$20 sps:$4 sm:$0xff]  }
  0x2f   :  { %1570 = vmatprep.subr.bf16.mxu0 %v7372_v0  ;;  %4819 = vmatprep.subr.bf16.mxu1 %v7372_v0 }
  0x32   :  { %1571 = vmatpush1.bf16.msra.mxu0 %v5018_v14  ;;  %4835 = vmatpush1.bf16.msra.mxu1 %v5018_v14  ;;  %v5149_v14 = vld [vmem:[%s7362_s1 + $0x118] sm:$0xff]  }
  0x33   :  { %1572 = vmatprep.subr.bf16.mxu0 %v7372_v0  ;;  %4820 = vmatprep.subr.bf16.mxu1 %v7372_v0 }
  0x36   :  { %1573 = vmatpush1.bf16.msra.mxu0 %v5019_v15  ;;  %4836 = vmatpush1.bf16.msra.mxu1 %v5019_v15  ;;  %v5150_v15 = vld [vmem:[%s7363_s0 + $0x10] ss:$20 sps:$4 sm:$0xff]  }
  0x37   :  { %1574 = vmatprep.subr.bf16.mxu0 %v7372_v0  ;;  %4821 = vmatprep.subr.bf16.mxu1 %v7372_v0 }
  0x3a   :  { %1575 = vmatpush1.bf16.msra.mxu0 %v5020_v16  ;;  %4837 = vmatpush1.bf16.msra.mxu1 %v5020_v16  ;;  %v5154_v16 = vld [vmem:[%s7363_s0 + $0x38] ss:$20 sps:$4 sm:$0xff]  }
  0x3b   :  { %1576 = vmatprep.subr.bf16.mxu0 %v7372_v0  ;;  %4822 = vmatprep.subr.bf16.mxu1 %v7372_v0 }
  0x3e   :  { %1577 = vmatpush1.bf16.msra.mxu0 %v5021_v17  ;;  %4838 = vmatpush1.bf16.msra.mxu1 %v5021_v17  ;;  %v5074_v17 = vld [vmem:[%s7363_s0 + $0x230] ss:$20 sps:$4 sm:$0xff]  }
  0x3f   :  { %1867 = vmatprep.subr.bf16.mxu0 %v7372_v0  ;;  %4707 = vmatprep.subr.bf16.mxu1 %v5138_v4 }
  0x41   :  { %1579 = vmatmul.mubr.bf16.vlgmr.msra.gmra.mrb[0].mxu0 %v5022_v18  ;;  %1819 = vmatmul.mubr.bf16.vlgmr.msra.gmra.mrb[0].mxu1 %v5107_v47  ;;  %v5075_v18 = vld [vmem:[%s7363_s0 + $0x25c] ss:$20 sps:$4 sm:$0xff]   ;;  %v5112_v47 = vld [vmem:[%s7363_s0 + $0x3c0] ss:$20 sps:$4 sm:$0xff]  }
  0x42   :  { %1868 = vmatpush1.bf16.msra.mxu0 %v5025_v19  ;;  %1586 = vmatprep.mubr.bf16.mxu0 %v5026_v20  ;;  %v5077_v19 = vld [vmem:[%s7363_s0 + $0x258] ss:$20 sps:$4 sm:$0xff]  }
  0x43   :  { %1869 = vmatprep.subr.bf16.mxu0 %v7372_v0  ;;  %1826 = vmatprep.mubr.bf16.mxu1 %v5114_v52  ;;  %v5079_v20 = vld [vmem:[%s7363_s0 + $0x284] ss:$20 sps:$4 sm:$0xff]  }
  0x44   :  { %4708 = vmatpush3.bf16.msra.mxu1 %v5138_v4  ;;  %v5201_v52 = vld [vmem:[%s7363_s0 + $0x218] ss:$20 sps:$4 sm:$0xff]   ;;  %v5157_v4 = vld [vmem:[%s7363_s0 + $0x30] ss:$20 sps:$4 sm:$0xff]  }
  0x45   :  { %4709 = vmatprep.subr.bf16.mxu1 %v5141_v8 }
  0x46   :  { %1870 = vmatpush1.bf16.msra.mxu0 %v5032_v21  ;;  %v5158_v21 = vld [vmem:[%s7363_s0 + $0x60] ss:$20 sps:$4 sm:$0xff]  }
  0x47   :  { %1871 = vmatprep.subr.bf16.mxu0 %v7372_v0 }
  0x48   :  { %4710 = vmatpush3.bf16.msra.mxu1 %v5141_v8  ;;  %v5162_v8 = vld [vmem:[%s7363_s0 + $0x58] ss:$20 sps:$4 sm:$0xff]  }
  0x49   :  { %1587 = vmatmul.mubr.bf16.gmra.mrb[4].mxu0 %v5028_v22  ;;  %1827 = vmatmul.mubr.bf16.gmra.mrb[4].mxu1 %v5118_v53  ;;  %v5161_v22 = vld [vmem:[%s7363_s0 + $0x88] ss:$20 sps:$4 sm:$0xff]   ;;  %v5125_v53 = vld [vmem:[%s7363_s0 + $0x410] ss:$20 sps:$4 sm:$0xff]  }
  0x4a   :  { %1594 = vmatprep.mubr.bf16.mxu0 %v5029_v23  ;;  %1872 = vmatpush1.bf16.msra.mxu0 %v5038_v24  ;;  %v5081_v23 = vld [vmem:[%s7363_s0 + $0x280] ss:$20 sps:$4 sm:$0xff]  }
  0x4b   :  { %1873 = vmatprep.subr.bf16.mxu0 %v7372_v0  ;;  %1834 = vmatprep.mubr.bf16.mxu1 %v5120_v56  ;;  %v5082_v24 = vld [vmem:[%s7363_s0 + $0x2ac] ss:$20 sps:$4 sm:$0xff]   ;;  %v5135_v56 = vld [vmem:[%s7363_s0 + $0x464] ss:$20 sps:$4 sm:$0xff]  }
  0x4c   :  { %4711 = vmatprep.subr.bf16.mxu1 %v5147_v11 }
  0x4d   :  { %4712 = vmatpush3.bf16.msra.mxu1 %v5147_v11  ;;  %v5167_v11 = vld [vmem:[%s7363_s0 + $0xac] ss:$20 sps:$4 sm:$0xff]  }
  0x4e   :  { %1874 = vmatpush1.bf16.msra.mxu0 %v5043_v25  ;;  %4713 = vmatprep.subr.bf16.mxu1 %v5149_v14  ;;  %v5084_v25 = vld [vmem:[%s7363_s0 + $0x2a8] ss:$20 sps:$4 sm:$0xff]  }
  0x4f   :  { %1875 = vmatprep.subr.bf16.mxu0 %v7372_v0 }
  0x51   :  { %1595 = vmatmul.mubr.bf16.gmra.mrb[8].mxu0 %v5031_v26  ;;  %1835 = vmatmul.mubr.bf16.gmra.mrb[8].mxu1 %v5124_v57  ;;  %v5086_v26 = vld [vmem:[%s7363_s0 + $0x2d4] ss:$20 sps:$4 sm:$0xff]  }
  0x52   :  { %1602 = vmatprep.mubr.bf16.mxu0 %v5033_v27  ;;  %1876 = vmatpush1.bf16.msra.mxu0 %v5050_v28  ;;  %v5166_v27 = vld [vmem:[%s7363_s0 + $0xb0] ss:$20 sps:$4 sm:$0xff]   ;;  %v5169_v28 = vld [vmem:[%s7363_s0 + $0xd8] ss:$20 sps:$4 sm:$0xff]   ;;  %v5206_v57 = vld [vmem:[%s7363_s0 + $0x240] ss:$20 sps:$4 sm:$0xff]  }
  0x53   :  { %1877 = vmatprep.subr.bf16.mxu0 %v7372_v0  ;;  %1842 = vmatprep.mubr.bf16.mxu1 %v5127_v61  ;;  %v5148_v61 = vld [vmem:[%s7363_s0 + $0x488] ss:$20 sps:$4 sm:$0xff]  }
  0x54   :  { %4714 = vmatpush3.bf16.msra.mxu1 %v5149_v14  ;;  %v5170_v14 = vld [vmem:[%s7363_s0 + $0xa8] ss:$20 sps:$4 sm:$0xff]  }
  0x56   :  { %1878 = vmatpush1.bf16.msra.mxu0 %v5057_v29  ;;  %v5088_v29 = vld [vmem:[%s7363_s0 + $0x2d0] ss:$20 sps:$4 sm:$0xff]  }
  0x57   :  { %1879 = vmatprep.subr.bf16.mxu0 %v7372_v0 }
  0x59   :  { %1603 = vmatmul.mubr.bf16.gmra.mrb[12].mxu0 %v5035_v30  ;;  %1843 = vmatmul.mubr.bf16.gmra.mrb[12].mxu1 %v5131_v62  ;;  %v5089_v30 = vld [vmem:[%s7363_s0 + $0x2fc] ss:$20 sps:$4 sm:$0xff]   ;;  %v5153_v62 = vld [vmem:[%s7363_s0 + $0xc] ss:$20 sps:$4 sm:$0xff]  }
  0x5a   :  { %1610 = vmatprep.mubr.bf16.mxu0 %v5036_v31  ;;  %1880 = vmatpush1.bf16.msra.mxu0 %v5064_v32  ;;  %v5092_v31 = vld [vmem:[%s7363_s0 + $0x2f8] ss:$20 sps:$4 sm:$0xff]  }
  0x5b   :  { %1881 = vmatprep.subr.bf16.mxu0 %v7372_v0  ;;  %1850 = vmatprep.mubr.bf16.mxu1 %v5133_v2  ;;  %v5093_v32 = vld [vmem:[%s7363_s0 + $0x324] ss:$20 sps:$4 sm:$0xff]   ;;  %v5151_v2 = vld [vmem:[%s7363_s0 + $0x8] ss:$20 sps:$4 sm:$0xff]  }
  0x5e   :  { %1882 = vmatpush1.bf16.msra.mxu0 %v5071_v33  ;;  %v5174_v33 = vld [vmem:[%s7363_s0 + $0x100] ss:$20 sps:$4 sm:$0xff]  }
  0x5f   :  { %1883 = vmatprep.subr.bf16.mxu0 %v7372_v0 }
  0x61   :  { %1611 = vmatmul.mubr.bf16.gmra.mrb[16].mxu0 %v5039_v34  ;;  %1851 = vmatmul.mubr.bf16.gmra.mrb[16].mxu1 %v5137_v3  ;;  %v5177_v34 = vld [vmem:[%s7363_s0 + $0x128] ss:$20 sps:$4 sm:$0xff]  }
  0x62   :  { %1618 = vmatprep.mubr.bf16.mxu0 %v5040_v35  ;;  %1884 = vmatpush1.bf16.msra.mxu0 %v5078_v36  ;;  %v5095_v35 = vld [vmem:[%s7363_s0 + $0x320] ss:$20 sps:$4 sm:$0xff]  }
  0x63   :  { %1885 = vmatprep.subr.bf16.mxu0 %v7372_v0  ;;  %1858 = vmatprep.mubr.bf16.mxu1 %v5142_v9  ;;  %v5097_v36 = vld [vmem:[%s7363_s0 + $0x34c] ss:$20 sps:$4 sm:$0xff]   ;;  %v5155_v3 = vld [vmem:[%s7363_s0 + $0x34] ss:$20 sps:$4 sm:$0xff]   ;;  %v5163_v9 = vld [vmem:[%s7363_s0 + $0x84] ss:$20 sps:$4 sm:$0xff]  }
  0x66   :  { %1886 = vmatpush1.bf16.msra.mxu0 %v5085_v37  ;;  %v5099_v37 = vld [vmem:[%s7363_s0 + $0x348] ss:$20 sps:$4 sm:$0xff]  }
  0x67   :  { %1887 = vmatprep.subr.bf16.mxu0 %v7372_v0 }
  0x69   :  { %1619 = vmatmul.mubr.bf16.gmra.mrb[20].mxu0 %v5042_v38  ;;  %1859 = vmatmul.mubr.bf16.gmra.mrb[20].mxu1 %v5146_v10  ;;  %v5100_v38 = vld [vmem:[%s7363_s0 + $0x374] ss:$20 sps:$4 sm:$0xff]  }
  0x6a   :  { %1626 = vmatprep.mubr.bf16.mxu0 %v5044_v39  ;;  %1888 = vmatpush1.bf16.msra.mxu0 %v5091_v40  ;;  %v5182_v39 = vld [vmem:[%s7363_s0 + $0x150] ss:$20 sps:$4 sm:$0xff]   ;;  %v5185_v40 = vld [vmem:[%s7363_s0 + $0x178] ss:$20 sps:$4 sm:$0xff]   ;;  %v5165_v10 = vld [vmem:[%s7363_s0 + $0x80] ss:$20 sps:$4 sm:$0xff]  }
  0x6b   :  { %1889 = vmatprep.subr.bf16.mxu0 %v7372_v0  ;;  %4715 = vmatprep.mubr.msk.bf16.mxu1 %vm1437_vm0, %v5150_v15  ;;  %v5171_v15 = vld [vmem:[%s7363_s0 + $0xd4] ss:$20 sps:$4 sm:$0xff]  }
  0x6e   :  { %1890 = vmatpush1.bf16.msra.mxu0 %v5096_v41  ;;  %v5102_v41 = vld [vmem:[%s7363_s0 + $0x370] ss:$20 sps:$4 sm:$0xff]  }
  0x6f   :  { %1891 = vmatprep.subr.bf16.mxu0 %v7372_v0 }
  0x71   :  { %1627 = vmatmul.mubr.bf16.gmra.mrb[24].mxu0 %v5046_v42  ;;  %4716 = vmatmul.mubr.msk.bf16.vlgmr.msra.gmra.mrb[24].mxu1 %vm1437_vm0, %v5154_v16  ;;  %v5104_v42 = vld [vmem:[%s7363_s0 + $0x39c] ss:$20 sps:$4 sm:$0xff]  }
  0x72   :  { %1634 = vmatprep.mubr.bf16.mxu0 %v5047_v43  ;;  %1892 = vmatpush1.bf16.msra.mxu0 %v5103_v44  ;;  %v5106_v43 = vld [vmem:[%s7363_s0 + $0x398] ss:$20 sps:$4 sm:$0xff]   ;;  %v5173_v16 = vld [vmem:[%s7363_s0 + $0xd0] ss:$20 sps:$4 sm:$0xff]  }
  0x73   :  { %1893 = vmatprep.subr.bf16.mxu0 %v7372_v0  ;;  %4719 = vmatprep.mubr.msk.bf16.mxu1 %vm1437_vm0, %v5158_v21  ;;  %v5110_v44 = vld [vmem:[%s7363_s0 + $0x3c4] ss:$20 sps:$4 sm:$0xff]  }
  0x74   :  { %v5179_v21 = vld [vmem:[%s7363_s0 + $0x124] ss:$20 sps:$4 sm:$0xff]  }
  0x76   :  { %1894 = vmatpush1.bf16.msra.mxu0 %v5113_v51  ;;  %v5198_v51 = vld [vmem:[%s7363_s0 + $0x1f0] ss:$20 sps:$4 sm:$0xff]  }
  0x77   :  { %1895 = vmatprep.subr.bf16.mxu0 %v7372_v0 }
  0x79   :  { %1635 = vmatmul.mubr.bf16.gmra.mrb[28].mxu0 %v5049_v45  ;;  %4720 = vmatmul.mubr.msk.bf16.gmra.mrb[28].mxu1 %vm1437_vm0, %v5161_v22  ;;  %v5190_v45 = vld [vmem:[%s7363_s0 + $0x1a0] ss:$20 sps:$4 sm:$0xff]  }
  0x7a   :  { %1642 = vmatprep.mubr.bf16.mxu0 %v5051_v46  ;;  %1896 = vmatpush1.bf16.msra.mxu0 %v5126_v60  ;;  %v5193_v46 = vld [vmem:[%s7363_s0 + $0x1c8] ss:$20 sps:$4 sm:$0xff]   ;;  %v5144_v60 = vld [vmem:[%s7363_s0 + $0x48c] ss:$20 sps:$4 sm:$0xff]  }
  0x7b   :  { %1897 = vmatprep.subr.bf16.mxu0 %v7372_v0  ;;  %4723 = vmatprep.mubr.msk.bf16.mxu1 %vm1437_vm0, %v5166_v27  ;;  %v5181_v22 = vld [vmem:[%s7363_s0 + $0x120] ss:$20 sps:$4 sm:$0xff]   ;;  %v5249_v27 = vld [vmem:[%s7363_s0 + $0x3f8] ss:$20 sps:$4 sm:$0xff]  }
  0x7e   :  { %1898 = vmatpush1.bf16.msra.mxu0 %v5140_v7  ;;  %v5225_v7 = vld [vmem:[%s7363_s0 + $0x308] ss:$20 sps:$4 sm:$0xff]  }
  0x81   :  { %1643 = vmatmul.mubr.bf16.gmra.mrb[32].mxu0 %v5053_v49  ;;  %4724 = vmatmul.mubr.msk.bf16.gmra.mrb[32].mxu1 %vm1437_vm0, %v5169_v28  ;;  %v5119_v49 = vld [vmem:[%s7363_s0 + $0x3e8] ss:$20 sps:$4 sm:$0xff]  }
  0x82   :  { %1650 = vmatprep.mubr.bf16.mxu0 %v5054_v50  ;;  %4727 = vmatprep.mubr.msk.bf16.mxu1 %vm1437_vm0, %v5174_v33  ;;  %v5122_v50 = vld [vmem:[%s7363_s0 + $0x414] ss:$20 sps:$4 sm:$0xff]  }
  0x89   :  { %1651 = vmatmul.mubr.bf16.gmra.mrb[36].mxu0 %v5056_v54  ;;  %4728 = vmatmul.mubr.msk.bf16.gmra.mrb[36].mxu1 %vm1437_vm0, %v5177_v34  ;;  %v5129_v54 = vld [vmem:[%s7363_s0 + $0x43c] ss:$20 sps:$4 sm:$0xff]  }
  0x8a   :  { %1658 = vmatprep.mubr.bf16.mxu0 %v5058_v55  ;;  %4731 = vmatprep.mubr.msk.bf16.mxu1 %vm1437_vm0, %v5182_v39  ;;  %v5132_v55 = vld [vmem:[%s7363_s0 + $0x438] ss:$20 sps:$4 sm:$0xff]  }
  0x91   :  { %1659 = vmatmul.mubr.bf16.gmra.mrb[40].mxu0 %v5060_v58  ;;  %4732 = vmatmul.mubr.msk.bf16.gmra.mrb[40].mxu1 %vm1437_vm0, %v5185_v40  ;;  %v5209_v58 = vld [vmem:[%s7363_s0 + $0x268] ss:$20 sps:$4 sm:$0xff]   ;;  %v5189_v40 = vld [vmem:[%s7363_s0 + $0x170] ss:$20 sps:$4 sm:$0xff]  }
  0x92   :  { %1666 = vmatprep.mubr.bf16.mxu0 %v5061_v59  ;;  %4735 = vmatprep.mubr.msk.bf16.mxu1 %vm1437_vm0, %v5190_v45  ;;  %v5139_v59 = vld [vmem:[%s7363_s0 + $0x460] ss:$20 sps:$4 sm:$0xff]  }
  0x99   :  { %1667 = vmatmul.mubr.bf16.gmra.mrb[44].mxu0 %v5063_v63  ;;  %4736 = vmatmul.mubr.msk.bf16.gmra.mrb[44].mxu1 %vm1437_vm0, %v5193_v46  ;;  %v5214_v63 = vld [vmem:[%s7363_s0 + $0x290] ss:$20 sps:$4 sm:$0xff]  }
  0x9a   :  { %1674 = vmatprep.mubr.bf16.mxu0 %v5065_v1  ;;  %4739 = vmatprep.mubr.msk.bf16.mxu1 %vm1437_vm0, %v5198_v51  ;;  %v5217_v1 = vld [vmem:[%s7363_s0 + $0x2b8] ss:$20 sps:$4 sm:$0xff]  }
  0xa1   :  { %1675 = vmatmul.mubr.bf16.gmra.mrb[48].mxu0 %v5067_v5  ;;  %4740 = vmatmul.mubr.msk.bf16.gmra.mrb[48].mxu1 %vm1437_vm0, %v5201_v52  ;;  %v5159_v5 = vld [vmem:[%s7363_s0 + $0x5c] ss:$20 sps:$4 sm:$0xff]   ;;  %v5194_v52 = vld [vmem:[%s7363_s0 + $0x198] ss:$20 sps:$4 sm:$0xff]  }
  0xa2   :  { %1682 = vmatprep.mubr.bf16.mxu0 %v5068_v6  ;;  %4743 = vmatprep.mubr.msk.bf16.mxu1 %vm1437_vm0, %v5206_v57  ;;  %v5222_v6 = vld [vmem:[%s7363_s0 + $0x2e0] ss:$20 sps:$4 sm:$0xff]  }
  0xa9   :  { %1683 = vmatmul.mubr.bf16.gmra.mrb[52].mxu0 %v5070_v12  ;;  %4744 = vmatmul.mubr.msk.bf16.gmra.mrb[52].mxu1 %vm1437_vm0, %v5209_v58  ;;  %v5230_v12 = vld [vmem:[%s7363_s0 + $0x330] ss:$20 sps:$4 sm:$0xff]  }
  0xaa   :  { %1690 = vmatprep.mubr.bf16.mxu0 %v5072_v13  ;;  %4747 = vmatprep.mubr.msk.bf16.mxu1 %vm1437_vm0, %v5214_v63  ;;  %v5233_v13 = vld [vmem:[%s7363_s0 + $0x358] ss:$20 sps:$4 sm:$0xff]  }
  0xb1   :  { %1691 = vmatmul.mubr.bf16.gmra.mrb[56].mxu0 %v5074_v17  ;;  %4748 = vmatmul.mubr.msk.bf16.gmra.mrb[56].mxu1 %vm1437_vm0, %v5217_v1  ;;  %v5175_v17 = vld [vmem:[%s7363_s0 + $0xfc] ss:$20 sps:$4 sm:$0xff]  }
  0xb2   :  { %1698 = vmatprep.mubr.bf16.mxu0 %v5075_v18  ;;  %4751 = vmatprep.mubr.msk.bf16.mxu1 %vm1437_vm0, %v5222_v6  ;;  %v5238_v18 = vld [vmem:[%s7363_s0 + $0x380] ss:$20 sps:$4 sm:$0xff]   ;;  %v5262_v1 = vld [vmem:[%s7363_s0 + $0x470] ss:$20 sps:$4 sm:$0xff]  }
  0xb9   :  { %1699 = vmatmul.mubr.bf16.gmra.mrb[60].mxu0 %v5077_v19  ;;  %4752 = vmatmul.mubr.msk.bf16.gmra.mrb[60].mxu1 %vm1437_vm0, %v5225_v7  ;;  %v5241_v19 = vld [vmem:[%s7363_s0 + $0x3a8] ss:$20 sps:$4 sm:$0xff]   ;;  %v5205_v7 = vld [vmem:[%s7363_s0 + $0x210] ss:$20 sps:$4 sm:$0xff]  }
  0xba   :  { %1706 = vmatprep.mubr.bf16.mxu0 %v5079_v20  ;;  %4755 = vmatprep.mubr.msk.bf16.mxu1 %vm1437_vm0, %v5230_v12  ;;  %v5178_v20 = vld [vmem:[%s7363_s0 + $0xf8] ss:$20 sps:$4 sm:$0xff]  }
  0xbb   :  { %v5211_v12 = vld [vmem:[%s7363_s0 + $0x264] ss:$20 sps:$4 sm:$0xff]  }
  0xc1   :  { %1707 = vmatmul.mubr.bf16.gmra.mrb[64].mxu0 %v5081_v23  ;;  %4756 = vmatmul.mubr.msk.bf16.gmra.mrb[64].mxu1 %vm1437_vm0, %v5233_v13  ;;  %v5183_v23 = vld [vmem:[%s7363_s0 + $0x14c] ss:$20 sps:$4 sm:$0xff]  }
  0xc2   :  { %1714 = vmatprep.mubr.bf16.mxu0 %v5082_v24  ;;  %4759 = vmatprep.mubr.msk.bf16.mxu1 %vm1437_vm0, %v5238_v18  ;;  %v5273_v13 = vld [vmem:[%s7363_s0 + $0x4c0] ss:$20 sps:$4 sm:$0xff]  }
  0xc9   :  { %1715 = vmatmul.mubr.bf16.gmra.mrb[68].mxu0 %v5084_v25  ;;  %4760 = vmatmul.mubr.msk.bf16.gmra.mrb[68].mxu1 %vm1437_vm0, %v5241_v19  ;;  %v5246_v25 = vld [vmem:[%s7363_s0 + $0x3d0] ss:$20 sps:$4 sm:$0xff]   ;;  %v5215_v19 = vld [vmem:[%s7363_s0 + $0x28c] ss:$20 sps:$4 sm:$0xff]  }
  0xca   :  { %1722 = vmatprep.mubr.bf16.mxu0 %v5086_v26  ;;  %4763 = vmatprep.mubr.msk.bf16.mxu1 %vm1437_vm0, %v5246_v25  ;;  %v5282_v25 = vld [vmem:[%s7363_s0 + $0x538] ss:$20 sps:$4 sm:$0xff]  }
  0xd1   :  { %1723 = vmatmul.mubr.bf16.gmra.mrb[72].mxu0 %v5088_v29  ;;  %4764 = vmatmul.mubr.msk.bf16.gmra.mrb[72].mxu1 %vm1437_vm0, %v5249_v27 }
  0xd2   :  { %1730 = vmatprep.mubr.bf16.mxu0 %v5089_v30  ;;  %v5186_v30 = vld [vmem:[%s7363_s0 + $0x148] ss:$20 sps:$4 sm:$0xff]  }
  0xd9   :  { %1731 = vmatmul.mubr.bf16.gmra.mrb[76].mxu0 %v5092_v31 }
  0xda   :  { %1738 = vmatprep.mubr.bf16.mxu0 %v5093_v32  ;;  %v5187_v32 = vld [vmem:[%s7363_s0 + $0x174] ss:$20 sps:$4 sm:$0xff]  }
  0xe1   :  { %1739 = vmatmul.mubr.bf16.gmra.mrb[80].mxu0 %v5095_v35 }
  0xe2   :  { %1746 = vmatprep.mubr.bf16.mxu0 %v5097_v36 }
  0xe9   :  { %1747 = vmatmul.mubr.bf16.gmra.mrb[84].mxu0 %v5099_v37 }
  0xea   :  { %1754 = vmatprep.mubr.bf16.mxu0 %v5100_v38 }
  0xf1   :  { %1755 = vmatmul.mubr.bf16.gmra.mrb[88].mxu0 %v5102_v41 }
  0xf2   :  { %1762 = vmatprep.mubr.bf16.mxu0 %v5104_v42  ;;  %v5191_v42 = vld [vmem:[%s7363_s0 + $0x19c] ss:$20 sps:$4 sm:$0xff]  }
  0xf9   :  { %1763 = vmatmul.mubr.bf16.gmra.mrb[92].mxu0 %v5106_v43 }
  0xfa   :  { %1770 = vmatprep.mubr.bf16.mxu0 %v5110_v44 }
 0x101   :  { %1771 = vmatmul.mubr.bf16.gmra.mrb[96].mxu0 %v5112_v47  ;;  %v5254_v47 = vld [vmem:[%s7363_s0 + $0x420] ss:$20 sps:$4 sm:$0xff]  }
 0x102   :  { %1778 = vmatprep.mubr.bf16.mxu0 %v5116_v48  ;;  %4767 = vmatprep.mubr.msk.bf16.mxu1 %vm1437_vm0, %v5254_v47 }
 0x109   :  { %1779 = vmatmul.mubr.bf16.gmra.mrb[100].mxu0 %v5119_v49  ;;  %v5257_v49 = vld [vmem:[%s7363_s0 + $0x448] ss:$20 sps:$4 sm:$0xff]  }
 0x10a   :  { %1786 = vmatprep.mubr.bf16.mxu0 %v5122_v50  ;;  %4768 = vmatmul.mubr.msk.bf16.gmra.mrb[76].mxu1 %vm1437_vm0, %v5257_v49 }
 0x10b   :  { %4771 = vmatprep.mubr.msk.bf16.mxu1 %vm1437_vm0, %v5262_v1 }
 0x111   :  { %1787 = vmatmul.mubr.bf16.gmra.mrb[104].mxu0 %v5125_v53 }
 0x112   :  { %1794 = vmatprep.mubr.bf16.mxu0 %v5129_v54  ;;  %v5195_v54 = vld [vmem:[%s7363_s0 + $0x1c4] ss:$20 sps:$4 sm:$0xff]  }
 0x114   :  { %v6106_v24 = vpop.f32.mrb[0].mxu1 }
 0x115   :  { %7375 = vst [vmem:[#allocation2_spill] sm:$0xff] %v6106_v24  ;;  %v1822_v26 = vpop.f32.mrb[1].mxu1 }
 0x116   :  { %v6114_v28 = vpop.f32.mrb[2].mxu1 }
 0x117   :  { %7376 = vst [vmem:[#allocation3_spill] sm:$0xff] %v6114_v28  ;;  %v1825_v29 = vpop.f32.mrb[3].mxu1 }
 0x118   :  { %v5221_v29 = vld [vmem:[%s7363_s0 + $0x2b0] ss:$20 sps:$4 sm:$0xff]  }
 0x119   :  { %1795 = vmatmul.mubr.bf16.gmra.mrb[108].mxu0 %v5132_v55 }
 0x11a   :  { %1802 = vmatprep.mubr.bf16.mxu0 %v5135_v56 }
 0x11c   :  { %v6121_v31 = vpop.f32.mrb[4].mxu1 }
 0x11d   :  { %7377 = vst [vmem:[#allocation4_spill] sm:$0xff] %v6121_v31  ;;  %v1830_v33 = vpop.f32.mrb[5].mxu1 }
 0x11e   :  { %v6126_v34 = vpop.f32.mrb[6].mxu1 }
 0x11f   :  { %7378 = vst [vmem:[#allocation5_spill] sm:$0xff] %v6126_v34  ;;  %v1833_v35 = vpop.f32.mrb[7].mxu1 }
 0x120   :  { %v5226_v35 = vld [vmem:[%s7363_s0 + $0x2d8] ss:$20 sps:$4 sm:$0xff]  }
 0x121   :  { %1803 = vmatmul.mubr.bf16.gmra.mrb[112].mxu0 %v5139_v59 }
 0x122   :  { %1810 = vmatprep.mubr.bf16.mxu0 %v5144_v60  ;;  %v5197_v60 = vld [vmem:[%s7363_s0 + $0x1c0] ss:$20 sps:$4 sm:$0xff]  }
 0x124   :  { %v6128_v36 = vpop.f32.mrb[8].mxu1 }
 0x125   :  { %7379 = vst [vmem:[#allocation6_spill] sm:$0xff] %v6128_v36  ;;  %v1838_v37 = vpop.f32.mrb[9].mxu1 }
 0x126   :  { %v6130_v38 = vpop.f32.mrb[10].mxu1  ;;  %v5227_v37 = vld [vmem:[%s7363_s0 + $0x304] ss:$20 sps:$4 sm:$0xff]  }
 0x127   :  { %7380 = vst [vmem:[#allocation7_spill] sm:$0xff] %v6130_v38  ;;  %v1841_v39 = vpop.f32.mrb[11].mxu1  ;;  %v5293_v38 = vld [vmem:[%s7363_s0 + $0x580] ss:$20 sps:$4 sm:$0xff]  }
 0x128   :  { %v5289_v39 = vld [vmem:[%s7363_s0 + $0x560] ss:$20 sps:$4 sm:$0xff]  }
 0x129   :  { %1811 = vmatmul.mubr.bf16.gmra.mrb[116].mxu0 %v5148_v61 }
 0x12a   :  { %1899 = vmatprep.mubr.bf16.mxu0 %v5153_v62  ;;  %v5199_v62 = vld [vmem:[%s7363_s0 + $0x1ec] ss:$20 sps:$4 sm:$0xff]  }
 0x12c   :  { %v6135_v41 = vpop.f32.mrb[12].mxu1 }
 0x12d   :  { %7381 = vst [vmem:[#allocation8_spill] sm:$0xff] %v6135_v41  ;;  %v1846_v43 = vpop.f32.mrb[13].mxu1 }
 0x12e   :  { %v6140_v44 = vpop.f32.mrb[14].mxu1 }
 0x12f   :  { %7382 = vst [vmem:[#allocation9_spill] sm:$0xff] %v6140_v44  ;;  %v1849_v45 = vpop.f32.mrb[15].mxu1 }
 0x130   :  { %v5229_v45 = vld [vmem:[%s7363_s0 + $0x300] ss:$20 sps:$4 sm:$0xff]  }
 0x131   :  { %1900 = vmatmul.mubr.bf16.vlgmr.msra.gmra.mrb[0].mxu0 %v5151_v2  ;;  %v5263_v2 = vld [vmem:[%s7363_s0 + $0x498] ss:$20 sps:$4 sm:$0xff]  }
 0x132   :  { %1907 = vmatprep.mubr.bf16.mxu0 %v5155_v3  ;;  %v5202_v3 = vld [vmem:[%s7363_s0 + $0x1e8] ss:$20 sps:$4 sm:$0xff]   ;;  %4772 = vmatmul.mubr.msk.bf16.gmra.mrb[80].mxu1 %vm1437_vm0, %v5263_v2  ;;  %v5242_v2 = vld [vmem:[%s7363_s0 + $0x378] ss:$20 sps:$4 sm:$0xff]  }
 0x133   :  { %4775 = vmatprep.mubr.msk.bf16.mxu1 %vm1437_vm0, %v5273_v13 }
 0x134   :  { %v6142_v46 = vpop.f32.mrb[16].mxu1 }
 0x135   :  { %7383 = vst [vmem:[#allocation10_spill] sm:$0xff] %v6142_v46  ;;  %v1854_v48 = vpop.f32.mrb[17].mxu1 }
 0x136   :  { %v6150_v50 = vpop.f32.mrb[18].mxu1  ;;  %v5231_v48 = vld [vmem:[%s7363_s0 + $0x32c] ss:$20 sps:$4 sm:$0xff]  }
 0x137   :  { %7384 = vst [vmem:[#allocation11_spill] sm:$0xff] %v6150_v50  ;;  %v1857_v51 = vpop.f32.mrb[19].mxu1  ;;  %v5285_v50 = vld [vmem:[%s7363_s0 + $0x530] ss:$20 sps:$4 sm:$0xff]  }
 0x138   :  { %v5234_v51 = vld [vmem:[%s7363_s0 + $0x328] ss:$20 sps:$4 sm:$0xff]  }
 0x139   :  { %1908 = vmatmul.mubr.bf16.gmra.mrb[4].mxu0 %v5157_v4  ;;  %v5203_v4 = vld [vmem:[%s7363_s0 + $0x214] ss:$20 sps:$4 sm:$0xff]  }
 0x13a   :  { %1915 = vmatprep.mubr.bf16.mxu0 %v5159_v5 }
 0x13c   :  { %v6157_v53 = vpop.f32.mrb[20].mxu1 }
 0x13d   :  { %7385 = vst [vmem:[#allocation12_spill] sm:$0xff] %v6157_v53  ;;  %v1862_v55 = vpop.f32.mrb[21].mxu1 }
 0x13e   :  { %v6162_v56 = vpop.f32.mrb[22].mxu1 }
 0x13f   :  { %7386 = vst [vmem:[#allocation13_spill] sm:$0xff] %v6162_v56  ;;  %v1865_v57 = vpop.f32.mrb[23].mxu1 }
 0x140   :  { %v5237_v57 = vld [vmem:[%s7363_s0 + $0x350] ss:$20 sps:$4 sm:$0xff]  }
 0x141   :  { %1916 = vmatmul.mubr.bf16.gmra.mrb[8].mxu0 %v5162_v8 }
 0x142   :  { %1923 = vmatprep.mubr.bf16.mxu0 %v5163_v9  ;;  %v5207_v9 = vld [vmem:[%s7363_s0 + $0x23c] ss:$20 sps:$4 sm:$0xff]  }
 0x144   :  { %v6164_v58 = vpop.f32.mrb[24].mxu1 }
 0x145   :  { %v6166_v59 = vpop.f32.mrb[25].mxu1 }
 0x146   :  { %v6171_v61 = vpop.f32.mrb[26].mxu1 }
 0x147   :  { %v6176_v63 = vpop.f32.mrb[27].mxu1 }
 0x149   :  { %1924 = vmatmul.mubr.bf16.gmra.mrb[12].mxu0 %v5165_v10 }
 0x14a   :  { %1931 = vmatprep.mubr.bf16.mxu0 %v5167_v11  ;;  %v5210_v11 = vld [vmem:[%s7363_s0 + $0x238] ss:$20 sps:$4 sm:$0xff]  }
 0x14c   :  { %v6192_v5 = vpop.f32.mrb[28].mxu1 }
 0x14d   :  { %v6194_v6 = vpop.f32.mrb[29].mxu1 }
 0x14e   :  { %v6199_v8 = vpop.f32.mrb[30].mxu1 }
 0x14f   :  { %v6204_v10 = vpop.f32.mrb[31].mxu1 }
 0x151   :  { %1932 = vmatmul.mubr.bf16.gmra.mrb[16].mxu0 %v5170_v14  ;;  %v5274_v14 = vld [vmem:[%s7363_s0 + $0x4e8] ss:$20 sps:$4 sm:$0xff]  }
 0x152   :  { %1939 = vmatprep.mubr.bf16.mxu0 %v5171_v15  ;;  %4776 = vmatmul.mubr.msk.bf16.gmra.mrb[84].mxu1 %vm1437_vm0, %v5274_v14 }
 0x154   :  { %v6219_v15 = vpop.f32.mrb[32].mxu1 }
 0x159   :  { %1940 = vmatmul.mubr.bf16.gmra.mrb[20].mxu0 %v5173_v16  ;;  %v6222_v16 = vpop.f32.mrb[33].mxu1 }
 0x15a   :  { %1947 = vmatprep.mubr.bf16.mxu0 %v5175_v17  ;;  %v5213_v17 = vld [vmem:[%s7363_s0 + $0x260] ss:$20 sps:$4 sm:$0xff]   ;;  %v6227_v18 = vpop.f32.mrb[34].mxu1 }
 0x161   :  { %1948 = vmatmul.mubr.bf16.gmra.mrb[24].mxu0 %v5178_v20  ;;  %v6232_v20 = vpop.f32.mrb[35].mxu1 }
 0x162   :  { %1955 = vmatprep.mubr.bf16.mxu0 %v5179_v21  ;;  %v5218_v21 = vld [vmem:[%s7363_s0 + $0x288] ss:$20 sps:$4 sm:$0xff]   ;;  %v6247_v26 = vpop.f32.mrb[36].mxu1 }
 0x163   :  { %v6250_v27 = vpop.f32.mrb[37].mxu1 }
 0x169   :  { %1956 = vmatmul.mubr.bf16.gmra.mrb[28].mxu0 %v5181_v22  ;;  %v5219_v22 = vld [vmem:[%s7363_s0 + $0x2b4] ss:$20 sps:$4 sm:$0xff]  }
 0x16a   :  { %1963 = vmatprep.mubr.bf16.mxu0 %v5183_v23  ;;  %v5281_v23 = vld [vmem:[%s7363_s0 + $0x510] ss:$20 sps:$4 sm:$0xff]  }
 0x16b   :  { %4779 = vmatprep.mubr.msk.bf16.mxu1 %vm1437_vm0, %v5281_v23  ;;  %v5297_v23 = vld [vmem:[%s7364_s3 + $0x90] ss:$8 sps:$4 sm:$0xff]  }
 0x16c   :  { %4780 = vmatmul.mubr.msk.bf16.gmra.mrb[88].mxu1 %vm1437_vm0, %v5282_v25  ;;  %v5299_v25 = vld [vmem:[%s7364_s3 + $0x94] ss:$8 sps:$4 sm:$0xff]  }
 0x16d   :  { %4783 = vmatprep.mubr.msk.bf16.mxu1 %vm1437_vm0, %v5289_v39 }
 0x171   :  { %1964 = vmatmul.mubr.bf16.gmra.mrb[32].mxu0 %v5186_v30  ;;  %v6255_v30 = vpop.f32.mrb[38].mxu1 }
 0x172   :  { %1971 = vmatprep.mubr.bf16.mxu0 %v5187_v32  ;;  %v5223_v32 = vld [vmem:[%s7363_s0 + $0x2dc] ss:$20 sps:$4 sm:$0xff]   ;;  %v6260_v33 = vpop.f32.mrb[39].mxu1 }
 0x179   :  { %1972 = vmatmul.mubr.bf16.gmra.mrb[36].mxu0 %v5189_v40  ;;  %v5290_v40 = vld [vmem:[%s7363_s0 + $0x588] ss:$20 sps:$4 sm:$0xff]  }
 0x17a   :  { %1979 = vmatprep.mubr.bf16.mxu0 %v5191_v42  ;;  %v6275_v42 = vpop.f32.mrb[40].mxu1  ;;  %4784 = vmatmul.mubr.msk.bf16.gmra.mrb[92].mxu1 %vm1437_vm0, %v5290_v40  ;;  %v5258_v40 = vld [vmem:[%s7363_s0 + $0x418] ss:$20 sps:$4 sm:$0xff]  }
 0x17b   :  { %2871 = vmatprep.mubr.bf16.mxu1 %v7372_v0  ;;  %v6279_v43 = vpop.f32.mrb[41].mxu1 }
 0x17c   :  { %v6284_v47 = vpop.f32.mrb[42].mxu1 }
 0x17d   :  { %v6289_v49 = vpop.f32.mrb[43].mxu1 }
 0x181   :  { %1980 = vmatmul.mubr.bf16.gmra.mrb[40].mxu0 %v5194_v52  ;;  %v5235_v52 = vld [vmem:[%s7363_s0 + $0x354] ss:$20 sps:$4 sm:$0xff]  }
 0x182   :  { %1987 = vmatprep.mubr.bf16.mxu0 %v5195_v54  ;;  %v6297_v54 = vpop.f32.mrb[44].mxu1 }
 0x183   :  { %v6299_v55 = vpop.f32.mrb[45].mxu1 }
 0x189   :  { %1988 = vmatmul.mubr.bf16.gmra.mrb[44].mxu0 %v5197_v60  ;;  %v6304_v60 = vpop.f32.mrb[46].mxu1 }
 0x18a   :  { %1995 = vmatprep.mubr.bf16.mxu0 %v5199_v62  ;;  %v5239_v62 = vld [vmem:[%s7363_s0 + $0x37c] ss:$20 sps:$4 sm:$0xff]   ;;  %v6309_v1 = vpop.f32.mrb[47].mxu1 }
 0x191   :  { %1996 = vmatmul.mubr.bf16.gmra.mrb[48].mxu0 %v5202_v3  ;;  %v5243_v3 = vld [vmem:[%s7363_s0 + $0x3a4] ss:$20 sps:$4 sm:$0xff]  }
 0x192   :  { %2003 = vmatprep.mubr.bf16.mxu0 %v5203_v4  ;;  %v6317_v4 = vpop.f32.mrb[48].mxu1 }
 0x193   :  { %v6331_v13 = vpop.f32.mrb[49].mxu1 }
 0x194   :  { %v6333_v14 = vpop.f32.mrb[50].mxu1 }
 0x199   :  { %2004 = vmatmul.mubr.bf16.gmra.mrb[52].mxu0 %v5205_v7  ;;  %v5294_v7 = vld [vmem:[%s7364_s3 + $0x80] ss:$8 sps:$4 sm:$0xff]  }
 0x19a   :  { %2011 = vmatprep.mubr.bf16.mxu0 %v5207_v9  ;;  %v5245_v9 = vld [vmem:[%s7363_s0 + $0x3a0] ss:$20 sps:$4 sm:$0xff]  }
 0x1a1   :  { %2012 = vmatmul.mubr.bf16.gmra.mrb[56].mxu0 %v5210_v11  ;;  %v5296_v11 = vld [vmem:[%s7364_s3 + $0x84] ss:$8 sps:$4 sm:$0xff]  }
 0x1a2   :  { %2019 = vmatprep.mubr.bf16.mxu0 %v5211_v12  ;;  %v5247_v12 = vld [vmem:[%s7363_s0 + $0x3cc] ss:$20 sps:$4 sm:$0xff]   ;;  %2839 = vmatprep.subr.bf16.mxu1 %v5296_v11 }
 0x1a3   :  { %2840 = vmatpush1.bf16.msra.mxu1 %v5294_v7 }
 0x1a4   :  { %2841 = vmatprep.subr.bf16.mxu1 %v5299_v25 }
 0x1a7   :  { %2842 = vmatpush1.bf16.msra.mxu1 %v5297_v23  ;;  %v5302_v23 = vld [vmem:[%s7364_s3 + $0xa4] ss:$8 sps:$4 sm:$0xff]  }
 0x1a8   :  { %2843 = vmatprep.subr.bf16.mxu1 %v5302_v23  ;;  %v5270_v23 = vld [vmem:[%s7363_s0 + $0x4bc] ss:$20 sps:$4 sm:$0xff]  }
 0x1a9   :  { %2020 = vmatmul.mubr.bf16.gmra.mrb[60].mxu0 %v5213_v17  ;;  %v6335_v17 = vpop.f32.mrb[51].mxu1 }
 0x1aa   :  { %2027 = vmatprep.mubr.bf16.mxu0 %v5215_v19  ;;  %v5250_v19 = vld [vmem:[%s7363_s0 + $0x3c8] ss:$20 sps:$4 sm:$0xff]  }
 0x1b1   :  { %2028 = vmatmul.mubr.bf16.gmra.mrb[64].mxu0 %v5218_v21  ;;  %v5251_v21 = vld [vmem:[%s7363_s0 + $0x3f4] ss:$20 sps:$4 sm:$0xff]  }
 0x1b2   :  { %2035 = vmatprep.mubr.bf16.mxu0 %v5219_v22  ;;  %v6343_v22 = vpop.f32.mrb[52].mxu1 }
 0x1b9   :  { %2036 = vmatmul.mubr.bf16.gmra.mrb[68].mxu0 %v5221_v29  ;;  %v5253_v29 = vld [vmem:[%s7363_s0 + $0x3f0] ss:$20 sps:$4 sm:$0xff]  }
 0x1ba   :  { %2043 = vmatprep.mubr.bf16.mxu0 %v5223_v32  ;;  %v5255_v32 = vld [vmem:[%s7363_s0 + $0x41c] ss:$20 sps:$4 sm:$0xff]  }
 0x1c1   :  { %2044 = vmatmul.mubr.bf16.gmra.mrb[72].mxu0 %v5226_v35  ;;  %v6357_v35 = vpop.f32.mrb[53].mxu1 }
 0x1c2   :  { %2051 = vmatprep.mubr.bf16.mxu0 %v5227_v37  ;;  %v6359_v37 = vpop.f32.mrb[54].mxu1 }
 0x1c3   :  { %v6361_v39 = vpop.f32.mrb[55].mxu1 }
 0x1c9   :  { %2052 = vmatmul.mubr.bf16.gmra.mrb[76].mxu0 %v5229_v45  ;;  %v5259_v45 = vld [vmem:[%s7363_s0 + $0x444] ss:$20 sps:$4 sm:$0xff]  }
 0x1ca   :  { %2059 = vmatprep.mubr.bf16.mxu0 %v5231_v48  ;;  %v6369_v48 = vpop.f32.mrb[56].mxu1 }
 0x1d1   :  { %2060 = vmatmul.mubr.bf16.gmra.mrb[80].mxu0 %v5234_v51  ;;  %v5261_v51 = vld [vmem:[%s7363_s0 + $0x440] ss:$20 sps:$4 sm:$0xff]  }
 0x1d2   :  { %2067 = vmatprep.mubr.bf16.mxu0 %v5235_v52 }
 0x1d9   :  { %2068 = vmatmul.mubr.bf16.gmra.mrb[84].mxu0 %v5237_v57  ;;  %v5264_v57 = vld [vmem:[%s7363_s0 + $0x46c] ss:$20 sps:$4 sm:$0xff]  }
 0x1da   :  { %2075 = vmatprep.mubr.bf16.mxu0 %v5239_v62  ;;  %v6377_v62 = vpop.f32.mrb[57].mxu1 }
 0x1db   :  { %v6382_v7 = vpop.f32.mrb[58].mxu1 }
 0x1dc   :  { %v6384_v11 = vpop.f32.mrb[59].mxu1 }
 0x1e1   :  { %2076 = vmatmul.mubr.bf16.gmra.mrb[88].mxu0 %v5242_v2 }
 0x1e2   :  { %2083 = vmatprep.mubr.bf16.mxu0 %v5243_v3 }
 0x1e9   :  { %2084 = vmatmul.mubr.bf16.gmra.mrb[92].mxu0 %v5245_v9 }
 0x1ea   :  { %2091 = vmatprep.mubr.bf16.mxu0 %v5247_v12 }
 0x1f1   :  { %2092 = vmatmul.mubr.bf16.gmra.mrb[96].mxu0 %v5250_v19 }
 0x1f2   :  { %2099 = vmatprep.mubr.bf16.mxu0 %v5251_v21  ;;  %v5300_v21 = vld [vmem:[%s7364_s3 + $0xa0] ss:$8 sps:$4 sm:$0xff]  }
 0x1f3   :  { %2844 = vmatpush1.bf16.msra.mxu1 %v5300_v21 }
 0x1f9   :  { %2100 = vmatmul.mubr.bf16.gmra.mrb[100].mxu0 %v5253_v29 }
 0x1fa   :  { %2107 = vmatprep.mubr.bf16.mxu0 %v5255_v32 }
 0x201   :  { %2108 = vmatmul.mubr.bf16.gmra.mrb[104].mxu0 %v5258_v40 }
 0x202   :  { %2115 = vmatprep.mubr.bf16.mxu0 %v5259_v45 }
 0x204   :  { %v1901_v52 = vpop.f32.mrb[0].mxu0 }
 0x205   :  { %v6380_v2 = vadd.f32 %v6166_v59, %v1901_v52  ;;  %v1903_v3 = vpop.f32.mrb[1].mxu0  ;;  %v5266_v59 = vld [vmem:[%s7363_s0 + $0x468] ss:$20 sps:$4 sm:$0xff]   ;;  %v6407_v52 = vpop.f32.mrb[60].mxu1 }
 0x206   :  { %v1904_v9 = vpop.f32.mrb[2].mxu0  ;;  %v6409_v3 = vpop.f32.mrb[61].mxu1 }
 0x207   :  { %v6387_v12 = vadd.f32 %v6176_v63, %v1904_v9  ;;  %v1906_v19 = vpop.f32.mrb[3].mxu0  ;;  %v5267_v63 = vld [vmem:[%s7363_s0 + $0x494] ss:$20 sps:$4 sm:$0xff]   ;;  %v6417_v21 = vpop.f32.mrb[62].mxu1 }
 0x209   :  { %2116 = vmatmul.mubr.bf16.gmra.mrb[108].mxu0 %v5261_v51 }
 0x20a   :  { %2123 = vmatprep.mubr.bf16.mxu0 %v5264_v57 }
 0x20c   :  { %v1909_v25 = vpop.f32.mrb[4].mxu0 }
 0x20d   :  { %v6402_v29 = vadd.f32 %v6164_v58, %v1909_v25  ;;  %v1911_v32 = vpop.f32.mrb[5].mxu0  ;;  %v5269_v58 = vld [vmem:[%s7363_s0 + $0x490] ss:$20 sps:$4 sm:$0xff]  }
 0x20e   :  { %v1912_v40 = vpop.f32.mrb[6].mxu0  ;;  %v5305_v32 = vld [vmem:[%s7364_s3 + $0xb4] ss:$8 sps:$4 sm:$0xff]  }
 0x20f   :  { %v6405_v45 = vadd.f32 %v6171_v61, %v1912_v40  ;;  %v1914_v51 = vpop.f32.mrb[7].mxu0  ;;  %2845 = vmatprep.subr.bf16.mxu1 %v5305_v32 }
 0x211   :  { %2124 = vmatmul.mubr.bf16.gmra.mrb[112].mxu0 %v5266_v59  ;;  %v6422_v59 = vpop.f32.mrb[63].mxu1 }
 0x212   :  { %2131 = vmatprep.mubr.bf16.mxu0 %v5267_v63 }
 0x214   :  { %v1917_v57 = vpop.f32.mrb[8].mxu0 }
 0x215   :  { %v6412_v9 = vadd.f32 %v6194_v6, %v1917_v57  ;;  %v1919_v19 = vpop.f32.mrb[9].mxu0  ;;  %v5303_v6 = vld [vmem:[%s7364_s3 + $0xb0] ss:$8 sps:$4 sm:$0xff]  }
 0x216   :  { %v1920_v61 = vpop.f32.mrb[10].mxu0  ;;  %2846 = vmatpush1.bf16.msra.mxu1 %v5303_v6 }
 0x217   :  { %v6425_v25 = vadd.f32 %v6204_v10, %v1920_v61  ;;  %v1922_v63 = vpop.f32.mrb[11].mxu0  ;;  %v5272_v10 = vld [vmem:[%s7363_s0 + $0x4b8] ss:$20 sps:$4 sm:$0xff]  }
 0x218   :  { %v6445_v63 = vpop.f32.mrb[64].mxu1 }
 0x219   :  { %2132 = vmatmul.mubr.bf16.gmra.mrb[116].mxu0 %v5269_v58  ;;  %v5275_v58 = vld [vmem:[%s7363_s0 + $0x4e4] ss:$20 sps:$4 sm:$0xff]   ;;  %v6447_v6 = vpop.f32.mrb[65].mxu1 }
 0x21a   :  { %2139 = vmatprep.mubr.bf16.mxu0 %v5270_v23  ;;  %v6455_v0 = vpop.f32.mrb[66].mxu1 }
 0x21c   :  { %v1925_v40 = vpop.f32.mrb[12].mxu0 }
 0x21d   :  { %v6434_v51 = vadd.f32 %v6192_v5, %v1925_v40  ;;  %v1927_v57 = vpop.f32.mrb[13].mxu0 }
 0x21e   :  { %v1928_v19 = vpop.f32.mrb[14].mxu0  ;;  %v5277_v57 = vld [vmem:[%s7363_s0 + $0x4e0] ss:$20 sps:$4 sm:$0xff]  }
 0x21f   :  { %v6443_v61 = vadd.f32 %v6199_v8, %v1928_v19  ;;  %v1930_v23 = vpop.f32.mrb[15].mxu0  ;;  %v6460_v19 = vpop.f32.mrb[67].mxu1 }
 0x221   :  { %2140 = vmatmul.mubr.bf16.gmra.mrb[120].mxu0 %v5272_v10  ;;  %v5278_v10 = vld [vmem:[%s7363_s0 + $0x50c] ss:$20 sps:$4 sm:$0xff]  }
 0x222   :  { %2147 = vmatprep.mubr.bf16.mxu0 %v5275_v58 }
 0x224   :  { %v1933_v5 = vpop.f32.mrb[16].mxu0 }
 0x225   :  { %v6450_v32 = vadd.f32 %v6222_v16, %v1933_v5  ;;  %v1935_v40 = vpop.f32.mrb[17].mxu0  ;;  %v5306_v16 = vld [vmem:[%s7364_s3 + $0xc0] ss:$8 sps:$4 sm:$0xff]   ;;  %v5308_v5 = vld [vmem:[%s7364_s3 + $0xc4] ss:$8 sps:$4 sm:$0xff]  }
 0x226   :  { %v1936_v8 = vpop.f32.mrb[18].mxu0  ;;  %2847 = vmatprep.subr.bf16.mxu1 %v5308_v5  ;;  %v6483_v5 = vpop.f32.mrb[68].mxu1 }
 0x227   :  { %v6463_v58 = vadd.f32 %v6232_v20, %v1936_v8  ;;  %v1938_v23 = vpop.f32.mrb[19].mxu0  ;;  %2848 = vmatpush1.bf16.msra.mxu1 %v5306_v16  ;;  %v5280_v20 = vld [vmem:[%s7363_s0 + $0x508] ss:$20 sps:$4 sm:$0xff]   ;;  %v6485_v16 = vpop.f32.mrb[69].mxu1 }
 0x228   :  { %v5283_v8 = vld [vmem:[%s7363_s0 + $0x534] ss:$20 sps:$4 sm:$0xff]   ;;  %v6493_v46 = vpop.f32.mrb[70].mxu1 }
 0x229   :  { %2148 = vmatmul.mubr.bf16.gmra.mrb[124].mxu0 %v5277_v57 }
 0x22a   :  { %2155 = vmatprep.mubr.bf16.mxu0 %v5278_v10 }
 0x22c   :  { %v1941_v40 = vpop.f32.mrb[20].mxu0 }
 0x22d   :  { %v6472_v56 = vadd.f32 %v6219_v15, %v1941_v40  ;;  %v1943_v53 = vpop.f32.mrb[21].mxu0 }
 0x22e   :  { %v1944_v57 = vpop.f32.mrb[22].mxu0 }
 0x22f   :  { %v6481_v23 = vadd.f32 %v6227_v18, %v1944_v57  ;;  %v1946_v10 = vpop.f32.mrb[23].mxu0  ;;  %v6498_v57 = vpop.f32.mrb[71].mxu1 }
 0x231   :  { %2156 = vmatmul.mubr.bf16.gmra.mrb[128].mxu0 %v5280_v20  ;;  %v5286_v20 = vld [vmem:[%s7363_s0 + $0x55c] ss:$20 sps:$4 sm:$0xff]  }
 0x232   :  { %2163 = vmatprep.mubr.bf16.mxu0 %v5283_v8 }
 0x234   :  { %v1949_v15 = vpop.f32.mrb[24].mxu0 }
 0x235   :  { %v6488_v53 = vadd.f32 %v6250_v27, %v1949_v15  ;;  %v1951_v40 = vpop.f32.mrb[25].mxu0  ;;  %v5309_v27 = vld [vmem:[%s7364_s3 + $0xd0] ss:$8 sps:$4 sm:$0xff]   ;;  %v5311_v15 = vld [vmem:[%s7364_s3 + $0xd4] ss:$8 sps:$4 sm:$0xff]  }
 0x236   :  { %v1952_v18 = vpop.f32.mrb[26].mxu0  ;;  %2849 = vmatprep.subr.bf16.mxu1 %v5311_v15  ;;  %v6521_v15 = vpop.f32.mrb[72].mxu1 }
 0x237   :  { %v6501_v8 = vadd.f32 %v6260_v33, %v1952_v18  ;;  %v1954_v10 = vpop.f32.mrb[27].mxu0  ;;  %2850 = vmatpush1.bf16.msra.mxu1 %v5309_v27  ;;  %v5291_v18 = vld [vmem:[%s7363_s0 + $0x584] ss:$20 sps:$4 sm:$0xff]   ;;  %v6523_v27 = vpop.f32.mrb[73].mxu1 }
 0x238   :  { %v6531_v36 = vpop.f32.mrb[74].mxu1 }
 0x239   :  { %2164 = vmatmul.mubr.bf16.gmra.mrb[132].mxu0 %v5285_v50  ;;  %v5288_v50 = vld [vmem:[%s7363_s0 + $0x558] ss:$20 sps:$4 sm:$0xff]  }
 0x23a   :  { %2171 = vmatprep.mubr.bf16.mxu0 %v5286_v20 }
 0x23c   :  { %v1957_v40 = vpop.f32.mrb[28].mxu0 }
 0x23d   :  { %v6510_v44 = vadd.f32 %v6247_v26, %v1957_v40  ;;  %v1959_v41 = vpop.f32.mrb[29].mxu0 }
 0x23e   :  { %v1960_v33 = vpop.f32.mrb[30].mxu0 }
 0x23f   :  { %v6519_v10 = vadd.f32 %v6255_v30, %v1960_v33  ;;  %v1962_v20 = vpop.f32.mrb[31].mxu0  ;;  %v6533_v33 = vpop.f32.mrb[75].mxu1 }
 0x241   :  { %2172 = vmatmul.mubr.bf16.gmra.mrb[136].mxu0 %v5288_v50 }
 0x242   :  { %2179 = vmatprep.mubr.bf16.mxu0 %v5291_v18 }
 0x244   :  { %v1965_v26 = vpop.f32.mrb[32].mxu0 }
 0x245   :  { %v6526_v41 = vadd.f32 %v6279_v43, %v1965_v26  ;;  %v1967_v40 = vpop.f32.mrb[33].mxu0 }
 0x246   :  { %v1968_v30 = vpop.f32.mrb[34].mxu0 }
 0x247   :  { %v6536_v50 = vadd.f32 %v6289_v49, %v1968_v30  ;;  %v1970_v18 = vpop.f32.mrb[35].mxu0  ;;  %v5312_v49 = vld [vmem:[%s7364_s3 + $0xe0] ss:$8 sps:$4 sm:$0xff]   ;;  %v6554_v30 = vpop.f32.mrb[76].mxu1 }
 0x248   :  { %7387 = vst [vmem:[#allocation14_spill] sm:$0xff] %v6554_v30 }
 0x249   :  { %2180 = vmatmul.mubr.bf16.gmra.mrb[140].mxu0 %v5293_v38  ;;  %v5314_v38 = vld [vmem:[%s7364_s3 + $0xe4] ss:$8 sps:$4 sm:$0xff]  }
 0x24a   :  { %2851 = vmatprep.subr.bf16.mxu1 %v5314_v38 }
 0x24b   :  { %2852 = vmatpush1.bf16.msra.mxu1 %v5312_v49 }
 0x24c   :  { %v1973_v20 = vpop.f32.mrb[36].mxu0 }
 0x24d   :  { %v6539_v34 = vadd.f32 %v6275_v42, %v1973_v20  ;;  %v1975_v43 = vpop.f32.mrb[37].mxu0  ;;  %v6556_v20 = vpop.f32.mrb[77].mxu1 }
 0x24e   :  { %v1976_v26 = vpop.f32.mrb[38].mxu0  ;;  %7388 = vst [vmem:[#allocation15_spill] sm:$0xff] %v6556_v20  ;;  %v6561_v43 = vpop.f32.mrb[78].mxu1 }
 0x24f   :  { %v6544_v31 = vadd.f32 %v6284_v47, %v1976_v26  ;;  %v1978_v28 = vpop.f32.mrb[39].mxu0  ;;  %7389 = vst [vmem:[#allocation16_spill] sm:$0xff] %v6561_v43  ;;  %v6563_v40 = vpop.f32.mrb[79].mxu1 }
 0x250   :  { %7390 = vst [vmem:[#allocation17_spill] sm:$0xff] %v6563_v40  ;;  %v6580_v20 = vpop.f32.mrb[80].mxu1 }
 0x251   :  { %7391 = vst [vmem:[#allocation18_spill] sm:$0xff] %v6580_v20 }
 0x254   :  { %v1981_v18 = vpop.f32.mrb[40].mxu0 }
 0x255   :  { %v6559_v28 = vadd.f32 %v6299_v55, %v1981_v18  ;;  %v1983_v47 = vpop.f32.mrb[41].mxu0 }
 0x256   :  { %v1984_v26 = vpop.f32.mrb[42].mxu0 }
 0x257   :  { %v6568_v38 = vadd.f32 %v6309_v1, %v1984_v26  ;;  %v1986_v42 = vpop.f32.mrb[43].mxu0  ;;  %v5315_v1 = vld [vmem:[%s7364_s3 + $0xf0] ss:$8 sps:$4 sm:$0xff]  }
 0x258   :  { %v6584_v42 = vpop.f32.mrb[81].mxu1 }
 0x259   :  { %7392 = vst [vmem:[#allocation19_spill] sm:$0xff] %v6584_v42  ;;  %v6586_v26 = vpop.f32.mrb[82].mxu1 }
 0x25a   :  { %7393 = vst [vmem:[#allocation20_spill] sm:$0xff] %v6586_v26  ;;  %v5317_v26 = vld [vmem:[%s7364_s3 + $0xf4] ss:$8 sps:$4 sm:$0xff]  }
 0x25b   :  { %2853 = vmatprep.subr.bf16.mxu1 %v5317_v26 }
 0x25c   :  { %v1989_v30 = vpop.f32.mrb[44].mxu0  ;;  %2854 = vmatpush1.bf16.msra.mxu1 %v5315_v1 }
 0x25d   :  { %v6573_v55 = vadd.f32 %v6297_v54, %v1989_v30  ;;  %v1991_v18 = vpop.f32.mrb[45].mxu0  ;;  %v6588_v54 = vpop.f32.mrb[83].mxu1 }
 0x25e   :  { %v1992_v47 = vpop.f32.mrb[46].mxu0  ;;  %7394 = vst [vmem:[#allocation21_spill] sm:$0xff] %v6588_v54 }
 0x25f   :  { %v6578_v40 = vadd.f32 %v6304_v60, %v1992_v47  ;;  %v1994_v24 = vpop.f32.mrb[47].mxu0 }
 0x264   :  { %v1997_v30 = vpop.f32.mrb[48].mxu0 }
 0x265   :  { %v6591_v18 = vadd.f32 %v6331_v13, %v1997_v30  ;;  %v1999_v43 = vpop.f32.mrb[49].mxu0  ;;  %v6622_v13 = vpop.f32.mrb[84].mxu1 }
 0x266   :  { %v2000_v49 = vpop.f32.mrb[50].mxu0  ;;  %7395 = vst [vmem:[#allocation22_spill] sm:$0xff] %v6622_v13 }
 0x267   :  { %v6596_v60 = vadd.f32 %v6335_v17, %v2000_v49  ;;  %v2002_v47 = vpop.f32.mrb[51].mxu0 }
 0x268   :  { %v5320_v47 = vld [vmem:[%s7364_s3 + $0x4] ss:$8 sps:$4 sm:$0xff]  }
 0x269   :  { %2962 = vmatprep.subr.bf16.mxu1 %v5320_v47 }
 0x26c   :  { %v2005_v43 = vpop.f32.mrb[52].mxu0 }
 0x26d   :  { %v6607_v30 = vadd.f32 %v6317_v4, %v2005_v43  ;;  %v2007_v17 = vpop.f32.mrb[53].mxu0 }
 0x26e   :  { %v2008_v49 = vpop.f32.mrb[54].mxu0 }
 0x26f   :  { %v6615_v20 = vadd.f32 %v6333_v14, %v2008_v49  ;;  %v2010_v54 = vpop.f32.mrb[55].mxu0 }
 0x270   :  { %v6629_v54 = vpop.f32.mrb[85].mxu1 }
 0x271   :  { %7396 = vst [vmem:[#allocation23_spill] sm:$0xff] %v6629_v54  ;;  %v6631_v49 = vpop.f32.mrb[86].mxu1 }
 0x272   :  { %7397 = vst [vmem:[#allocation24_spill] sm:$0xff] %v6631_v49 }
 0x274   :  { %v2013_v26 = vpop.f32.mrb[56].mxu0 }
 0x275   :  { %v6620_v4 = vadd.f32 %v6357_v35, %v2013_v26  ;;  %v2015_v43 = vpop.f32.mrb[57].mxu0  ;;  %v6635_v35 = vpop.f32.mrb[87].mxu1 }
 0x276   :  { %v2016_v17 = vpop.f32.mrb[58].mxu0  ;;  %7398 = vst [vmem:[#allocation25_spill] sm:$0xff] %v6635_v35 }
 0x277   :  { %v6627_v24 = vadd.f32 %v6361_v39, %v2016_v17  ;;  %v2018_v14 = vpop.f32.mrb[59].mxu0 }
 0x27c   :  { %v2021_v26 = vpop.f32.mrb[60].mxu0 }
 0x27d   :  { %v6638_v43 = vadd.f32 %v6343_v22, %v2021_v26  ;;  %v2023_v1 = vpop.f32.mrb[61].mxu0  ;;  %v6650_v22 = vpop.f32.mrb[88].mxu1 }
 0x27e   :  { %v2024_v13 = vpop.f32.mrb[62].mxu0  ;;  %7399 = vst [vmem:[#allocation26_spill] sm:$0xff] %v6650_v22  ;;  %v7405_v1 = vmax.f32 %v6387_v12, %v6544_v31  ;;  %v7407_v31 = vmax.f32 %v6405_v45, %v6568_v38 }
 0x27f   :  { %v6643_v17 = vadd.f32 %v6359_v37, %v2024_v13  ;;  %v2026_v14 = vpop.f32.mrb[63].mxu0  ;;  %v6657_v13 = vpop.f32.mrb[89].mxu1 }
 0x280   :  { %7401 = vst [vmem:[#allocation28_spill] sm:$0xff] %v6657_v13  ;;  %v6659_v14 = vpop.f32.mrb[90].mxu1 }
 0x281   :  { %7402 = vst [vmem:[#allocation29_spill] sm:$0xff] %v6659_v14 }
 0x284   :  { %v2029_v49 = vpop.f32.mrb[64].mxu0 }
 0x285   :  { %v6648_v47 = vadd.f32 %v6377_v62, %v2029_v49  ;;  %v2031_v35 = vpop.f32.mrb[65].mxu0  ;;  %v6663_v62 = vpop.f32.mrb[91].mxu1 }
 0x286   :  { %v2032_v54 = vpop.f32.mrb[66].mxu0  ;;  %7403 = vst [vmem:[#allocation30_spill] sm:$0xff] %v6663_v62 }
 0x287   :  { %v6655_v26 = vadd.f32 %v6384_v11, %v2032_v54  ;;  %v2034_v37 = vpop.f32.mrb[67].mxu0 }
 0x289   :  { %7400 = vst [vmem:[#allocation27_spill] sm:$0xff] %v6655_v26  ;;  %v6676_v26 = vpop.f32.mrb[92].mxu1 }
 0x28c   :  { %v2037_v49 = vpop.f32.mrb[68].mxu0 }
 0x28d   :  { %v6666_v35 = vadd.f32 %v6369_v48, %v2037_v49  ;;  %v2039_v39 = vpop.f32.mrb[69].mxu0  ;;  %v7404_v48 = vmax.f32 %v6380_v2, %v6539_v34 }
 0x28e   :  { %v2040_v22 = vpop.f32.mrb[70].mxu0 }
 0x28f   :  { %v6671_v54 = vadd.f32 %v6382_v7, %v2040_v22  ;;  %v2042_v37 = vpop.f32.mrb[71].mxu0  ;;  %v6684_v22 = vpop.f32.mrb[93].mxu1 }
 0x290   :  { %v6686_v37 = vpop.f32.mrb[94].mxu1 }
 0x294   :  { %v2045_v14 = vpop.f32.mrb[72].mxu0 }
 0x295   :  { %v2367_v42 = vadd.f32 %v6409_v3, %v2045_v14  ;;  %v2047_v62 = vpop.f32.mrb[73].mxu0  ;;  %v6693_v14 = vpop.f32.mrb[95].mxu1 }
 0x296   :  { %v2048_v13 = vpop.f32.mrb[74].mxu0 }
 0x297   :  { %v6681_v39 = vmax.f32 %v7404_v48, %v2367_v42  ;;  %v2370_v49 = vadd.f32 %v6422_v59, %v2048_v13  ;;  %v2050_v7 = vpop.f32.mrb[75].mxu0  ;;  %v7406_v59 = vmax.f32 %v6402_v29, %v6559_v28 }
 0x299   :  { %v6691_v3 = vmax.f32 %v7405_v1, %v2370_v49 }
 0x29c   :  { %v2053_v62 = vpop.f32.mrb[76].mxu0 }
 0x29d   :  { %v2375_v11 = vadd.f32 %v6407_v52, %v2053_v62  ;;  %v2055_v34 = vpop.f32.mrb[77].mxu0  ;;  %v7408_v62 = vmax.f32 %v6412_v9, %v6573_v55 }
 0x29e   :  { %v2056_v2 = vpop.f32.mrb[78].mxu0 }
 0x29f   :  { %v6699_v42 = vmax.f32 %v7406_v59, %v2375_v11  ;;  %v2378_v13 = vadd.f32 %v6417_v21, %v2056_v2  ;;  %v2058_v48 = vpop.f32.mrb[79].mxu0  ;;  %v7409_v21 = vmax.f32 %v6425_v25, %v6578_v40  ;;  %v7410_v59 = vmax.f32 %v6434_v51, %v6591_v18 }
 0x2a1   :  { %v6705_v12 = vmax.f32 %v7407_v31, %v2378_v13 }
 0x2a4   :  { %v2061_v1 = vpop.f32.mrb[80].mxu0 }
 0x2a5   :  { %v2383_v49 = vadd.f32 %v6447_v6, %v2061_v1  ;;  %v2063_v7 = vpop.f32.mrb[81].mxu0  ;;  %v7412_v1 = vmax.f32 %v6450_v32, %v6607_v30 }
 0x2a6   :  { %v2064_v52 = vpop.f32.mrb[82].mxu0 }
 0x2a7   :  { %v6711_v34 = vmax.f32 %v7408_v62, %v2383_v49  ;;  %v2386_v29 = vadd.f32 %v6460_v19, %v2064_v52  ;;  %v2066_v28 = vpop.f32.mrb[83].mxu0  ;;  %v7411_v19 = vmax.f32 %v6443_v61, %v6596_v60  ;;  %v7414_v62 = vmax.f32 %v6472_v56, %v6620_v4 }
 0x2a9   :  { %v6717_v11 = vmax.f32 %v7409_v21, %v2386_v29 }
 0x2ac   :  { %v2069_v45 = vpop.f32.mrb[84].mxu0 }
 0x2ad   :  { %v2391_v38 = vadd.f32 %v6445_v63, %v2069_v45  ;;  %v2071_v2 = vpop.f32.mrb[85].mxu0  ;;  %v7416_v45 = vmax.f32 %v6488_v53, %v6638_v43 }
 0x2ae   :  { %v2072_v6 = vpop.f32.mrb[86].mxu0 }
 0x2af   :  { %v6723_v13 = vmax.f32 %v7410_v59, %v2391_v38  ;;  %v2394_v9 = vadd.f32 %v6455_v0, %v2072_v6  ;;  %v2074_v55 = vpop.f32.mrb[87].mxu0  ;;  %v7413_v0 = vmax.f32 %v6463_v58, %v6615_v20  ;;  %v7418_v59 = vmax.f32 %v6510_v44, %v6648_v47  ;;  %v7423_v44 = vld [vmem:[#allocation17_spill] sm:$0xff] }
 0x2b1   :  { %v6729_v48 = vmax.f32 %v7411_v19, %v2394_v9 }
 0x2b4   :  { %v2077_v25 = vpop.f32.mrb[88].mxu0 }
 0x2b5   :  { %v2399_v40 = vadd.f32 %v6485_v16, %v2077_v25  ;;  %v2079_v31 = vpop.f32.mrb[89].mxu0 }
 0x2b6   :  { %v2080_v63 = vpop.f32.mrb[90].mxu0  ;;  %v7422_v31 = vmax.f32 %v6526_v41, %v6666_v35 }
 0x2b7   :  { %v6735_v49 = vmax.f32 %v7412_v1, %v2399_v40  ;;  %v2402_v51 = vadd.f32 %v6498_v57, %v2080_v63  ;;  %v2082_v18 = vpop.f32.mrb[91].mxu0  ;;  %v7415_v57 = vmax.f32 %v6481_v23, %v6627_v24 }
 0x2b8   :  { %v7425_v18 = vld [vmem:[#allocation14_spill] sm:$0xff] }
 0x2b9   :  { %v6741_v7 = vmax.f32 %v7413_v0, %v2402_v51 }
 0x2bc   :  { %v2085_v61 = vpop.f32.mrb[92].mxu0 }
 0x2bd   :  { %v2407_v60 = vadd.f32 %v6483_v5, %v2085_v61  ;;  %v2087_v52 = vpop.f32.mrb[93].mxu0 }
 0x2be   :  { %v2088_v16 = vpop.f32.mrb[94].mxu0  ;;  %v7426_v52 = vld [vmem:[#allocation16_spill] sm:$0xff] }
 0x2bf   :  { %v6747_v29 = vmax.f32 %v7414_v62, %v2407_v60  ;;  %v2410_v32 = vadd.f32 %v6493_v46, %v2088_v16  ;;  %v2090_v30 = vpop.f32.mrb[95].mxu0  ;;  %v7417_v46 = vmax.f32 %v6501_v8, %v6643_v17  ;;  %v7421_v17 = vld [vmem:[#allocation15_spill] sm:$0xff]  ;;  %v6795_v60 = vld [vmem:[%s7365_s2] ss:$0 sm:$0xff] }
 0x2c1   :  { %v6753_v28 = vmax.f32 %v7415_v57, %v2410_v32 }
 0x2c4   :  { %v2093_v58 = vpop.f32.mrb[96].mxu0 }
 0x2c5   :  { %v2415_v20 = vadd.f32 %v6523_v27, %v2093_v58  ;;  %v2095_v21 = vpop.f32.mrb[97].mxu0 }
 0x2c6   :  { %v2096_v5 = vpop.f32.mrb[98].mxu0 }
 0x2c7   :  { %v6759_v38 = vmax.f32 %v7416_v45, %v2415_v20  ;;  %v2418_v56 = vadd.f32 %v6533_v33, %v2096_v5  ;;  %v2098_v4 = vpop.f32.mrb[99].mxu0  ;;  %v7419_v33 = vld [vmem:[#allocation27_spill] sm:$0xff] }
 0x2c8   :  { %v7420_v55 = vmax.f32 %v6519_v10, %v7419_v33  ;;  %v7427_v20 = vld [vmem:[#allocation19_spill] sm:$0xff]  ;;  %v7428_v4 = vld [vmem:[#allocation21_spill] sm:$0xff] }
 0x2c9   :  { %v6765_v2 = vmax.f32 %v7417_v46, %v2418_v56 }
 0x2cc   :  { %v2101_v23 = vpop.f32.mrb[100].mxu0 }
 0x2cd   :  { %v2423_v24 = vadd.f32 %v6521_v15, %v2101_v23  ;;  %v2103_v6 = vpop.f32.mrb[101].mxu0 }
 0x2ce   :  { %v2104_v27 = vpop.f32.mrb[102].mxu0 }
 0x2cf   :  { %v6771_v9 = vmax.f32 %v7418_v59, %v2423_v24  ;;  %v2426_v53 = vadd.f32 %v6531_v36, %v2104_v27  ;;  %v2106_v43 = vpop.f32.mrb[103].mxu0  ;;  %v7424_v36 = vmax.f32 %v6536_v50, %v6671_v54 }
 0x2d0   :  { %v7429_v43 = vld [vmem:[#allocation18_spill] sm:$0xff] }
 0x2d1   :  { %v6777_v19 = vmax.f32 %v7420_v55, %v2426_v53 }
 0x2d4   :  { %v2109_v8 = vpop.f32.mrb[104].mxu0 }
 0x2d5   :  { %v2431_v25 = vadd.f32 %v7421_v17, %v2109_v8  ;;  %v2111_v40 = vpop.f32.mrb[105].mxu0 }
 0x2d6   :  { %v2112_v15 = vpop.f32.mrb[106].mxu0  ;;  %v7430_v40 = vld [vmem:[#allocation20_spill] sm:$0xff] }
 0x2d7   :  { %v6783_v63 = vmax.f32 %v7422_v31, %v2431_v25  ;;  %v2434_v47 = vadd.f32 %v7423_v44, %v2112_v15  ;;  %v2114_v1 = vpop.f32.mrb[107].mxu0 }
 0x2d8   :  { %v5321_v1 = vld [vmem:[%s7364_s3 + $0x10] ss:$8 sps:$4 sm:$0xff]  }
 0x2d9   :  { %v6789_v51 = vmax.f32 %v7424_v36, %v2434_v47  ;;  %v7431_v36 = vmov 0  }
 0x2dc   :  { %v2117_v10 = vpop.f32.mrb[108].mxu0 }
 0x2dd   :  { %v2439_v0 = vadd.f32 %v7425_v18, %v2117_v10  ;;  %v2119_v61 = vpop.f32.mrb[109].mxu0  ;;  %v5326_v10 = vld [vmem:[%s7364_s3 + $0x24] ss:$8 sps:$4 sm:$0xff]  }
 0x2de   :  { %v2120_v41 = vpop.f32.mrb[110].mxu0 }
 0x2df   :  { %v2511_v35 = vmax.f32 %v6681_v39, %v2439_v0  ;;  %v2442_v16 = vadd.f32 %v7426_v52, %v2120_v41  ;;  %v2122_v62 = vpop.f32.mrb[111].mxu0  ;;  %v7432_v41 = vld [vmem:[#allocation2_spill] sm:$0xff] }
 0x2e1   :  { %v2570_v32 = vadd.f32 %v6795_v60, %v2511_v35  ;;  %v2514_v50 = vmax.f32 %v6691_v3, %v2442_v16  ;;  %v5324_v16 = vld [vmem:[%s7364_s3 + $0x20] ss:$8 sps:$4 sm:$0xff]  }
 0x2e3   :  { %v2571_v54 = vadd.f32 %v6795_v60, %v2514_v50  ;;  %v2588_v57 = vmax.f32 %v2570_v32, 0.0  ;;  %v7433_v32 = vld [vmem:[#allocation3_spill] sm:$0xff] }
 0x2e4   :  { %v2125_v30 = vpop.f32.mrb[112].mxu0 }
 0x2e5   :  { %v2589_v58 = vmax.f32 %v2571_v54, 0.0  ;;  %v2447_v21 = vadd.f32 %v7427_v20, %v2125_v30  ;;  %v2127_v5 = vpop.f32.mrb[113].mxu0  ;;  %v7434_v54 = vld [vmem:[#allocation23_spill] sm:$0xff] }
 0x2e6   :  { %v2128_v45 = vpop.f32.mrb[114].mxu0 }
 0x2e7   :  { %v6803_v56 = vpack.c.bf16 %v2589_v58, %v2588_v57  ;;  %v2517_v39 = vmax.f32 %v6699_v42, %v2447_v21  ;;  %v2450_v46 = vadd.f32 %v7428_v4, %v2128_v45  ;;  %v2130_v23 = vpop.f32.mrb[115].mxu0  ;;  %v5318_v42 = vld [vmem:[%s7364_s3] ss:$8 sps:$4 sm:$0xff]   ;;  %v5329_v58 = vld [vmem:[%s7364_s3 + $0x34] ss:$8 sps:$4 sm:$0xff]  }
 0x2e8   :  { %v7435_v21 = vld [vmem:[#allocation25_spill] sm:$0xff] }
 0x2e9   :  { %v2572_v24 = vadd.f32 %v6795_v60, %v2517_v39  ;;  %v2520_v3 = vmax.f32 %v6705_v12, %v2450_v46  ;;  %v5323_v12 = vld [vmem:[%s7364_s3 + $0x14] ss:$8 sps:$4 sm:$0xff]   ;;  %v5327_v45 = vld [vmem:[%s7364_s3 + $0x30] ss:$8 sps:$4 sm:$0xff]   ;;  %v5332_v46 = vld [vmem:[%s7364_s3 + $0x44] ss:$8 sps:$4 sm:$0xff]  }
 0x2eb   :  { %v2573_v6 = vadd.f32 %v6795_v60, %v2520_v3  ;;  %v2590_v59 = vmax.f32 %v2572_v24, 0.0 }
 0x2ec   :  { %v2133_v27 = vpop.f32.mrb[116].mxu0 }
 0x2ed   :  { %v2591_v53 = vmax.f32 %v2573_v6, 0.0  ;;  %v2455_v33 = vadd.f32 %v7429_v43, %v2133_v27  ;;  %v2135_v55 = vpop.f32.mrb[117].mxu0 }
 0x2ee   :  { %v2136_v8 = vpop.f32.mrb[118].mxu0  ;;  %v7438_v55 = vld [vmem:[#allocation5_spill] sm:$0xff] }
 0x2ef   :  { %v2607_v17 = vpack.c.bf16 %v2591_v53, %v2590_v59  ;;  %v2523_v25 = vmax.f32 %v6711_v34, %v2455_v33  ;;  %v2458_v15 = vadd.f32 %v7430_v40, %v2136_v8  ;;  %v2138_v31 = vpop.f32.mrb[119].mxu0  ;;  %v5330_v59 = vld [vmem:[%s7364_s3 + $0x40] ss:$8 sps:$4 sm:$0xff]  }
 0x2f1   :  { %v2574_v44 = vadd.f32 %v6795_v60, %v2523_v25  ;;  %v2526_v47 = vmax.f32 %v6717_v11, %v2458_v15  ;;  %2872 = vmatmul.mubr.bf16.vlgmr.msra.gmra.mrb[96].mxu1 %v2607_v17  ;;  %v5335_v17 = vld [vmem:[%s7364_s3 + $0x54] ss:$8 sps:$4 sm:$0xff]  }
 0x2f2   :  { %2963 = vmatpush1.bf16.msra.mxu1 %v5318_v42  ;;  %2994 = vmatprep.mubr.bf16.mxu1 %v7431_v36  ;;  %v7439_v15 = vld [vmem:[#allocation24_spill] sm:$0xff] }
 0x2f3   :  { %v2575_v34 = vadd.f32 %v6795_v60, %v2526_v47  ;;  %2964 = vmatprep.subr.bf16.mxu1 %v5323_v12  ;;  %v2592_v0 = vmax.f32 %v2574_v44, 0.0  ;;  %v5333_v12 = vld [vmem:[%s7364_s3 + $0x50] ss:$8 sps:$4 sm:$0xff]  }
 0x2f4   :  { %v2141_v18 = vpop.f32.mrb[120].mxu0 }
 0x2f5   :  { %v2593_v61 = vmax.f32 %v2575_v34, 0.0  ;;  %v2142_v11 = vadd.f32 %v2141_v18, %v7432_v41  ;;  %v2143_v35 = vpop.f32.mrb[121].mxu0  ;;  %v5336_v41 = vld [vmem:[%s7364_s3 + $0x60] ss:$8 sps:$4 sm:$0xff]  }
 0x2f6   :  { %2965 = vmatpush1.bf16.msra.mxu1 %v5321_v1  ;;  %v2144_v52 = vpop.f32.mrb[122].mxu0  ;;  %v5338_v1 = vld [vmem:[%s7364_s3 + $0x64] ss:$8 sps:$4 sm:$0xff]  }
 0x2f7   :  { %v6833_v62 = vpack.c.bf16 %v2593_v61, %v2592_v0  ;;  %v2145_v50 = vadd.f32 %v2144_v52, %v7433_v32  ;;  %v2463_v30 = vadd.f32 %v7434_v54, %v2142_v11  ;;  %2966 = vmatprep.subr.bf16.mxu1 %v5326_v10  ;;  %v2146_v57 = vpop.f32.mrb[123].mxu0  ;;  %v5341_v54 = vld [vmem:[%s7364_s3 + $0x74] ss:$8 sps:$4 sm:$0xff]  }
 0x2f8   :  { %v7443_v57 = vld [vmem:[#allocation30_spill] sm:$0xff] }
 0x2f9   :  { %v2529_v20 = vmax.f32 %v6723_v13, %v2463_v30  ;;  %v2466_v5 = vadd.f32 %v7435_v21, %v2145_v50  ;;  %v7436_v13 = vld [vmem:[#allocation4_spill] sm:$0xff] }
 0x2fa   :  { %2967 = vmatpush1.bf16.msra.mxu1 %v5324_v16  ;;  %v7442_v16 = vld [vmem:[#allocation28_spill] sm:$0xff] }
 0x2fb   :  { %v2576_v39 = vadd.f32 %v6795_v60, %v2529_v20  ;;  %v2532_v4 = vmax.f32 %v6729_v48, %v2466_v5  ;;  %2968 = vmatprep.subr.bf16.mxu1 %v5329_v58  ;;  %v7437_v48 = vld [vmem:[#allocation22_spill] sm:$0xff]  ;;  %v5339_v21 = vld [vmem:[%s7364_s3 + $0x70] ss:$8 sps:$4 sm:$0xff]  }
 0x2fc   :  { %v2149_v23 = vpop.f32.mrb[124].mxu0 }
 0x2fd   :  { %v2577_v24 = vadd.f32 %v6795_v60, %v2532_v4  ;;  %v2150_v3 = vadd.f32 %v2149_v23, %v7436_v13  ;;  %v2151_v6 = vpop.f32.mrb[125].mxu0  ;;  %v2594_v53 = vmax.f32 %v2576_v39, 0.0  ;;  %v5344_v39 = vld [vmem:[%s7364_s3 + $0x104] ss:$8 sps:$4 sm:$0xff]  }
 0x2fe   :  { %2969 = vmatpush1.bf16.msra.mxu1 %v5327_v45  ;;  %v2152_v27 = vpop.f32.mrb[126].mxu0 }
 0x2ff   :  { %v2595_v43 = vmax.f32 %v2577_v24, 0.0  ;;  %v2471_v33 = vadd.f32 %v7437_v48, %v2150_v3  ;;  %v2153_v8 = vadd.f32 %v2152_v27, %v7438_v55  ;;  %2970 = vmatprep.subr.bf16.mxu1 %v5332_v46  ;;  %v2154_v42 = vpop.f32.mrb[127].mxu0  ;;  %v7444_v46 = vld [vmem:[#allocation8_spill] sm:$0xff]  ;;  %v5342_v3 = vld [vmem:[%s7364_s3 + $0x100] ss:$8 sps:$4 sm:$0xff]  }
 0x300   :  { %v7447_v42 = vld [vmem:[#allocation29_spill] sm:$0xff] }
 0x301   :  { %v6860_v25 = vpack.c.bf16 %v2595_v43, %v2594_v53  ;;  %v2535_v40 = vmax.f32 %v6735_v49, %v2471_v33  ;;  %v2474_v31 = vadd.f32 %v7439_v15, %v2153_v8  ;;  %v7440_v49 = vld [vmem:[#allocation6_spill] sm:$0xff]  ;;  %v7446_v53 = vld [vmem:[#allocation9_spill] sm:$0xff] }
 0x302   :  { %2971 = vmatpush1.bf16.msra.mxu1 %v5330_v59  ;;  %v5347_v33 = vld [vmem:[%s7364_s3 + $0x114] ss:$8 sps:$4 sm:$0xff]  }
 0x303   :  { %v2578_v44 = vadd.f32 %v6795_v60, %v2535_v40  ;;  %v2538_v47 = vmax.f32 %v6741_v7, %v2474_v31  ;;  %2972 = vmatprep.subr.bf16.mxu1 %v5335_v17  ;;  %v7441_v7 = vld [vmem:[#allocation7_spill] sm:$0xff]  ;;  %v5345_v40 = vld [vmem:[%s7364_s3 + $0x110] ss:$8 sps:$4 sm:$0xff]  }
 0x304   :  { %v2157_v34 = vpop.f32.mrb[128].mxu0 }
 0x305   :  { %v2579_v10 = vadd.f32 %v6795_v60, %v2538_v47  ;;  %v2158_v18 = vadd.f32 %v2157_v34, %v7440_v49  ;;  %v2159_v0 = vpop.f32.mrb[129].mxu0  ;;  %v2596_v11 = vmax.f32 %v2578_v44, 0.0 }
 0x306   :  { %2973 = vmatpush1.bf16.msra.mxu1 %v5333_v12  ;;  %v2160_v61 = vpop.f32.mrb[130].mxu0 }
 0x307   :  { %v2597_v35 = vmax.f32 %v2579_v10, 0.0  ;;  %v2161_v52 = vadd.f32 %v2160_v61, %v7441_v7  ;;  %v2479_v32 = vadd.f32 %v7442_v16, %v2158_v18  ;;  %2974 = vmatprep.subr.bf16.mxu1 %v5338_v1  ;;  %v2162_v50 = vpop.f32.mrb[131].mxu0  ;;  %v5348_v10 = vld [vmem:[%s7364_s3 + $0x120] ss:$8 sps:$4 sm:$0xff]   ;;  %v5351_v16 = vld [vmem:[%s7364_s3 + $0x130] ss:$8 sps:$4 sm:$0xff]  }
 0x308   :  { %v5356_v50 = vld [vmem:[%s7364_s3 + $0x144] ss:$8 sps:$4 sm:$0xff]  }
 0x309   :  { %v2541_v30 = vmax.f32 %v6747_v29, %v2479_v32  ;;  %v2482_v58 = vadd.f32 %v7443_v57, %v2161_v52  ;;  %v6884_v20 = vpack.c.bf16 %v2597_v35, %v2596_v11  ;;  %v5353_v11 = vld [vmem:[%s7364_s3 + $0x134] ss:$8 sps:$4 sm:$0xff]  }
 0x30a   :  { %2975 = vmatpush1.bf16.msra.mxu1 %v5336_v41 }
 0x30b   :  { %v2580_v5 = vadd.f32 %v6795_v60, %v2541_v30  ;;  %v2544_v45 = vmax.f32 %v6753_v28, %v2482_v58  ;;  %2976 = vmatprep.subr.bf16.mxu1 %v5341_v54  ;;  %v7445_v28 = vld [vmem:[#allocation26_spill] sm:$0xff] }
 0x30c   :  { %v2165_v4 = vpop.f32.mrb[132].mxu0 }
 0x30d   :  { %v2581_v29 = vadd.f32 %v6795_v60, %v2544_v45  ;;  %v2166_v23 = vadd.f32 %v2165_v4, %v7444_v46  ;;  %v2167_v24 = vpop.f32.mrb[133].mxu0  ;;  %v2598_v6 = vmax.f32 %v2580_v5, 0.0 }
 0x30e   :  { %2977 = vmatpush1.bf16.msra.mxu1 %v5339_v21  ;;  %v2168_v13 = vpop.f32.mrb[134].mxu0  ;;  %v5354_v21 = vld [vmem:[%s7364_s3 + $0x140] ss:$8 sps:$4 sm:$0xff]  }
 0x30f   :  { %v2599_v27 = vmax.f32 %v2581_v29, 0.0  ;;  %v2487_v59 = vadd.f32 %v7445_v28, %v2166_v23  ;;  %v2169_v43 = vadd.f32 %v2168_v13, %v7446_v53  ;;  %3085 = vmatprep.subr.bf16.mxu1 %v5344_v39  ;;  %v2170_v48 = vpop.f32.mrb[135].mxu0  ;;  %v7451_v39 = vld [vmem:[#allocation13_spill] sm:$0xff] }
 0x310   :  { %v5359_v29 = vld [vmem:[%s7364_s3 + $0x154] ss:$8 sps:$4 sm:$0xff]   ;;  %v5366_v48 = vld [vmem:[%s7364_s3 + $0x180] ss:$8 sps:$4 sm:$0xff]  }
 0x311   :  { %v6904_v55 = vpack.c.bf16 %v2599_v27, %v2598_v6  ;;  %v2547_v8 = vmax.f32 %v6759_v38, %v2487_v59  ;;  %v2490_v17 = vadd.f32 %v7447_v42, %v2169_v43  ;;  %2995 = vmatmul.mubr.bf16.vlgmr.msra.gmra.mrb[96].mxu1 %v6803_v56  ;;  %v5350_v38 = vld [vmem:[%s7364_s3 + $0x124] ss:$8 sps:$4 sm:$0xff]   ;;  %v5365_v53 = vld [vmem:[%s7364_s3 + $0x174] ss:$8 sps:$4 sm:$0xff]   ;;  %v5363_v43 = vld [vmem:[%s7364_s3 + $0x170] ss:$8 sps:$4 sm:$0xff]  }
 0x312   :  { %3086 = vmatpush1.bf16.msra.mxu1 %v5342_v3  ;;  %3117 = vmatprep.mubr.bf16.mxu1 %v7431_v36  ;;  %v7448_v56 = vld [vmem:[#allocation10_spill] sm:$0xff]  ;;  %v5357_v3 = vld [vmem:[%s7364_s3 + $0x150] ss:$8 sps:$4 sm:$0xff]  }
 0x313   :  { %v2582_v15 = vadd.f32 %v6795_v60, %v2547_v8  ;;  %v2550_v31 = vmax.f32 %v6765_v2, %v2490_v17  ;;  %3087 = vmatprep.subr.bf16.mxu1 %v5347_v33  ;;  %v7449_v2 = vld [vmem:[#allocation11_spill] sm:$0xff]  ;;  %v5371_v33 = vld [vmem:[%s7364_s3 + $0x194] ss:$8 sps:$4 sm:$0xff]   ;;  %v5369_v8 = vld [vmem:[%s7364_s3 + $0x190] ss:$8 sps:$4 sm:$0xff]  }
 0x314   :  { %v2173_v12 = vpop.f32.mrb[136].mxu0  ;;  %v5362_v27 = vld [vmem:[%s7364_s3 + $0x164] ss:$8 sps:$4 sm:$0xff]   ;;  %v5372_v17 = vld [vmem:[%s7364_s3 + $0x1a0] ss:$8 sps:$4 sm:$0xff]  }
 0x315   :  { %v2583_v44 = vadd.f32 %v6795_v60, %v2550_v31  ;;  %v2174_v47 = vadd.f32 %v2173_v12, %v7448_v56  ;;  %v2175_v1 = vpop.f32.mrb[137].mxu0  ;;  %v2600_v49 = vmax.f32 %v2582_v15, 0.0  ;;  %v5374_v42 = vld [vmem:[%s7364_s3 + $0x1a4] ss:$8 sps:$4 sm:$0xff]   ;;  %v5378_v31 = vld [vmem:[%s7364_s3 + $0x1c0] ss:$8 sps:$4 sm:$0xff]  }
 0x316   :  { %3088 = vmatpush1.bf16.msra.mxu1 %v5345_v40  ;;  %v2176_v34 = vpop.f32.mrb[138].mxu0  ;;  %v5375_v40 = vld [vmem:[%s7364_s3 + $0x1b0] ss:$8 sps:$4 sm:$0xff]   ;;  %v5380_v15 = vld [vmem:[%s7364_s3 + $0x1c4] ss:$8 sps:$4 sm:$0xff]  }
 0x317   :  { %v2601_v18 = vmax.f32 %v2583_v44, 0.0  ;;  %v2177_v0 = vadd.f32 %v2176_v34, %v7449_v2  ;;  %v2495_v61 = vadd.f32 %v6684_v22, %v2174_v47  ;;  %3089 = vmatprep.subr.bf16.mxu1 %v5350_v38  ;;  %v2178_v41 = vpop.f32.mrb[139].mxu0  ;;  %v5383_v38 = vld [vmem:[%s7364_s3 + $0x1d4] ss:$8 sps:$4 sm:$0xff]   ;;  %v5381_v12 = vld [vmem:[%s7364_s3 + $0x1d0] ss:$8 sps:$4 sm:$0xff]  }
 0x318   :  { %v5386_v44 = vld [vmem:[%s7364_s3 + $0x1e4] ss:$8 sps:$4 sm:$0xff]   ;;  %v5384_v56 = vld [vmem:[%s7364_s3 + $0x1e0] ss:$8 sps:$4 sm:$0xff]   ;;  %v5389_v47 = vld [vmem:[%s7364_s3 + $0x1f4] ss:$8 sps:$4 sm:$0xff]  }
 0x319   :  { %v2553_v35 = vmax.f32 %v6771_v9, %v2495_v61  ;;  %v2498_v7 = vadd.f32 %v6693_v14, %v2177_v0  ;;  %v6930_v52 = vpack.c.bf16 %v2601_v18, %v2600_v49  ;;  %v7450_v14 = vld [vmem:[#allocation12_spill] sm:$0xff]  ;;  %v5392_v34 = vld [vmem:[%s7364_s3 + $0x204] ss:$8 sps:$4 sm:$0xff]   ;;  %v5396_v0 = vld [vmem:[%s7364_s3 + $0x220] ss:$8 sps:$4 sm:$0xff]  }
 0x31a   :  { %3090 = vmatpush1.bf16.msra.mxu1 %v5348_v10  ;;  %v5387_v1 = vld [vmem:[%s7364_s3 + $0x1f0] ss:$8 sps:$4 sm:$0xff]   ;;  %v5390_v10 = vld [vmem:[%s7364_s3 + $0x200] ss:$8 sps:$4 sm:$0xff]   ;;  %v5395_v49 = vld [vmem:[%s7364_s3 + $0x214] ss:$8 sps:$4 sm:$0xff]  }
 0x31b   :  { %v2584_v32 = vadd.f32 %v6795_v60, %v2553_v35  ;;  %v2556_v22 = vmax.f32 %v6777_v19, %v2498_v7  ;;  %3091 = vmatprep.subr.bf16.mxu1 %v5353_v11  ;;  %v5393_v18 = vld [vmem:[%s7364_s3 + $0x210] ss:$8 sps:$4 sm:$0xff]   ;;  %v5398_v2 = vld [vmem:[%s7364_s3 + $0x224] ss:$8 sps:$4 sm:$0xff]   ;;  %v5402_v11 = vld [vmem:[%s7364_s3 + $0x240] ss:$8 sps:$4 sm:$0xff]  }
 0x31c   :  { %v2181_v54 = vpop.f32.mrb[140].mxu0  ;;  %v5399_v61 = vld [vmem:[%s7364_s3 + $0x230] ss:$8 sps:$4 sm:$0xff]   ;;  %v5404_v41 = vld [vmem:[%s7364_s3 + $0x244] ss:$8 sps:$4 sm:$0xff]  }
 0x31d   :  { %v2585_v9 = vadd.f32 %v6795_v60, %v2556_v22  ;;  %v2182_v30 = vadd.f32 %v2181_v54, %v7450_v14  ;;  %v2183_v57 = vpop.f32.mrb[141].mxu0  ;;  %v2602_v5 = vmax.f32 %v2584_v32, 0.0  ;;  %v5407_v35 = vld [vmem:[%s7364_s3 + $0x254] ss:$8 sps:$4 sm:$0xff]   ;;  %v5405_v7 = vld [vmem:[%s7364_s3 + $0x250] ss:$8 sps:$4 sm:$0xff]  }
 0x31e   :  { %3092 = vmatpush1.bf16.msra.mxu1 %v5351_v16  ;;  %v2184_v58 = vpop.f32.mrb[142].mxu0  ;;  %v5410_v16 = vld [vmem:[%s7364_s3 + $0x264] ss:$8 sps:$4 sm:$0xff]   ;;  %v5408_v32 = vld [vmem:[%s7364_s3 + $0x260] ss:$8 sps:$4 sm:$0xff]  }
 0x31f   :  { %v2603_v45 = vmax.f32 %v2585_v9, 0.0  ;;  %v2503_v19 = vadd.f32 %v6676_v26, %v2182_v30  ;;  %v2185_v4 = vadd.f32 %v2184_v58, %v7451_v39  ;;  %3093 = vmatprep.subr.bf16.mxu1 %v5356_v50  ;;  %v2186_v46 = vpop.f32.mrb[143].mxu0  ;;  %v5413_v22 = vld [vmem:[%s7364_s3 + $0x274] ss:$8 sps:$4 sm:$0xff]   ;;  %v5411_v50 = vld [vmem:[%s7364_s3 + $0x270] ss:$8 sps:$4 sm:$0xff]  }
 0x320   :  { %v5416_v54 = vld [vmem:[%s7364_s3 + $0x284] ss:$8 sps:$4 sm:$0xff]   ;;  %v5414_v9 = vld [vmem:[%s7364_s3 + $0x280] ss:$8 sps:$4 sm:$0xff]   ;;  %v5419_v14 = vld [vmem:[%s7364_s3 + $0x294] ss:$8 sps:$4 sm:$0xff]  }
 0x321   :  { %v6950_v23 = vpack.c.bf16 %v2603_v45, %v2602_v5  ;;  %v2559_v24 = vmax.f32 %v6783_v63, %v2503_v19  ;;  %v2506_v13 = vadd.f32 %v6686_v37, %v2185_v4  ;;  %v5360_v37 = vld [vmem:[%s7364_s3 + $0x160] ss:$8 sps:$4 sm:$0xff]   ;;  %v5417_v30 = vld [vmem:[%s7364_s3 + $0x290] ss:$8 sps:$4 sm:$0xff]   ;;  %v5422_v57 = vld [vmem:[%s7364_s3 + $0x2a4] ss:$8 sps:$4 sm:$0xff]  }
 0x322   :  { %3094 = vmatpush1.bf16.msra.mxu1 %v5354_v21  ;;  %v5420_v58 = vld [vmem:[%s7364_s3 + $0x2a0] ss:$8 sps:$4 sm:$0xff]   ;;  %v5423_v21 = vld [vmem:[%s7364_s3 + $0x2b0] ss:$8 sps:$4 sm:$0xff]   ;;  %v5428_v5 = vld [vmem:[%s7364_s3 + $0x2c4] ss:$8 sps:$4 sm:$0xff]  }
 0x323   :  { %v2586_v26 = vadd.f32 %v6795_v60, %v2559_v24  ;;  %v2562_v6 = vmax.f32 %v6789_v51, %v2506_v13  ;;  %3095 = vmatprep.subr.bf16.mxu1 %v5359_v29  ;;  %v5426_v45 = vld [vmem:[%s7364_s3 + $0x2c0] ss:$8 sps:$4 sm:$0xff]   ;;  %v5431_v19 = vld [vmem:[%s7364_s3 + $0x2d4] ss:$8 sps:$4 sm:$0xff]   ;;  %v5429_v39 = vld [vmem:[%s7364_s3 + $0x2d0] ss:$8 sps:$4 sm:$0xff]  }
 0x324   :  { %v5434_v4 = vld [vmem:[%s7364_s3 + $0x2e4] ss:$8 sps:$4 sm:$0xff]   ;;  %v5432_v29 = vld [vmem:[%s7364_s3 + $0x2e0] ss:$8 sps:$4 sm:$0xff]   ;;  %v5437_v46 = vld [vmem:[%s7364_s3 + $0x2f4] ss:$8 sps:$4 sm:$0xff]  }
 0x325   :  { %v2587_v28 = vadd.f32 %v6795_v60, %v2562_v6  ;;  %v2604_v63 = vmax.f32 %v2586_v26, 0.0  ;;  %v5368_v60 = vld [vmem:[%s7364_s3 + $0x184] ss:$8 sps:$4 sm:$0xff]   ;;  %v5435_v24 = vld [vmem:[%s7364_s3 + $0x2f0] ss:$8 sps:$4 sm:$0xff]  }
 0x326   :  { %3096 = vmatpush1.bf16.msra.mxu1 %v5357_v3  ;;  %v5440_v13 = vld [vmem:[%s7364_s3 + $0x304] ss:$8 sps:$4 sm:$0xff]   ;;  %v5438_v3 = vld [vmem:[%s7364_s3 + $0x300] ss:$8 sps:$4 sm:$0xff]   ;;  %v5443_v26 = vld [vmem:[%s7364_s3 + $0x314] ss:$8 sps:$4 sm:$0xff]  }
 0x327   :  { %v2605_v59 = vmax.f32 %v2587_v28, 0.0  ;;  %3097 = vmatprep.subr.bf16.mxu1 %v5362_v27  ;;  %v5441_v6 = vld [vmem:[%s7364_s3 + $0x310] ss:$8 sps:$4 sm:$0xff]   ;;  %v5446_v27 = vld [vmem:[%s7364_s3 + $0x324] ss:$8 sps:$4 sm:$0xff]  }
 0x328   :  { %v5444_v28 = vld [vmem:[%s7364_s3 + $0x320] ss:$8 sps:$4 sm:$0xff]  }
 0x329   :  { %v6969_v51 = vpack.c.bf16 %v2605_v59, %v2604_v63  ;;  %v5452_v63 = vld [vmem:[%s7364_s3 + $0x344] ss:$8 sps:$4 sm:$0xff]   ;;  %v5450_v59 = vld [vmem:[%s7364_s3 + $0x340] ss:$8 sps:$4 sm:$0xff]  }
 0x32a   :  { %3098 = vmatpush1.bf16.msra.mxu1 %v5360_v37  ;;  %v5447_v37 = vld [vmem:[%s7364_s3 + $0x330] ss:$8 sps:$4 sm:$0xff]  }
 0x32b   :  { %3099 = vmatprep.subr.bf16.mxu1 %v5365_v53  ;;  %v5455_v53 = vld [vmem:[%s7364_s3 + $0x354] ss:$8 sps:$4 sm:$0xff]  }
 0x32e   :  { %3100 = vmatpush1.bf16.msra.mxu1 %v5363_v43  ;;  %v5453_v43 = vld [vmem:[%s7364_s3 + $0x350] ss:$8 sps:$4 sm:$0xff]  }
 0x32f   :  { %3212 = vmatprep.subr.bf16.mxu1 %v5368_v60  ;;  %v5458_v60 = vld [vmem:[%s7364_s3 + $0x364] ss:$8 sps:$4 sm:$0xff]  }
 0x331   :  { %3118 = vmatmul.mubr.bf16.vlgmr.msra.gmra.mrb[96].mxu1 %v6833_v62  ;;  %v5377_v62 = vld [vmem:[%s7364_s3 + $0x1b4] ss:$8 sps:$4 sm:$0xff]  }
 0x332   :  { %3213 = vmatpush1.bf16.msra.mxu1 %v5366_v48  ;;  %3244 = vmatprep.mubr.bf16.mxu1 %v7431_v36  ;;  %v5456_v48 = vld [vmem:[%s7364_s3 + $0x360] ss:$8 sps:$4 sm:$0xff]  }
 0x333   :  { %3214 = vmatprep.subr.bf16.mxu1 %v5371_v33  ;;  %v5461_v33 = vld [vmem:[%s7364_s3 + $0x374] ss:$8 sps:$4 sm:$0xff]  }
 0x336   :  { %3215 = vmatpush1.bf16.msra.mxu1 %v5369_v8  ;;  %v5459_v8 = vld [vmem:[%s7364_s3 + $0x370] ss:$8 sps:$4 sm:$0xff]  }
 0x337   :  { %3216 = vmatprep.subr.bf16.mxu1 %v5374_v42  ;;  %v5464_v42 = vld [vmem:[%s7364_s3 + $0x384] ss:$8 sps:$4 sm:$0xff]  }
 0x33a   :  { %3217 = vmatpush1.bf16.msra.mxu1 %v5372_v17  ;;  %v5462_v17 = vld [vmem:[%s7364_s3 + $0x380] ss:$8 sps:$4 sm:$0xff]  }
 0x33b   :  { %3218 = vmatprep.subr.bf16.mxu1 %v5377_v62  ;;  %v5467_v62 = vld [vmem:[%s7364_s3 + $0x394] ss:$8 sps:$4 sm:$0xff]  }
 0x33e   :  { %3219 = vmatpush1.bf16.msra.mxu1 %v5375_v40  ;;  %v5465_v40 = vld [vmem:[%s7364_s3 + $0x390] ss:$8 sps:$4 sm:$0xff]  }
 0x33f   :  { %3220 = vmatprep.subr.bf16.mxu1 %v5380_v15  ;;  %v5470_v15 = vld [vmem:[%s7364_s3 + $0x3a4] ss:$8 sps:$4 sm:$0xff]  }
 0x342   :  { %3221 = vmatpush1.bf16.msra.mxu1 %v5378_v31  ;;  %v5468_v31 = vld [vmem:[%s7364_s3 + $0x3a0] ss:$8 sps:$4 sm:$0xff]  }
 0x343   :  { %3222 = vmatprep.subr.bf16.mxu1 %v5383_v38  ;;  %v5471_v38 = vld [vmem:[%s7364_s3 + $0x3b0] ss:$8 sps:$4 sm:$0xff]  }
 0x346   :  { %3223 = vmatpush1.bf16.msra.mxu1 %v5381_v12  ;;  %v5476_v12 = vld [vmem:[%s7364_s3 + $0x3c4] ss:$8 sps:$4 sm:$0xff]  }
 0x347   :  { %3224 = vmatprep.subr.bf16.mxu1 %v5386_v44  ;;  %v5474_v44 = vld [vmem:[%s7364_s3 + $0x3c0] ss:$8 sps:$4 sm:$0xff]  }
 0x34a   :  { %3225 = vmatpush1.bf16.msra.mxu1 %v5384_v56  ;;  %v5479_v56 = vld [vmem:[%s7364_s3 + $0x3d4] ss:$8 sps:$4 sm:$0xff]  }
 0x34b   :  { %3226 = vmatprep.subr.bf16.mxu1 %v5389_v47  ;;  %v5477_v47 = vld [vmem:[%s7364_s3 + $0x3d0] ss:$8 sps:$4 sm:$0xff]  }
 0x34e   :  { %3227 = vmatpush1.bf16.msra.mxu1 %v5387_v1  ;;  %v5482_v1 = vld [vmem:[%s7364_s3 + $0x3e4] ss:$8 sps:$4 sm:$0xff]  }
 0x34f   :  { %3339 = vmatprep.subr.bf16.mxu1 %v5392_v34  ;;  %v5480_v34 = vld [vmem:[%s7364_s3 + $0x3e0] ss:$8 sps:$4 sm:$0xff]  }
 0x351   :  { %3245 = vmatmul.mubr.bf16.vlgmr.msra.gmra.mrb[96].mxu1 %v6860_v25  ;;  %v5401_v25 = vld [vmem:[%s7364_s3 + $0x234] ss:$8 sps:$4 sm:$0xff]  }
 0x352   :  { %3340 = vmatpush1.bf16.msra.mxu1 %v5390_v10  ;;  %3371 = vmatprep.mubr.bf16.mxu1 %v7431_v36  ;;  %v5485_v10 = vld [vmem:[%s7364_s3 + $0x3f4] ss:$8 sps:$4 sm:$0xff]  }
 0x353   :  { %3341 = vmatprep.subr.bf16.mxu1 %v5395_v49  ;;  %v5483_v49 = vld [vmem:[%s7364_s3 + $0x3f0] ss:$8 sps:$4 sm:$0xff]  }
 0x356   :  { %3342 = vmatpush1.bf16.msra.mxu1 %v5393_v18  ;;  %v5488_v18 = vld [vmem:[%s7364_s3 + $0x404] ss:$8 sps:$4 sm:$0xff]  }
 0x357   :  { %3343 = vmatprep.subr.bf16.mxu1 %v5398_v2  ;;  %v5486_v2 = vld [vmem:[%s7364_s3 + $0x400] ss:$8 sps:$4 sm:$0xff]  }
 0x35a   :  { %3344 = vmatpush1.bf16.msra.mxu1 %v5396_v0  ;;  %v5491_v0 = vld [vmem:[%s7364_s3 + $0x414] ss:$8 sps:$4 sm:$0xff]  }
 0x35b   :  { %3345 = vmatprep.subr.bf16.mxu1 %v5401_v25  ;;  %v5489_v25 = vld [vmem:[%s7364_s3 + $0x410] ss:$8 sps:$4 sm:$0xff]  }
 0x35e   :  { %3346 = vmatpush1.bf16.msra.mxu1 %v5399_v61  ;;  %v5494_v61 = vld [vmem:[%s7364_s3 + $0x424] ss:$8 sps:$4 sm:$0xff]  }
 0x35f   :  { %3347 = vmatprep.subr.bf16.mxu1 %v5404_v41  ;;  %v5492_v41 = vld [vmem:[%s7364_s3 + $0x420] ss:$8 sps:$4 sm:$0xff]  }
 0x362   :  { %3348 = vmatpush1.bf16.msra.mxu1 %v5402_v11  ;;  %v5500_v11 = vld [vmem:[%s7364_s3 + $0x444] ss:$8 sps:$4 sm:$0xff]  }
 0x363   :  { %3349 = vmatprep.subr.bf16.mxu1 %v5407_v35  ;;  %v5498_v35 = vld [vmem:[%s7364_s3 + $0x440] ss:$8 sps:$4 sm:$0xff]  }
 0x366   :  { %3350 = vmatpush1.bf16.msra.mxu1 %v5405_v7  ;;  %v5503_v7 = vld [vmem:[%s7364_s3 + $0x454] ss:$8 sps:$4 sm:$0xff]  }
 0x367   :  { %3351 = vmatprep.subr.bf16.mxu1 %v5410_v16  ;;  %v5501_v16 = vld [vmem:[%s7364_s3 + $0x450] ss:$8 sps:$4 sm:$0xff]  }
 0x36a   :  { %3352 = vmatpush1.bf16.msra.mxu1 %v5408_v32  ;;  %v5506_v32 = vld [vmem:[%s7364_s3 + $0x464] ss:$8 sps:$4 sm:$0xff]  }
 0x36b   :  { %3353 = vmatprep.subr.bf16.mxu1 %v5413_v22  ;;  %v5504_v22 = vld [vmem:[%s7364_s3 + $0x460] ss:$8 sps:$4 sm:$0xff]  }
 0x36e   :  { %3354 = vmatpush1.bf16.msra.mxu1 %v5411_v50  ;;  %v5509_v50 = vld [vmem:[%s7364_s3 + $0x474] ss:$8 sps:$4 sm:$0xff]  }
 0x36f   :  { %3466 = vmatprep.subr.bf16.mxu1 %v5416_v54  ;;  %v5507_v54 = vld [vmem:[%s7364_s3 + $0x470] ss:$8 sps:$4 sm:$0xff]  }
 0x371   :  { %3372 = vmatmul.mubr.bf16.vlgmr.msra.gmra.mrb[96].mxu1 %v6884_v20  ;;  %v5425_v20 = vld [vmem:[%s7364_s3 + $0x2b4] ss:$8 sps:$4 sm:$0xff]  }
 0x372   :  { %3467 = vmatpush1.bf16.msra.mxu1 %v5414_v9  ;;  %3498 = vmatprep.mubr.bf16.mxu1 %v7431_v36  ;;  %v5510_v9 = vld [vmem:[%s7366_s5 + $0x40] sm:$0xff]  }
 0x373   :  { %3468 = vmatprep.subr.bf16.mxu1 %v5419_v14  ;;  %v5511_v14 = vld [vmem:[%s7366_s5] sm:$0xff]  }
 0x376   :  { %3469 = vmatpush1.bf16.msra.mxu1 %v5417_v30  ;;  %v5512_v30 = vld [vmem:[%s7366_s5 + $0x48] sm:$0xff]  }
 0x377   :  { %3470 = vmatprep.subr.bf16.mxu1 %v5422_v57  ;;  %v5513_v57 = vld [vmem:[%s7366_s5 + $0x8] sm:$0xff]  }
 0x37a   :  { %3471 = vmatpush1.bf16.msra.mxu1 %v5420_v58  ;;  %v5514_v58 = vld [vmem:[%s7366_s5 + $0x50] sm:$0xff]  }
 0x37b   :  { %3472 = vmatprep.subr.bf16.mxu1 %v5425_v20  ;;  %v5515_v20 = vld [vmem:[%s7366_s5 + $0x10] sm:$0xff]  }
 0x37e   :  { %3473 = vmatpush1.bf16.msra.mxu1 %v5423_v21  ;;  %v5517_v21 = vld [vmem:[%s7366_s5 + $0x18] sm:$0xff]  }
 0x37f   :  { %3474 = vmatprep.subr.bf16.mxu1 %v5428_v5  ;;  %v5518_v5 = vld [vmem:[%s7366_s5 + $0x60] sm:$0xff]  }
 0x382   :  { %3475 = vmatpush1.bf16.msra.mxu1 %v5426_v45  ;;  %v5519_v45 = vld [vmem:[%s7366_s5 + $0x20] sm:$0xff]  }
 0x383   :  { %3476 = vmatprep.subr.bf16.mxu1 %v5431_v19  ;;  %v5520_v19 = vld [vmem:[%s7366_s5 + $0x68] sm:$0xff]  }
 0x386   :  { %3477 = vmatpush1.bf16.msra.mxu1 %v5429_v39  ;;  %v5521_v39 = vld [vmem:[%s7366_s5 + $0x28] sm:$0xff]  }
 0x387   :  { %3478 = vmatprep.subr.bf16.mxu1 %v5434_v4  ;;  %v5522_v4 = vld [vmem:[%s7366_s5 + $0x70] sm:$0xff]  }
 0x38a   :  { %3479 = vmatpush1.bf16.msra.mxu1 %v5432_v29  ;;  %v5523_v29 = vld [vmem:[%s7366_s5 + $0x30] sm:$0xff]  }
 0x38b   :  { %3480 = vmatprep.subr.bf16.mxu1 %v5437_v46  ;;  %v5524_v46 = vld [vmem:[%s7366_s5 + $0x78] sm:$0xff]  }
 0x38e   :  { %3481 = vmatpush1.bf16.msra.mxu1 %v5435_v24  ;;  %v5525_v24 = vld [vmem:[%s7366_s5 + $0x38] sm:$0xff]  }
 0x38f   :  { %3593 = vmatprep.subr.bf16.mxu1 %v5440_v13  ;;  %v5535_v13 = vmov 0.0  }
 0x391   :  { %3499 = vmatmul.mubr.bf16.vlgmr.msra.gmra.mrb[96].mxu1 %v6904_v55  ;;  %v5449_v55 = vld [vmem:[%s7364_s3 + $0x334] ss:$8 sps:$4 sm:$0xff]  }
 0x392   :  { %3594 = vmatpush1.bf16.msra.mxu1 %v5438_v3  ;;  %3625 = vmatprep.mubr.bf16.mxu1 %v7431_v36  ;;  %v3896_v3 = vlaneseq }
 0x393   :  { %3595 = vmatprep.subr.bf16.mxu1 %v5443_v26 }
 0x394   :  { %v3897_v26 = vshrl.u32 %v3896_v3, 7 }
 0x396   :  { %3596 = vmatpush1.bf16.msra.mxu1 %v5441_v6  ;;  %v3898_v6 = vsub.s32 0, %v3897_v26 }
 0x397   :  { %3597 = vmatprep.subr.bf16.mxu1 %v5446_v27  ;;  %v3894_v27 = vld [vmem:[%s7368_s4] sm:$0x3] }
 0x39a   :  { %3598 = vmatpush1.bf16.msra.mxu1 %v5444_v28  ;;  %v3902_v28 = vsub.s32 1, %v3897_v26 }
 0x39b   :  { %3599 = vmatprep.subr.bf16.mxu1 %v5449_v55  ;;  %v3899_v55 = vrot.slane %v3894_v27, %v3898_v6 }
 0x39e   :  { %3600 = vmatpush1.bf16.msra.mxu1 %v5447_v37  ;;  %v3903_v37 = vrot.slane %v3894_v27, %v3902_v28 }
 0x39f   :  { %3601 = vmatprep.subr.bf16.mxu1 %v5452_v63 }
 0x3a2   :  { %3602 = vmatpush1.bf16.msra.mxu1 %v5450_v59 }
 0x3a3   :  { %3603 = vmatprep.subr.bf16.mxu1 %v5455_v53 }
 0x3a6   :  { %3604 = vmatpush1.bf16.msra.mxu1 %v5453_v43 }
 0x3a7   :  { %3605 = vmatprep.subr.bf16.mxu1 %v5458_v60 }
 0x3aa   :  { %3606 = vmatpush1.bf16.msra.mxu1 %v5456_v48 }
 0x3ab   :  { %3607 = vmatprep.subr.bf16.mxu1 %v5461_v33 }
 0x3ae   :  { %3608 = vmatpush1.bf16.msra.mxu1 %v5459_v8 }
 0x3af   :  { %3720 = vmatprep.subr.bf16.mxu1 %v5464_v42 }
 0x3b1   :  { %3626 = vmatmul.mubr.bf16.vlgmr.msra.gmra.mrb[96].mxu1 %v6930_v52  ;;  %v5473_v52 = vld [vmem:[%s7364_s3 + $0x3b4] ss:$8 sps:$4 sm:$0xff]  }
 0x3b2   :  { %3721 = vmatpush1.bf16.msra.mxu1 %v5462_v17  ;;  %3752 = vmatprep.mubr.bf16.mxu1 %v7431_v36 }
 0x3b3   :  { %3722 = vmatprep.subr.bf16.mxu1 %v5467_v62 }
 0x3b6   :  { %3723 = vmatpush1.bf16.msra.mxu1 %v5465_v40 }
 0x3b7   :  { %3724 = vmatprep.subr.bf16.mxu1 %v5470_v15 }
 0x3ba   :  { %3725 = vmatpush1.bf16.msra.mxu1 %v5468_v31 }
 0x3bb   :  { %3726 = vmatprep.subr.bf16.mxu1 %v5473_v52  ;;  %v5526_v52 = vld [vmem:[%s7367_s7] sm:$0xff]  }
 0x3be   :  { %3727 = vmatpush1.bf16.msra.mxu1 %v5471_v38  ;;  %v5527_v38 = vld [vmem:[%s7367_s7 + $0x8] sm:$0xff]  }
 0x3bf   :  { %3728 = vmatprep.subr.bf16.mxu1 %v5476_v12  ;;  %v5528_v12 = vld [vmem:[%s7367_s7 + $0x10] sm:$0xff]  }
 0x3c2   :  { %3729 = vmatpush1.bf16.msra.mxu1 %v5474_v44  ;;  %v5529_v44 = vld [vmem:[%s7367_s7 + $0x18] sm:$0xff]  }
 0x3c3   :  { %3730 = vmatprep.subr.bf16.mxu1 %v5479_v56  ;;  %v5530_v56 = vld [vmem:[%s7367_s7 + $0x20] sm:$0xff]  }
 0x3c6   :  { %3731 = vmatpush1.bf16.msra.mxu1 %v5477_v47  ;;  %v5531_v47 = vld [vmem:[%s7367_s7 + $0x28] sm:$0xff]  }
 0x3c7   :  { %3732 = vmatprep.subr.bf16.mxu1 %v5482_v1  ;;  %v5532_v1 = vld [vmem:[%s7367_s7 + $0x30] sm:$0xff]  }
 0x3ca   :  { %3733 = vmatpush1.bf16.msra.mxu1 %v5480_v34  ;;  %v5533_v34 = vld [vmem:[%s7367_s7 + $0x38] sm:$0xff]  }
 0x3cb   :  { %3734 = vmatprep.subr.bf16.mxu1 %v5485_v10 }
 0x3ce   :  { %3735 = vmatpush1.bf16.msra.mxu1 %v5483_v49  ;;  %v4610_v49 = vld [vmem:[%s7369_s6] ss:$0 sm:$0xff] }
 0x3cf   :  { %3847 = vmatprep.subr.bf16.mxu1 %v5488_v18 }
 0x3d1   :  { %3753 = vmatmul.mubr.bf16.vlgmr.msra.gmra.mrb[96].mxu1 %v6950_v23  ;;  %v5497_v23 = vld [vmem:[%s7364_s3 + $0x434] ss:$8 sps:$4 sm:$0xff]  }
 0x3d2   :  { %3848 = vmatpush1.bf16.msra.mxu1 %v5486_v2  ;;  %3879 = vmatprep.mubr.bf16.mxu1 %v7431_v36  ;;  %v5495_v36 = vld [vmem:[%s7364_s3 + $0x430] ss:$8 sps:$4 sm:$0xff]  }
 0x3d3   :  { %3849 = vmatprep.subr.bf16.mxu1 %v5491_v0 }
 0x3d6   :  { %3850 = vmatpush1.bf16.msra.mxu1 %v5489_v25 }
 0x3d7   :  { %3851 = vmatprep.subr.bf16.mxu1 %v5494_v61 }
 0x3da   :  { %3852 = vmatpush1.bf16.msra.mxu1 %v5492_v41 }
 0x3db   :  { %3853 = vmatprep.subr.bf16.mxu1 %v5497_v23 }
 0x3de   :  { %3854 = vmatpush1.bf16.msra.mxu1 %v5495_v36 }
 0x3df   :  { %3855 = vmatprep.subr.bf16.mxu1 %v5500_v11 }
 0x3e2   :  { %3856 = vmatpush1.bf16.msra.mxu1 %v5498_v35 }
 0x3e3   :  { %3857 = vmatprep.subr.bf16.mxu1 %v5503_v7  ;;  %v4627_v7 = vld [vmem:[%s7370_s8] ss:$0 sm:$0xff] }
 0x3e6   :  { %3858 = vmatpush1.bf16.msra.mxu1 %v5501_v16 }
 0x3e7   :  { %3859 = vmatprep.subr.bf16.mxu1 %v5506_v32 }
 0x3ea   :  { %3860 = vmatpush1.bf16.msra.mxu1 %v5504_v22 }
 0x3eb   :  { %3861 = vmatprep.subr.bf16.mxu1 %v5509_v50 }
 0x3ee   :  { %3862 = vmatpush1.bf16.msra.mxu1 %v5507_v54 }
 0x3ef   :  { %4676 = vmatprep.subr.bf16.mxu1 %v5510_v9 }
 0x3f1   :  { %3880 = vmatmul.mubr.bf16.vlgmr.msra.gmra.mrb[96].mxu1 %v6969_v51  ;;  %v5516_v51 = vld [vmem:[%s7366_s5 + $0x58] sm:$0xff]  }
 0x3f2   :  { %4677 = vmatpush3.bf16.msra.mxu1 %v5511_v14 }
 0x3f3   :  { %4678 = vmatprep.subr.bf16.mxu1 %v5512_v30 }
 0x3f6   :  { %4679 = vmatpush3.bf16.msra.mxu1 %v5513_v57 }
 0x3f7   :  { %4680 = vmatprep.subr.bf16.mxu1 %v5514_v58 }
 0x3fa   :  { %4681 = vmatpush3.bf16.msra.mxu1 %v5515_v20 }
 0x3fb   :  { %4682 = vmatprep.subr.bf16.mxu1 %v5516_v51 }
 0x3fe   :  { %4683 = vmatpush3.bf16.msra.mxu1 %v5517_v21 }
 0x3ff   :  { %4684 = vmatprep.subr.bf16.mxu1 %v5518_v5 }
 0x402   :  { %4685 = vmatpush3.bf16.msra.mxu1 %v5519_v45 }
 0x403   :  { %4686 = vmatprep.subr.bf16.mxu1 %v5520_v19 }
 0x406   :  { %4687 = vmatpush3.bf16.msra.mxu1 %v5521_v39 }
 0x407   :  { %4688 = vmatprep.subr.bf16.mxu1 %v5522_v4 }
 0x40a   :  { %4689 = vmatpush3.bf16.msra.mxu1 %v5523_v29 }
 0x40b   :  { %4690 = vmatprep.subr.bf16.mxu1 %v5524_v46 }
 0x40e   :  { %4691 = vmatpush3.bf16.msra.mxu1 %v5525_v24 }
 0x40f   :  { %4787 = vmatprep.subr.bf16.mxu1 %v5535_v13 }
 0x4c4   :  { %v3881_v63 = vpop.f32.mrb[96].mxu1 }
 0x4c5   :  { %v3906_v59 = vadd.f32 %v3899_v55, %v3881_v63  ;;  %v3883_v53 = vpop.f32.mrb[97].mxu1 }
 0x4c6   :  { %v3907_v43 = vadd.f32 %v3903_v37, %v3883_v53  ;;  %v3885_v60 = vpop.f32.mrb[98].mxu1 }
 0x4c7   :  { %v3908_v48 = vadd.f32 %v3899_v55, %v3885_v60  ;;  %v3887_v33 = vpop.f32.mrb[99].mxu1  ;;  %v3910_v42 = vmax.f32 %v3906_v59, 0.0 }
 0x4c8   :  { %v3909_v8 = vadd.f32 %v3903_v37, %v3887_v33  ;;  %v3911_v62 = vmax.f32 %v3907_v43, 0.0 }
 0x4c9   :  { %v3912_v17 = vmax.f32 %v3908_v48, 0.0 }
 0x4ca   :  { %v3913_v40 = vmax.f32 %v3909_v8, 0.0 }
 0x4cb   :  { %v3914_v15 = vpack.c.bf16 %v3912_v17, %v3910_v42 }
 0x4cc   :  { %v3915_v31 = vpack.c.bf16 %v3913_v40, %v3911_v62 }
 0x4ce   :  { %4083 = vmatprep.mubr.bf16.mxu1 %v3915_v31 }
 0x4cf   :  { %4084 = vmatmul.mubr.bf16.vlgmr.msra.gmra.mrb[100].mxu1 %v3914_v15 }
 0x4d0   :  { %4788 = vmatpush3.bf16.msra.mxu1 %v5526_v52  ;;  %4803 = vmatprep.mubr.msk.bf16.mxu1 %vm5536_vm1, %v5535_v13 }
 0x4d1   :  { %4789 = vmatprep.subr.bf16.mxu1 %v5535_v13 }
 0x4d4   :  { %4790 = vmatpush3.bf16.msra.mxu1 %v5527_v38 }
 0x4d5   :  { %4791 = vmatprep.subr.bf16.mxu1 %v5535_v13 }
 0x4d8   :  { %4792 = vmatpush3.bf16.msra.mxu1 %v5528_v12 }
 0x4d9   :  { %4793 = vmatprep.subr.bf16.mxu1 %v5535_v13 }
 0x4dc   :  { %4794 = vmatpush3.bf16.msra.mxu1 %v5529_v44 }
 0x4dd   :  { %4795 = vmatprep.subr.bf16.mxu1 %v5535_v13 }
 0x4e0   :  { %4796 = vmatpush3.bf16.msra.mxu1 %v5530_v56 }
 0x4e1   :  { %4797 = vmatprep.subr.bf16.mxu1 %v5535_v13 }
 0x4e4   :  { %4798 = vmatpush3.bf16.msra.mxu1 %v5531_v47 }
 0x4e5   :  { %4799 = vmatprep.subr.bf16.mxu1 %v5535_v13 }
 0x4e8   :  { %4800 = vmatpush3.bf16.msra.mxu1 %v5532_v1 }
 0x4e9   :  { %4801 = vmatprep.subr.bf16.mxu1 %v5535_v13 }
 0x4ec   :  { %4802 = vmatpush3.bf16.msra.mxu1 %v5533_v34 }
 0x5a2   :  { %v4692_v10 = vpop.f32.mrb[100].mxu1 }
 0x5a3   :  { %v4693_v18 = vpop.f32.mrb[101].mxu1 }
 0x5a4   :  { %v4694_v2 = vadd.f32 %v4693_v18, %v4692_v10  ;;  %v4695_v0 = vpop.f32.mrb[102].mxu1 }
 0x5a5   :  { %v4696_v25 = vpop.f32.mrb[103].mxu1 }
 0x5a6   :  { %v4086_v61 = vadd.f32 %v4694_v2, %v4610_v49  ;;  %v4697_v41 = vadd.f32 %v4696_v25, %v4695_v0 }
 0x5a8   :  { %v4089_v23 = vadd.f32 %v4697_v41, %v4610_v49  ;;  %v4092_v36 = vmax.f32 %v4086_v61, 0.0 }
 0x5aa   :  { %v4093_v11 = vmax.f32 %v4089_v23, 0.0 }
 0x5ac   :  { %v4094_v35 = vpack.c.bf16 %v4093_v11, %v4092_v36 }
 0x5ae   :  { %4804 = vmatmul.mubr.bf16.vlgmr.msra.gmra.mrb[104].mxu1 %v4094_v35 }
 0x681   :  { %v4200_v16 = vpop.f32.mrb[104].mxu1 }
 0x682   :  { %v4201_v32 = vadd.f32 %v4627_v7, %v4200_v16  ;;  %v4805_v22 = vpop.f32.mrb[105].mxu1 }
 0x683   :  { %v4203_v50 = vpop.f32.mrb[106].mxu1 }
 0x684   :  { %4207 = vst [vmem:[%s7371_s9] sm:$0xff] %v4201_v32  ;;  %v4204_v54 = vadd.f32 %v4627_v7, %v4203_v50  ;;  %v4806_v9 = vpop.f32.mrb[107].mxu1 }
 0x686   :  { %4208 = vst [vmem:[%s7371_s9 + $0x8] sm:$0xff] %v4204_v54 }

</bundles_post_ra>
